<compile_context>
chip_gen: v7x
topology: tpu7x:2x2x1
jax: 0.10.0
libtpu: 0.0.40
codegen_flags: <defaults>
</compile_context>

<pallas_src>
import jax
import jax.numpy as jnp
from jax import lax
from jax.experimental import pallas as pl
from jax.experimental.pallas import tpu as pltpu


# ----------------------------- Pallas kernel --------------------------------
def _lstm_attn_kernel(
    x0_ref,                      # (T, B, E)   time-major embeddings
    wi1_ref, b1_ref, wh1_ref,    # (E, 8H), (1, 8H), (2H, 8H)
    wi2_ref, b2_ref, wh2_ref,    # (2H, 8H), (1, 8H), (2H, 8H)
    uw_ref, ub_ref,              # (2H, 2H), (1, 2H)
    lw_ref, lb_ref,              # (2H, O), (1, O)
    logits_ref,                  # out: (B, O)
    q_ref,                       # scratch (T, B, 8H)  fused gate input projections
    h1_ref, h2_ref,              # scratch (T, B, 2H)  fused [fwd|bwd] layer outputs
):
    T, B, H8 = q_ref.shape
    H2 = H8 // 4
    H = H2 // 2

    # Lane mask: within each per-gate (2H) block, first H lanes = fwd direction.
    fwd8 = (lax.broadcasted_iota(jnp.int32, (B, H8), 1) % H2) < H

    # Full unroll only for tiny static T; bounded unroll otherwise keeps
    # instruction memory / vreg live ranges sane while still letting the LLO
    # scheduler overlap loads & EUP with the MXU carry chain.
    unroll = True if T <= 16 else 8

    def run_layer(x, wi_ref, b_ref, wh_ref, hs_ref):
        # ---- hoisted input projection: ONE (T,B,Din)x(Din,8H) matmul, all 4
        #      gates x 2 directions fused along lanes, bias folded in ----------
        q_ref[...] = (
            lax.dot_general(x, wi_ref[...], (((2,), (0,)), ((), ())),
                            preferred_element_type=jnp.float32)
            + b_ref[...])

        # ---- hoisted fwd/bwd time alignment (in place, pairwise swap).
        #      After this pass q_ref[s] holds, per gate block,
        #      [fwd proj @ time s | bwd proj @ time T-1-s]. ---------------------
        for s in range((T + 1) // 2):
            rt = T - 1 - s
            a = q_ref[s]
            b = q_ref[rt]
            q_ref[s] = jnp.where(fwd8, a, b)
            q_ref[rt] = jnp.where(fwd8, b, a)

        w_hh = wh_ref[...]                       # (2H, 8H), hoisted out of loop

        # ---- fused fwd/bwd recurrence: step s handles time s (fwd) and time
        #      T-1-s (bwd); carry is [h_f|h_b], [c_f|c_b] of shape (B, 2H). ----
        def step(s, carry):
            h, c = carry
            # ONE fused recurrent matmul per serial step + one (B,8H) load.
            gates = (jnp.dot(h, w_hh, preferred_element_type=jnp.float32)
                     + q_ref[s])
            i_t = jax.nn.sigmoid(gates[:, 0 * H2:1 * H2])
            f_t = jax.nn.sigmoid(gates[:, 1 * H2:2 * H2])
            g_t = jnp.tanh(gates[:, 2 * H2:3 * H2])
            o_t = jax.nn.sigmoid(gates[:, 3 * H2:4 * H2])
            c_new = f_t * c + i_t * g_t
            h_new = o_t * jnp.tanh(c_new)

            # Time-aligned stores (off the carry dependence chain).
            # TODO(synk): at realistic sizes pick H a multiple of 128 so these
            # half-width stores become unmasked lane-dense vst (v5e lever).
            hs_ref[s, :, 0:H] = h_new[:, 0:H]            # forward hidden @ s
            hs_ref[T - 1 - s, :, H:H2] = h_new[:, H:H2]  # backward hidden @ T-1-s
            return (h_new, c_new)

        zeros = jnp.zeros((B, H2), jnp.float32)
        lax.fori_loop(0, T, step, (zeros, zeros), unroll=unroll)

    # ---- LSTM layer 1 (input = embeddings), layer 2 (input = layer-1 output) --
    run_layer(x0_ref[...], wi1_ref, b1_ref, wh1_ref, h1_ref)
    run_layer(h1_ref[...], wi2_ref, b2_ref, wh2_ref, h2_ref)

    # ---- Attention over the time axis + final label projection ---------------
    h_all = h2_ref[...]                                           # (T, B, 2H)
    xw = lax.dot_general(h_all, uw_ref[...], (((2,), (0,)), ((), ())),
                         preferred_element_type=jnp.float32) + ub_ref[...]
    # tanh(.) is bounded in (-1, 1) -> exp is numerically safe without the
    # max-subtraction pass (mathematically identical softmax).
    e = jnp.exp(jnp.tanh(xw))                                     # (T, B, 2H)
    den = jnp.sum(e, axis=0)                                      # (B, 2H)
    num = jnp.sum(e * h_all, axis=0)                              # (B, 2H)
    inv = pl.reciprocal(den, approx=True)                         # EUP slot
    inv = inv * (2.0 - den * inv)                                 # 1 NR step -> f32
    attn = num * inv
    logits_ref[...] = (jnp.dot(attn, lw_ref[...],
                               preferred_element_type=jnp.float32) + lb_ref[...])


# ------------------------------ Wrapper --------------------------------------
def attention_model_forward(input_ids, params):
    """input_ids: (B, T) int32 token ids. Returns logits (B, output_size)."""
    H = params["hidden_size"]
    emb = jnp.take(params["embedding"], input_ids, axis=0)        # (B, T, E)
    B, T, E = emb.shape
    x0 = jnp.transpose(emb, (1, 0, 2)).astype(jnp.float32)        # (T, B, E)
    O = params["label_w"].shape[0]
    H2, H8 = 2 * H, 8 * H

    def pack_layer(fwd, bwd):
        w_ih_f, w_hh_f, b_ih_f, b_hh_f = fwd
        w_ih_b, w_hh_b, b_ih_b, b_hh_b = bwd
        wi_cols, b_cols = [], []
        wh = jnp.zeros((H2, H8), jnp.float32)
        for g in range(4):                       # PyTorch gate order: i, f, g, o
            sl = slice(g * H, (g + 1) * H)
            # gate block g occupies output cols [g*2H, (g+1)*2H): [fwd H | bwd H]
            wi_cols += [w_ih_f[sl].T, w_ih_b[sl].T]               # (Din, H) each
            b_cols += [b_ih_f[sl] + b_hh_f[sl], b_ih_b[sl] + b_hh_b[sl]]
            wh = wh.at[:H, (2 * g) * H:(2 * g + 1) * H].set(w_hh_f[sl].T)
            wh = wh.at[H:, (2 * g + 1) * H:(2 * g + 2) * H].set(w_hh_b[sl].T)
        wi = jnp.concatenate(wi_cols, axis=1)                     # (Din, 8H)
        bias = jnp.concatenate(b_cols)[None, :]                   # (1, 8H)
        return wi, bias, wh

    wi1, b1, wh1 = pack_layer(params["lstm"]["l0f"], params["lstm"]["l0b"])
    wi2, b2, wh2 = pack_layer(params["lstm"]["l1f"], params["lstm"]["l1b"])

    # TODO(synk): at realistic sizes cast MXU operands (wi/wh/uw/lw and the
    # q/h scratches) to bf16 (keep f32 accumulation + f32 h/c carries), add a
    # parallel batch grid to use v7x's second TensorCore and shrink per-core
    # scratch, and stream q from HBM (pl.ANY + make_async_copy double-buffer)
    # for long T against the v7x 64 MiB VMEM limit.
    args = [x0, wi1, b1, wh1, wi2, b2, wh2,
            params["u_w"].T, params["u_b"].reshape(1, -1),
            params["label_w"].T, params["label_b"].reshape(1, -1)]
    args = [a.astype(jnp.float32) for a in args]

    # Explicit scoped-VMEM limit (v5e/v6e defaults are 16/32 MiB):
    # f32 inputs + output + scratches, with 2x headroom.
    n_elems = (sum(int(a.size) for a in args) + B * O
               + T * B * H8 + 2 * T * B * H2)
    vmem_limit = int(max(8 * n_elems, 8 * 1024 * 1024))

    vmem = pl.BlockSpec(memory_space=pltpu.MemorySpace.VMEM)
    return pl.pallas_call(
        _lstm_attn_kernel,
        out_shape=jax.ShapeDtypeStruct((B, O), jnp.float32),
        in_specs=[vmem] * len(args),
        out_specs=vmem,
        scratch_shapes=[
            pltpu.VMEM((T, B, H8), jnp.float32),   # fused gate input projections
            pltpu.VMEM((T, B, H2), jnp.float32),   # layer-1 output [fwd|bwd]
            pltpu.VMEM((T, B, H2), jnp.float32),   # layer-2 output [fwd|bwd]
        ],
        compiler_params=pltpu.CompilerParams(vmem_limit_bytes=vmem_limit),
    )(*args)


# --------------------------- Pure-JAX reference -------------------------------
def _ref_forward(input_ids, params):
    emb = jnp.take(params["embedding"], input_ids, axis=0)        # (B, T, E)

    def lstm_dir(x, w_ih, w_hh, b_ih, b_hh, reverse):
        B, _, _ = x.shape
        H = w_hh.shape[1]
        xs = jnp.flip(x, 1) if reverse else x

        def step(carry, x_t):
            h, c = carry
            gates = x_t @ w_ih.T + h @ w_hh.T + b_ih + b_hh
            i, f, g, o = jnp.split(gates, 4, axis=-1)
            i, f, o = jax.nn.sigmoid(i), jax.nn.sigmoid(f), jax.nn.sigmoid(o)
            g = jnp.tanh(g)
            c = f * c + i * g
            h = o * jnp.tanh(c)
            return (h, c), h

        init = (jnp.zeros((B, H)), jnp.zeros((B, H)))
        _, hs = lax.scan(step, init, jnp.swapaxes(xs, 0, 1))
        hs = jnp.swapaxes(hs, 0, 1)                               # (B, T, H)
        return jnp.flip(hs, 1) if reverse else hs

    l = params["lstm"]
    x1 = jnp.concatenate([lstm_dir(emb, *l["l0f"], False),
                          lstm_dir(emb, *l["l0b"], True)], -1)
    out = jnp.concatenate([lstm_dir(x1, *l["l1f"], False),
                           lstm_dir(x1, *l["l1b"], True)], -1)    # (B, T, 2H)
    x = jnp.tanh(out @ params["u_w"].T + params["u_b"])
    a = jax.nn.softmax(x, axis=1)
    attn = jnp.sum(a * out, axis=1)
    return attn @ params["label_w"].T + params["label_b"]


# ------------------------------ Param init ------------------------------------
def make_params(key, vocab_size, embedding_length, hidden_size, output_size):
    ks = jax.random.split(key, 32)
    ki = iter(ks)
    scale = 1.0 / jnp.sqrt(hidden_size)

    def u(k, shape):
        return jax.random.uniform(k, shape, jnp.float32, -scale, scale)

    lstm = {}
    for li, in_sz in ((0, embedding_length), (1, 2 * hidden_size)):
        for d in ("f", "b"):
            lstm[f"l{li}{d}"] = (
                u(next(ki), (4 * hidden_size, in_sz)),        # weight_ih
                u(next(ki), (4 * hidden_size, hidden_size)),  # weight_hh
                u(next(ki), (4 * hidden_size,)),              # bias_ih
                u(next(ki), (4 * hidden_size,)),              # bias_hh
            )
    return {
        "hidden_size": hidden_size,
        "embedding": jax.random.normal(next(ki), (vocab_size, embedding_length),
                                       jnp.float32),
        "lstm": lstm,
        "u_w": u(next(ki), (2 * hidden_size, 2 * hidden_size)),
        "u_b": u(next(ki), (2 * hidden_size,)),
        "label_w": u(next(ki), (output_size, 2 * hidden_size)),
        "label_b": u(next(ki), (output_size,)),
    }


if __name__ == "__main__":
    batch, seq_len = 2, 8
    vocab_size, embedding_length, hidden_size, output_size = 50, 16, 32, 4

    key = jax.random.PRNGKey(0)
    kp, kx = jax.random.split(key)
    params = make_params(kp, vocab_size, embedding_length, hidden_size,
                         output_size)
    input_ids = jax.random.randint(kx, (batch, seq_len), 0, vocab_size,
                                   dtype=jnp.int32)

    logits = jax.block_until_ready(attention_model_forward(input_ids, params))
    ref = jax.block_until_ready(_ref_forward(input_ids, params))

    assert logits.shape == (batch, output_size)
    assert jnp.allclose(logits, ref, atol=1e-3, rtol=1e-3), (logits, ref)
    print("KERNEL_OK")
</pallas_src>

<mosaic_0001>
module attributes {stable_mosaic.version = 11 : i64} {
  func.func @_lstm_attn_kernel(%arg0: memref<8x2x16xf32, #tpu.memory_space<vmem>>, %arg1: memref<16x256xf32, #tpu.memory_space<vmem>>, %arg2: memref<1x256xf32, #tpu.memory_space<vmem>>, %arg3: memref<64x256xf32, #tpu.memory_space<vmem>>, %arg4: memref<64x256xf32, #tpu.memory_space<vmem>>, %arg5: memref<1x256xf32, #tpu.memory_space<vmem>>, %arg6: memref<64x256xf32, #tpu.memory_space<vmem>>, %arg7: memref<64x64xf32, #tpu.memory_space<vmem>>, %arg8: memref<1x64xf32, #tpu.memory_space<vmem>>, %arg9: memref<64x4xf32, #tpu.memory_space<vmem>>, %arg10: memref<1x4xf32, #tpu.memory_space<vmem>>, %arg11: memref<2x4xf32, #tpu.memory_space<vmem>>, %arg12: memref<8x2x256xf32, #tpu.memory_space<vmem>>, %arg13: memref<8x2x64xf32, #tpu.memory_space<vmem>>, %arg14: memref<8x2x64xf32, #tpu.memory_space<vmem>>) attributes {dimension_semantics = [], scalar_prefetch = 0 : i64, scratch_operands = 3 : i64, tpu.core_type = #tpu.core_type<tc>} {
    %0 = tpu.iota {dimensions = array<i32: 1>} : vector<2x256xi32>
    %c64_i32 = arith.constant 64 : i32
    %c0_i32 = arith.constant 0 : i32
    %1 = arith.cmpi eq, %c64_i32, %c0_i32 : i32
    %c1_i32 = arith.constant 1 : i32
    %2 = arith.select %1, %c1_i32, %c64_i32 : i32
    %3 = vector.broadcast %2 : i32 to vector<2x256xi32>
    %4 = arith.remsi %0, %3 : vector<2x256xi32>
    %c0_i32_0 = arith.constant 0 : i32
    %5 = vector.broadcast %c0_i32_0 : i32 to vector<2x256xi32>
    %6 = arith.cmpi ne, %4, %5 : vector<2x256xi32>
    %c0_i32_1 = arith.constant 0 : i32
    %7 = vector.broadcast %c0_i32_1 : i32 to vector<2x256xi32>
    %8 = arith.cmpi slt, %4, %7 : vector<2x256xi32>
    %c0_i32_2 = arith.constant 0 : i32
    %9 = arith.cmpi slt, %2, %c0_i32_2 : i32
    %10 = vector.broadcast %9 : i1 to vector<2x256xi1>
    %11 = vector.broadcast %10 : vector<2x256xi1> to vector<2x256xi1>
    %12 = arith.xori %8, %11 : vector<2x256xi1>
    %13 = arith.andi %12, %6 : vector<2x256xi1>
    %14 = vector.broadcast %2 : i32 to vector<2x256xi32>
    %15 = arith.addi %4, %14 : vector<2x256xi32>
    %16 = arith.select %13, %15, %4 : vector<2x256xi1>, vector<2x256xi32>
    %c32_i32 = arith.constant 32 : i32
    %17 = vector.broadcast %c32_i32 : i32 to vector<2x256xi32>
    %18 = arith.cmpi slt, %16, %17 : vector<2x256xi32>
    %c0 = arith.constant 0 : index
    %c0_3 = arith.constant 0 : index
    %c0_4 = arith.constant 0 : index
    %19 = vector.load %arg0[%c0, %c0_3, %c0_4] : memref<8x2x16xf32, #tpu.memory_space<vmem>>, vector<8x2x16xf32>
    %c0_5 = arith.constant 0 : index
    %c0_6 = arith.constant 0 : index
    %20 = vector.load %arg1[%c0_5, %c0_6] : memref<16x256xf32, #tpu.memory_space<vmem>>, vector<16x256xf32>
    %cst = arith.constant dense<0.000000e+00> : vector<8x2x256xf32>
    %21 = tpu.matmul %19, %20, %cst {dimension_numbers = #tpu.dot_dimension_numbers<[2], [0], [0, 1], [1], [0, 0, 0, 1, 1, 1], [], []>} : vector<8x2x16xf32>, vector<16x256xf32>, vector<8x2x256xf32> -> vector<8x2x256xf32>
    %c0_7 = arith.constant 0 : index
    %c0_8 = arith.constant 0 : index
    %22 = vector.load %arg2[%c0_7, %c0_8] : memref<1x256xf32, #tpu.memory_space<vmem>>, vector<1x256xf32>
    %23 = vector.shape_cast %22 : vector<1x256xf32> to vector<1x1x256xf32>
    %24 = vector.broadcast %23 : vector<1x1x256xf32> to vector<8x2x256xf32>
    %25 = arith.addf %21, %24 : vector<8x2x256xf32>
    %c0_9 = arith.constant 0 : index
    %c0_10 = arith.constant 0 : index
    %c0_11 = arith.constant 0 : index
    %26 = vector.load %arg12[%c0_9, %c0_10, %c0_11] : memref<8x2x256xf32, #tpu.memory_space<vmem>>, vector<8x2x256xf32>
    tpu.vector_store %arg12[%c0_9, %c0_10, %c0_11], %25 {strides = array<i32>} : memref<8x2x256xf32, #tpu.memory_space<vmem>>, vector<8x2x256xf32>,
    %c0_12 = arith.constant 0 : index
    %c0_13 = arith.constant 0 : index
    %c0_14 = arith.constant 0 : index
    %27 = vector.load %arg12[%c0_12, %c0_13, %c0_14] : memref<8x2x256xf32, #tpu.memory_space<vmem>>, vector<1x2x256xf32>
    %28 = vector.shape_cast %27 : vector<1x2x256xf32> to vector<2x256xf32>
    %c7 = arith.constant 7 : index
    %c0_15 = arith.constant 0 : index
    %c0_16 = arith.constant 0 : index
    %29 = vector.load %arg12[%c7, %c0_15, %c0_16] : memref<8x2x256xf32, #tpu.memory_space<vmem>>, vector<1x2x256xf32>
    %30 = vector.shape_cast %29 : vector<1x2x256xf32> to vector<2x256xf32>
    %31 = arith.select %18, %28, %30 : vector<2x256xi1>, vector<2x256xf32>
    %c0_17 = arith.constant 0 : index
    %c0_18 = arith.constant 0 : index
    %c0_19 = arith.constant 0 : index
    %32 = vector.load %arg12[%c0_17, %c0_18, %c0_19] : memref<8x2x256xf32, #tpu.memory_space<vmem>>, vector<1x2x256xf32>
    %33 = vector.shape_cast %32 : vector<1x2x256xf32> to vector<2x256xf32>
    %34 = vector.shape_cast %31 : vector<2x256xf32> to vector<1x2x256xf32>
    tpu.vector_store %arg12[%c0_17, %c0_18, %c0_19], %34 {strides = array<i32>} : memref<8x2x256xf32, #tpu.memory_space<vmem>>, vector<1x2x256xf32>,
    %35 = arith.select %18, %30, %28 : vector<2x256xi1>, vector<2x256xf32>
    %c7_20 = arith.constant 7 : index
    %c0_21 = arith.constant 0 : index
    %c0_22 = arith.constant 0 : index
    %36 = vector.load %arg12[%c7_20, %c0_21, %c0_22] : memref<8x2x256xf32, #tpu.memory_space<vmem>>, vector<1x2x256xf32>
    %37 = vector.shape_cast %36 : vector<1x2x256xf32> to vector<2x256xf32>
    %38 = vector.shape_cast %35 : vector<2x256xf32> to vector<1x2x256xf32>
    tpu.vector_store %arg12[%c7_20, %c0_21, %c0_22], %38 {strides = array<i32>} : memref<8x2x256xf32, #tpu.memory_space<vmem>>, vector<1x2x256xf32>,
    %c1 = arith.constant 1 : index
    %c0_23 = arith.constant 0 : index
    %c0_24 = arith.constant 0 : index
    %39 = vector.load %arg12[%c1, %c0_23, %c0_24] : memref<8x2x256xf32, #tpu.memory_space<vmem>>, vector<1x2x256xf32>
    %40 = vector.shape_cast %39 : vector<1x2x256xf32> to vector<2x256xf32>
    %c6 = arith.constant 6 : index
    %c0_25 = arith.constant 0 : index
    %c0_26 = arith.constant 0 : index
    %41 = vector.load %arg12[%c6, %c0_25, %c0_26] : memref<8x2x256xf32, #tpu.memory_space<vmem>>, vector<1x2x256xf32>
    %42 = vector.shape_cast %41 : vector<1x2x256xf32> to vector<2x256xf32>
    %43 = arith.select %18, %40, %42 : vector<2x256xi1>, vector<2x256xf32>
    %c1_27 = arith.constant 1 : index
    %c0_28 = arith.constant 0 : index
    %c0_29 = arith.constant 0 : index
    %44 = vector.load %arg12[%c1_27, %c0_28, %c0_29] : memref<8x2x256xf32, #tpu.memory_space<vmem>>, vector<1x2x256xf32>
    %45 = vector.shape_cast %44 : vector<1x2x256xf32> to vector<2x256xf32>
    %46 = vector.shape_cast %43 : vector<2x256xf32> to vector<1x2x256xf32>
    tpu.vector_store %arg12[%c1_27, %c0_28, %c0_29], %46 {strides = array<i32>} : memref<8x2x256xf32, #tpu.memory_space<vmem>>, vector<1x2x256xf32>,
    %47 = arith.select %18, %42, %40 : vector<2x256xi1>, vector<2x256xf32>
    %c6_30 = arith.constant 6 : index
    %c0_31 = arith.constant 0 : index
    %c0_32 = arith.constant 0 : index
    %48 = vector.load %arg12[%c6_30, %c0_31, %c0_32] : memref<8x2x256xf32, #tpu.memory_space<vmem>>, vector<1x2x256xf32>
    %49 = vector.shape_cast %48 : vector<1x2x256xf32> to vector<2x256xf32>
    %50 = vector.shape_cast %47 : vector<2x256xf32> to vector<1x2x256xf32>
    tpu.vector_store %arg12[%c6_30, %c0_31, %c0_32], %50 {strides = array<i32>} : memref<8x2x256xf32, #tpu.memory_space<vmem>>, vector<1x2x256xf32>,
    %c2 = arith.constant 2 : index
    %c0_33 = arith.constant 0 : index
    %c0_34 = arith.constant 0 : index
    %51 = vector.load %arg12[%c2, %c0_33, %c0_34] : memref<8x2x256xf32, #tpu.memory_space<vmem>>, vector<1x2x256xf32>
    %52 = vector.shape_cast %51 : vector<1x2x256xf32> to vector<2x256xf32>
    %c5 = arith.constant 5 : index
    %c0_35 = arith.constant 0 : index
    %c0_36 = arith.constant 0 : index
    %53 = vector.load %arg12[%c5, %c0_35, %c0_36] : memref<8x2x256xf32, #tpu.memory_space<vmem>>, vector<1x2x256xf32>
    %54 = vector.shape_cast %53 : vector<1x2x256xf32> to vector<2x256xf32>
    %55 = arith.select %18, %52, %54 : vector<2x256xi1>, vector<2x256xf32>
    %c2_37 = arith.constant 2 : index
    %c0_38 = arith.constant 0 : index
    %c0_39 = arith.constant 0 : index
    %56 = vector.load %arg12[%c2_37, %c0_38, %c0_39] : memref<8x2x256xf32, #tpu.memory_space<vmem>>, vector<1x2x256xf32>
    %57 = vector.shape_cast %56 : vector<1x2x256xf32> to vector<2x256xf32>
    %58 = vector.shape_cast %55 : vector<2x256xf32> to vector<1x2x256xf32>
    tpu.vector_store %arg12[%c2_37, %c0_38, %c0_39], %58 {strides = array<i32>} : memref<8x2x256xf32, #tpu.memory_space<vmem>>, vector<1x2x256xf32>,
    %59 = arith.select %18, %54, %52 : vector<2x256xi1>, vector<2x256xf32>
    %c5_40 = arith.constant 5 : index
    %c0_41 = arith.constant 0 : index
    %c0_42 = arith.constant 0 : index
    %60 = vector.load %arg12[%c5_40, %c0_41, %c0_42] : memref<8x2x256xf32, #tpu.memory_space<vmem>>, vector<1x2x256xf32>
    %61 = vector.shape_cast %60 : vector<1x2x256xf32> to vector<2x256xf32>
    %62 = vector.shape_cast %59 : vector<2x256xf32> to vector<1x2x256xf32>
    tpu.vector_store %arg12[%c5_40, %c0_41, %c0_42], %62 {strides = array<i32>} : memref<8x2x256xf32, #tpu.memory_space<vmem>>, vector<1x2x256xf32>,
    %c3 = arith.constant 3 : index
    %c0_43 = arith.constant 0 : index
    %c0_44 = arith.constant 0 : index
    %63 = vector.load %arg12[%c3, %c0_43, %c0_44] : memref<8x2x256xf32, #tpu.memory_space<vmem>>, vector<1x2x256xf32>
    %64 = vector.shape_cast %63 : vector<1x2x256xf32> to vector<2x256xf32>
    %c4 = arith.constant 4 : index
    %c0_45 = arith.constant 0 : index
    %c0_46 = arith.constant 0 : index
    %65 = vector.load %arg12[%c4, %c0_45, %c0_46] : memref<8x2x256xf32, #tpu.memory_space<vmem>>, vector<1x2x256xf32>
    %66 = vector.shape_cast %65 : vector<1x2x256xf32> to vector<2x256xf32>
    %67 = arith.select %18, %64, %66 : vector<2x256xi1>, vector<2x256xf32>
    %c3_47 = arith.constant 3 : index
    %c0_48 = arith.constant 0 : index
    %c0_49 = arith.constant 0 : index
    %68 = vector.load %arg12[%c3_47, %c0_48, %c0_49] : memref<8x2x256xf32, #tpu.memory_space<vmem>>, vector<1x2x256xf32>
    %69 = vector.shape_cast %68 : vector<1x2x256xf32> to vector<2x256xf32>
    %70 = vector.shape_cast %67 : vector<2x256xf32> to vector<1x2x256xf32>
    tpu.vector_store %arg12[%c3_47, %c0_48, %c0_49], %70 {strides = array<i32>} : memref<8x2x256xf32, #tpu.memory_space<vmem>>, vector<1x2x256xf32>,
    %71 = arith.select %18, %66, %64 : vector<2x256xi1>, vector<2x256xf32>
    %c4_50 = arith.constant 4 : index
    %c0_51 = arith.constant 0 : index
    %c0_52 = arith.constant 0 : index
    %72 = vector.load %arg12[%c4_50, %c0_51, %c0_52] : memref<8x2x256xf32, #tpu.memory_space<vmem>>, vector<1x2x256xf32>
    %73 = vector.shape_cast %72 : vector<1x2x256xf32> to vector<2x256xf32>
    %74 = vector.shape_cast %71 : vector<2x256xf32> to vector<1x2x256xf32>
    tpu.vector_store %arg12[%c4_50, %c0_51, %c0_52], %74 {strides = array<i32>} : memref<8x2x256xf32, #tpu.memory_space<vmem>>, vector<1x2x256xf32>,
    %c0_53 = arith.constant 0 : index
    %c0_54 = arith.constant 0 : index
    %75 = vector.load %arg3[%c0_53, %c0_54] : memref<64x256xf32, #tpu.memory_space<vmem>>, vector<64x256xf32>
    %cst_55 = arith.constant 0.000000e+00 : f32
    %76 = vector.broadcast %cst_55 : f32 to vector<2x64xf32>
    %c0_i32_56 = arith.constant 0 : i32
    %cst_57 = arith.constant dense<0.000000e+00> : vector<2x256xf32>
    %77 = tpu.matmul %76, %75, %cst_57 {dimension_numbers = #tpu.dot_dimension_numbers<[1], [0], [0], [1], [0, 0, 1, 1], [], []>} : vector<2x64xf32>, vector<64x256xf32>, vector<2x256xf32> -> vector<2x256xf32>
    %78 = arith.index_cast %c0_i32_56 : i32 to index
    %c0_58 = arith.constant 0 : index
    %c0_59 = arith.constant 0 : index
    %79 = vector.load %arg12[%78, %c0_58, %c0_59] : memref<8x2x256xf32, #tpu.memory_space<vmem>>, vector<1x2x256xf32>
    %80 = vector.shape_cast %79 : vector<1x2x256xf32> to vector<2x256xf32>
    %81 = arith.addf %77, %80 : vector<2x256xf32>
    %82 = vector.extract_strided_slice %81 {offsets = [0, 0], sizes = [2, 64], strides = [1, 1]} : vector<2x256xf32> to vector<2x64xf32>
    %83 = arith.negf %82 : vector<2x64xf32>
    %84 = math.exp %83 : vector<2x64xf32>
    %cst_60 = arith.constant 1.000000e+00 : f32
    %85 = vector.broadcast %cst_60 : f32 to vector<2x64xf32>
    %86 = arith.addf %85, %84 : vector<2x64xf32>
    %87 = arith.divf %85, %86 : vector<2x64xf32>
    %88 = vector.extract_strided_slice %81 {offsets = [0, 64], sizes = [2, 64], strides = [1, 1]} : vector<2x256xf32> to vector<2x64xf32>
    %89 = arith.negf %88 : vector<2x64xf32>
    %90 = math.exp %89 : vector<2x64xf32>
    %cst_61 = arith.constant 1.000000e+00 : f32
    %91 = vector.broadcast %cst_61 : f32 to vector<2x64xf32>
    %92 = arith.addf %91, %90 : vector<2x64xf32>
    %93 = arith.divf %91, %92 : vector<2x64xf32>
    %94 = vector.extract_strided_slice %81 {offsets = [0, 128], sizes = [2, 64], strides = [1, 1]} : vector<2x256xf32> to vector<2x64xf32>
    %95 = math.tanh %94 : vector<2x64xf32>
    %96 = vector.extract_strided_slice %81 {offsets = [0, 192], sizes = [2, 64], strides = [1, 1]} : vector<2x256xf32> to vector<2x64xf32>
    %97 = arith.negf %96 : vector<2x64xf32>
    %98 = math.exp %97 : vector<2x64xf32>
    %cst_62 = arith.constant 1.000000e+00 : f32
    %99 = vector.broadcast %cst_62 : f32 to vector<2x64xf32>
    %100 = arith.addf %99, %98 : vector<2x64xf32>
    %101 = arith.divf %99, %100 : vector<2x64xf32>
    %102 = arith.mulf %93, %76 : vector<2x64xf32>
    %103 = arith.mulf %87, %95 : vector<2x64xf32>
    %104 = arith.addf %102, %103 : vector<2x64xf32>
    %105 = math.tanh %104 : vector<2x64xf32>
    %106 = arith.mulf %101, %105 : vector<2x64xf32>
    %107 = vector.extract_strided_slice %106 {offsets = [0, 0], sizes = [2, 32], strides = [1, 1]} : vector<2x64xf32> to vector<2x32xf32>
    %108 = arith.index_cast %c0_i32_56 : i32 to index
    %c0_63 = arith.constant 0 : index
    %c0_64 = arith.constant 0 : index
    %109 = vector.load %arg13[%108, %c0_63, %c0_64] : memref<8x2x64xf32, #tpu.memory_space<vmem>>, vector<1x2x32xf32>
    %110 = vector.shape_cast %109 : vector<1x2x32xf32> to vector<2x32xf32>
    %111 = vector.shape_cast %107 : vector<2x32xf32> to vector<1x2x32xf32>
    tpu.vector_store %arg13[%108, %c0_63, %c0_64], %111 {strides = array<i32>} : memref<8x2x64xf32, #tpu.memory_space<vmem>>, vector<1x2x32xf32>,
    %112 = vector.extract_strided_slice %106 {offsets = [0, 32], sizes = [2, 32], strides = [1, 1]} : vector<2x64xf32> to vector<2x32xf32>
    %c7_i32 = arith.constant 7 : i32
    %113 = arith.subi %c7_i32, %c0_i32_56 : i32
    %114 = arith.index_cast %113 : i32 to index
    %c0_65 = arith.constant 0 : index
    %c32 = arith.constant 32 : index
    %115 = vector.load %arg13[%114, %c0_65, %c32] : memref<8x2x64xf32, #tpu.memory_space<vmem>>, vector<1x2x32xf32>
    %116 = vector.shape_cast %115 : vector<1x2x32xf32> to vector<2x32xf32>
    %117 = vector.shape_cast %112 : vector<2x32xf32> to vector<1x2x32xf32>
    tpu.vector_store %arg13[%114, %c0_65, %c32], %117 {strides = array<i32>} : memref<8x2x64xf32, #tpu.memory_space<vmem>>, vector<1x2x32xf32>,
    %c1_i32_66 = arith.constant 1 : i32
    %cst_67 = arith.constant dense<0.000000e+00> : vector<2x256xf32>
    %118 = tpu.matmul %106, %75, %cst_67 {dimension_numbers = #tpu.dot_dimension_numbers<[1], [0], [0], [1], [0, 0, 1, 1], [], []>} : vector<2x64xf32>, vector<64x256xf32>, vector<2x256xf32> -> vector<2x256xf32>
    %119 = arith.index_cast %c1_i32_66 : i32 to index
    %c0_68 = arith.constant 0 : index
    %c0_69 = arith.constant 0 : index
    %120 = vector.load %arg12[%119, %c0_68, %c0_69] : memref<8x2x256xf32, #tpu.memory_space<vmem>>, vector<1x2x256xf32>
    %121 = vector.shape_cast %120 : vector<1x2x256xf32> to vector<2x256xf32>
    %122 = arith.addf %118, %121 : vector<2x256xf32>
    %123 = vector.extract_strided_slice %122 {offsets = [0, 0], sizes = [2, 64], strides = [1, 1]} : vector<2x256xf32> to vector<2x64xf32>
    %124 = arith.negf %123 : vector<2x64xf32>
    %125 = math.exp %124 : vector<2x64xf32>
    %cst_70 = arith.constant 1.000000e+00 : f32
    %126 = vector.broadcast %cst_70 : f32 to vector<2x64xf32>
    %127 = arith.addf %126, %125 : vector<2x64xf32>
    %128 = arith.divf %126, %127 : vector<2x64xf32>
    %129 = vector.extract_strided_slice %122 {offsets = [0, 64], sizes = [2, 64], strides = [1, 1]} : vector<2x256xf32> to vector<2x64xf32>
    %130 = arith.negf %129 : vector<2x64xf32>
    %131 = math.exp %130 : vector<2x64xf32>
    %cst_71 = arith.constant 1.000000e+00 : f32
    %132 = vector.broadcast %cst_71 : f32 to vector<2x64xf32>
    %133 = arith.addf %132, %131 : vector<2x64xf32>
    %134 = arith.divf %132, %133 : vector<2x64xf32>
    %135 = vector.extract_strided_slice %122 {offsets = [0, 128], sizes = [2, 64], strides = [1, 1]} : vector<2x256xf32> to vector<2x64xf32>
    %136 = math.tanh %135 : vector<2x64xf32>
    %137 = vector.extract_strided_slice %122 {offsets = [0, 192], sizes = [2, 64], strides = [1, 1]} : vector<2x256xf32> to vector<2x64xf32>
    %138 = arith.negf %137 : vector<2x64xf32>
    %139 = math.exp %138 : vector<2x64xf32>
    %cst_72 = arith.constant 1.000000e+00 : f32
    %140 = vector.broadcast %cst_72 : f32 to vector<2x64xf32>
    %141 = arith.addf %140, %139 : vector<2x64xf32>
    %142 = arith.divf %140, %141 : vector<2x64xf32>
    %143 = arith.mulf %134, %104 : vector<2x64xf32>
    %144 = arith.mulf %128, %136 : vector<2x64xf32>
    %145 = arith.addf %143, %144 : vector<2x64xf32>
    %146 = math.tanh %145 : vector<2x64xf32>
    %147 = arith.mulf %142, %146 : vector<2x64xf32>
    %148 = vector.extract_strided_slice %147 {offsets = [0, 0], sizes = [2, 32], strides = [1, 1]} : vector<2x64xf32> to vector<2x32xf32>
    %149 = arith.index_cast %c1_i32_66 : i32 to index
    %c0_73 = arith.constant 0 : index
    %c0_74 = arith.constant 0 : index
    %150 = vector.load %arg13[%149, %c0_73, %c0_74] : memref<8x2x64xf32, #tpu.memory_space<vmem>>, vector<1x2x32xf32>
    %151 = vector.shape_cast %150 : vector<1x2x32xf32> to vector<2x32xf32>
    %152 = vector.shape_cast %148 : vector<2x32xf32> to vector<1x2x32xf32>
    tpu.vector_store %arg13[%149, %c0_73, %c0_74], %152 {strides = array<i32>} : memref<8x2x64xf32, #tpu.memory_space<vmem>>, vector<1x2x32xf32>,
    %153 = vector.extract_strided_slice %147 {offsets = [0, 32], sizes = [2, 32], strides = [1, 1]} : vector<2x64xf32> to vector<2x32xf32>
    %c7_i32_75 = arith.constant 7 : i32
    %154 = arith.subi %c7_i32_75, %c1_i32_66 : i32
    %155 = arith.index_cast %154 : i32 to index
    %c0_76 = arith.constant 0 : index
    %c32_77 = arith.constant 32 : index
    %156 = vector.load %arg13[%155, %c0_76, %c32_77] : memref<8x2x64xf32, #tpu.memory_space<vmem>>, vector<1x2x32xf32>
    %157 = vector.shape_cast %156 : vector<1x2x32xf32> to vector<2x32xf32>
    %158 = vector.shape_cast %153 : vector<2x32xf32> to vector<1x2x32xf32>
    tpu.vector_store %arg13[%155, %c0_76, %c32_77], %158 {strides = array<i32>} : memref<8x2x64xf32, #tpu.memory_space<vmem>>, vector<1x2x32xf32>,
    %c2_i32 = arith.constant 2 : i32
    %cst_78 = arith.constant dense<0.000000e+00> : vector<2x256xf32>
    %159 = tpu.matmul %147, %75, %cst_78 {dimension_numbers = #tpu.dot_dimension_numbers<[1], [0], [0], [1], [0, 0, 1, 1], [], []>} : vector<2x64xf32>, vector<64x256xf32>, vector<2x256xf32> -> vector<2x256xf32>
    %160 = arith.index_cast %c2_i32 : i32 to index
    %c0_79 = arith.constant 0 : index
    %c0_80 = arith.constant 0 : index
    %161 = vector.load %arg12[%160, %c0_79, %c0_80] : memref<8x2x256xf32, #tpu.memory_space<vmem>>, vector<1x2x256xf32>
    %162 = vector.shape_cast %161 : vector<1x2x256xf32> to vector<2x256xf32>
    %163 = arith.addf %159, %162 : vector<2x256xf32>
    %164 = vector.extract_strided_slice %163 {offsets = [0, 0], sizes = [2, 64], strides = [1, 1]} : vector<2x256xf32> to vector<2x64xf32>
    %165 = arith.negf %164 : vector<2x64xf32>
    %166 = math.exp %165 : vector<2x64xf32>
    %cst_81 = arith.constant 1.000000e+00 : f32
    %167 = vector.broadcast %cst_81 : f32 to vector<2x64xf32>
    %168 = arith.addf %167, %166 : vector<2x64xf32>
    %169 = arith.divf %167, %168 : vector<2x64xf32>
    %170 = vector.extract_strided_slice %163 {offsets = [0, 64], sizes = [2, 64], strides = [1, 1]} : vector<2x256xf32> to vector<2x64xf32>
    %171 = arith.negf %170 : vector<2x64xf32>
    %172 = math.exp %171 : vector<2x64xf32>
    %cst_82 = arith.constant 1.000000e+00 : f32
    %173 = vector.broadcast %cst_82 : f32 to vector<2x64xf32>
    %174 = arith.addf %173, %172 : vector<2x64xf32>
    %175 = arith.divf %173, %174 : vector<2x64xf32>
    %176 = vector.extract_strided_slice %163 {offsets = [0, 128], sizes = [2, 64], strides = [1, 1]} : vector<2x256xf32> to vector<2x64xf32>
    %177 = math.tanh %176 : vector<2x64xf32>
    %178 = vector.extract_strided_slice %163 {offsets = [0, 192], sizes = [2, 64], strides = [1, 1]} : vector<2x256xf32> to vector<2x64xf32>
    %179 = arith.negf %178 : vector<2x64xf32>
    %180 = math.exp %179 : vector<2x64xf32>
    %cst_83 = arith.constant 1.000000e+00 : f32
    %181 = vector.broadcast %cst_83 : f32 to vector<2x64xf32>
    %182 = arith.addf %181, %180 : vector<2x64xf32>
    %183 = arith.divf %181, %182 : vector<2x64xf32>
    %184 = arith.mulf %175, %145 : vector<2x64xf32>
    %185 = arith.mulf %169, %177 : vector<2x64xf32>
    %186 = arith.addf %184, %185 : vector<2x64xf32>
    %187 = math.tanh %186 : vector<2x64xf32>
    %188 = arith.mulf %183, %187 : vector<2x64xf32>
    %189 = vector.extract_strided_slice %188 {offsets = [0, 0], sizes = [2, 32], strides = [1, 1]} : vector<2x64xf32> to vector<2x32xf32>
    %190 = arith.index_cast %c2_i32 : i32 to index
    %c0_84 = arith.constant 0 : index
    %c0_85 = arith.constant 0 : index
    %191 = vector.load %arg13[%190, %c0_84, %c0_85] : memref<8x2x64xf32, #tpu.memory_space<vmem>>, vector<1x2x32xf32>
    %192 = vector.shape_cast %191 : vector<1x2x32xf32> to vector<2x32xf32>
    %193 = vector.shape_cast %189 : vector<2x32xf32> to vector<1x2x32xf32>
    tpu.vector_store %arg13[%190, %c0_84, %c0_85], %193 {strides = array<i32>} : memref<8x2x64xf32, #tpu.memory_space<vmem>>, vector<1x2x32xf32>,
    %194 = vector.extract_strided_slice %188 {offsets = [0, 32], sizes = [2, 32], strides = [1, 1]} : vector<2x64xf32> to vector<2x32xf32>
    %c7_i32_86 = arith.constant 7 : i32
    %195 = arith.subi %c7_i32_86, %c2_i32 : i32
    %196 = arith.index_cast %195 : i32 to index
    %c0_87 = arith.constant 0 : index
    %c32_88 = arith.constant 32 : index
    %197 = vector.load %arg13[%196, %c0_87, %c32_88] : memref<8x2x64xf32, #tpu.memory_space<vmem>>, vector<1x2x32xf32>
    %198 = vector.shape_cast %197 : vector<1x2x32xf32> to vector<2x32xf32>
    %199 = vector.shape_cast %194 : vector<2x32xf32> to vector<1x2x32xf32>
    tpu.vector_store %arg13[%196, %c0_87, %c32_88], %199 {strides = array<i32>} : memref<8x2x64xf32, #tpu.memory_space<vmem>>, vector<1x2x32xf32>,
    %c3_i32 = arith.constant 3 : i32
    %cst_89 = arith.constant dense<0.000000e+00> : vector<2x256xf32>
    %200 = tpu.matmul %188, %75, %cst_89 {dimension_numbers = #tpu.dot_dimension_numbers<[1], [0], [0], [1], [0, 0, 1, 1], [], []>} : vector<2x64xf32>, vector<64x256xf32>, vector<2x256xf32> -> vector<2x256xf32>
    %201 = arith.index_cast %c3_i32 : i32 to index
    %c0_90 = arith.constant 0 : index
    %c0_91 = arith.constant 0 : index
    %202 = vector.load %arg12[%201, %c0_90, %c0_91] : memref<8x2x256xf32, #tpu.memory_space<vmem>>, vector<1x2x256xf32>
    %203 = vector.shape_cast %202 : vector<1x2x256xf32> to vector<2x256xf32>
    %204 = arith.addf %200, %203 : vector<2x256xf32>
    %205 = vector.extract_strided_slice %204 {offsets = [0, 0], sizes = [2, 64], strides = [1, 1]} : vector<2x256xf32> to vector<2x64xf32>
    %206 = arith.negf %205 : vector<2x64xf32>
    %207 = math.exp %206 : vector<2x64xf32>
    %cst_92 = arith.constant 1.000000e+00 : f32
    %208 = vector.broadcast %cst_92 : f32 to vector<2x64xf32>
    %209 = arith.addf %208, %207 : vector<2x64xf32>
    %210 = arith.divf %208, %209 : vector<2x64xf32>
    %211 = vector.extract_strided_slice %204 {offsets = [0, 64], sizes = [2, 64], strides = [1, 1]} : vector<2x256xf32> to vector<2x64xf32>
    %212 = arith.negf %211 : vector<2x64xf32>
    %213 = math.exp %212 : vector<2x64xf32>
    %cst_93 = arith.constant 1.000000e+00 : f32
    %214 = vector.broadcast %cst_93 : f32 to vector<2x64xf32>
    %215 = arith.addf %214, %213 : vector<2x64xf32>
    %216 = arith.divf %214, %215 : vector<2x64xf32>
    %217 = vector.extract_strided_slice %204 {offsets = [0, 128], sizes = [2, 64], strides = [1, 1]} : vector<2x256xf32> to vector<2x64xf32>
    %218 = math.tanh %217 : vector<2x64xf32>
    %219 = vector.extract_strided_slice %204 {offsets = [0, 192], sizes = [2, 64], strides = [1, 1]} : vector<2x256xf32> to vector<2x64xf32>
    %220 = arith.negf %219 : vector<2x64xf32>
    %221 = math.exp %220 : vector<2x64xf32>
    %cst_94 = arith.constant 1.000000e+00 : f32
    %222 = vector.broadcast %cst_94 : f32 to vector<2x64xf32>
    %223 = arith.addf %222, %221 : vector<2x64xf32>
    %224 = arith.divf %222, %223 : vector<2x64xf32>
    %225 = arith.mulf %216, %186 : vector<2x64xf32>
    %226 = arith.mulf %210, %218 : vector<2x64xf32>
    %227 = arith.addf %225, %226 : vector<2x64xf32>
    %228 = math.tanh %227 : vector<2x64xf32>
    %229 = arith.mulf %224, %228 : vector<2x64xf32>
    %230 = vector.extract_strided_slice %229 {offsets = [0, 0], sizes = [2, 32], strides = [1, 1]} : vector<2x64xf32> to vector<2x32xf32>
    %231 = arith.index_cast %c3_i32 : i32 to index
    %c0_95 = arith.constant 0 : index
    %c0_96 = arith.constant 0 : index
    %232 = vector.load %arg13[%231, %c0_95, %c0_96] : memref<8x2x64xf32, #tpu.memory_space<vmem>>, vector<1x2x32xf32>
    %233 = vector.shape_cast %232 : vector<1x2x32xf32> to vector<2x32xf32>
    %234 = vector.shape_cast %230 : vector<2x32xf32> to vector<1x2x32xf32>
    tpu.vector_store %arg13[%231, %c0_95, %c0_96], %234 {strides = array<i32>} : memref<8x2x64xf32, #tpu.memory_space<vmem>>, vector<1x2x32xf32>,
    %235 = vector.extract_strided_slice %229 {offsets = [0, 32], sizes = [2, 32], strides = [1, 1]} : vector<2x64xf32> to vector<2x32xf32>
    %c7_i32_97 = arith.constant 7 : i32
    %236 = arith.subi %c7_i32_97, %c3_i32 : i32
    %237 = arith.index_cast %236 : i32 to index
    %c0_98 = arith.constant 0 : index
    %c32_99 = arith.constant 32 : index
    %238 = vector.load %arg13[%237, %c0_98, %c32_99] : memref<8x2x64xf32, #tpu.memory_space<vmem>>, vector<1x2x32xf32>
    %239 = vector.shape_cast %238 : vector<1x2x32xf32> to vector<2x32xf32>
    %240 = vector.shape_cast %235 : vector<2x32xf32> to vector<1x2x32xf32>
    tpu.vector_store %arg13[%237, %c0_98, %c32_99], %240 {strides = array<i32>} : memref<8x2x64xf32, #tpu.memory_space<vmem>>, vector<1x2x32xf32>,
    %c4_i32 = arith.constant 4 : i32
    %cst_100 = arith.constant dense<0.000000e+00> : vector<2x256xf32>
    %241 = tpu.matmul %229, %75, %cst_100 {dimension_numbers = #tpu.dot_dimension_numbers<[1], [0], [0], [1], [0, 0, 1, 1], [], []>} : vector<2x64xf32>, vector<64x256xf32>, vector<2x256xf32> -> vector<2x256xf32>
    %242 = arith.index_cast %c4_i32 : i32 to index
    %c0_101 = arith.constant 0 : index
    %c0_102 = arith.constant 0 : index
    %243 = vector.load %arg12[%242, %c0_101, %c0_102] : memref<8x2x256xf32, #tpu.memory_space<vmem>>, vector<1x2x256xf32>
    %244 = vector.shape_cast %243 : vector<1x2x256xf32> to vector<2x256xf32>
    %245 = arith.addf %241, %244 : vector<2x256xf32>
    %246 = vector.extract_strided_slice %245 {offsets = [0, 0], sizes = [2, 64], strides = [1, 1]} : vector<2x256xf32> to vector<2x64xf32>
    %247 = arith.negf %246 : vector<2x64xf32>
    %248 = math.exp %247 : vector<2x64xf32>
    %cst_103 = arith.constant 1.000000e+00 : f32
    %249 = vector.broadcast %cst_103 : f32 to vector<2x64xf32>
    %250 = arith.addf %249, %248 : vector<2x64xf32>
    %251 = arith.divf %249, %250 : vector<2x64xf32>
    %252 = vector.extract_strided_slice %245 {offsets = [0, 64], sizes = [2, 64], strides = [1, 1]} : vector<2x256xf32> to vector<2x64xf32>
    %253 = arith.negf %252 : vector<2x64xf32>
    %254 = math.exp %253 : vector<2x64xf32>
    %cst_104 = arith.constant 1.000000e+00 : f32
    %255 = vector.broadcast %cst_104 : f32 to vector<2x64xf32>
    %256 = arith.addf %255, %254 : vector<2x64xf32>
    %257 = arith.divf %255, %256 : vector<2x64xf32>
    %258 = vector.extract_strided_slice %245 {offsets = [0, 128], sizes = [2, 64], strides = [1, 1]} : vector<2x256xf32> to vector<2x64xf32>
    %259 = math.tanh %258 : vector<2x64xf32>
    %260 = vector.extract_strided_slice %245 {offsets = [0, 192], sizes = [2, 64], strides = [1, 1]} : vector<2x256xf32> to vector<2x64xf32>
    %261 = arith.negf %260 : vector<2x64xf32>
    %262 = math.exp %261 : vector<2x64xf32>
    %cst_105 = arith.constant 1.000000e+00 : f32
    %263 = vector.broadcast %cst_105 : f32 to vector<2x64xf32>
    %264 = arith.addf %263, %262 : vector<2x64xf32>
    %265 = arith.divf %263, %264 : vector<2x64xf32>
    %266 = arith.mulf %257, %227 : vector<2x64xf32>
    %267 = arith.mulf %251, %259 : vector<2x64xf32>
    %268 = arith.addf %266, %267 : vector<2x64xf32>
    %269 = math.tanh %268 : vector<2x64xf32>
    %270 = arith.mulf %265, %269 : vector<2x64xf32>
    %271 = vector.extract_strided_slice %270 {offsets = [0, 0], sizes = [2, 32], strides = [1, 1]} : vector<2x64xf32> to vector<2x32xf32>
    %272 = arith.index_cast %c4_i32 : i32 to index
    %c0_106 = arith.constant 0 : index
    %c0_107 = arith.constant 0 : index
    %273 = vector.load %arg13[%272, %c0_106, %c0_107] : memref<8x2x64xf32, #tpu.memory_space<vmem>>, vector<1x2x32xf32>
    %274 = vector.shape_cast %273 : vector<1x2x32xf32> to vector<2x32xf32>
    %275 = vector.shape_cast %271 : vector<2x32xf32> to vector<1x2x32xf32>
    tpu.vector_store %arg13[%272, %c0_106, %c0_107], %275 {strides = array<i32>} : memref<8x2x64xf32, #tpu.memory_space<vmem>>, vector<1x2x32xf32>,
    %276 = vector.extract_strided_slice %270 {offsets = [0, 32], sizes = [2, 32], strides = [1, 1]} : vector<2x64xf32> to vector<2x32xf32>
    %c7_i32_108 = arith.constant 7 : i32
    %277 = arith.subi %c7_i32_108, %c4_i32 : i32
    %278 = arith.index_cast %277 : i32 to index
    %c0_109 = arith.constant 0 : index
    %c32_110 = arith.constant 32 : index
    %279 = vector.load %arg13[%278, %c0_109, %c32_110] : memref<8x2x64xf32, #tpu.memory_space<vmem>>, vector<1x2x32xf32>
    %280 = vector.shape_cast %279 : vector<1x2x32xf32> to vector<2x32xf32>
    %281 = vector.shape_cast %276 : vector<2x32xf32> to vector<1x2x32xf32>
    tpu.vector_store %arg13[%278, %c0_109, %c32_110], %281 {strides = array<i32>} : memref<8x2x64xf32, #tpu.memory_space<vmem>>, vector<1x2x32xf32>,
    %c5_i32 = arith.constant 5 : i32
    %cst_111 = arith.constant dense<0.000000e+00> : vector<2x256xf32>
    %282 = tpu.matmul %270, %75, %cst_111 {dimension_numbers = #tpu.dot_dimension_numbers<[1], [0], [0], [1], [0, 0, 1, 1], [], []>} : vector<2x64xf32>, vector<64x256xf32>, vector<2x256xf32> -> vector<2x256xf32>
    %283 = arith.index_cast %c5_i32 : i32 to index
    %c0_112 = arith.constant 0 : index
    %c0_113 = arith.constant 0 : index
    %284 = vector.load %arg12[%283, %c0_112, %c0_113] : memref<8x2x256xf32, #tpu.memory_space<vmem>>, vector<1x2x256xf32>
    %285 = vector.shape_cast %284 : vector<1x2x256xf32> to vector<2x256xf32>
    %286 = arith.addf %282, %285 : vector<2x256xf32>
    %287 = vector.extract_strided_slice %286 {offsets = [0, 0], sizes = [2, 64], strides = [1, 1]} : vector<2x256xf32> to vector<2x64xf32>
    %288 = arith.negf %287 : vector<2x64xf32>
    %289 = math.exp %288 : vector<2x64xf32>
    %cst_114 = arith.constant 1.000000e+00 : f32
    %290 = vector.broadcast %cst_114 : f32 to vector<2x64xf32>
    %291 = arith.addf %290, %289 : vector<2x64xf32>
    %292 = arith.divf %290, %291 : vector<2x64xf32>
    %293 = vector.extract_strided_slice %286 {offsets = [0, 64], sizes = [2, 64], strides = [1, 1]} : vector<2x256xf32> to vector<2x64xf32>
    %294 = arith.negf %293 : vector<2x64xf32>
    %295 = math.exp %294 : vector<2x64xf32>
    %cst_115 = arith.constant 1.000000e+00 : f32
    %296 = vector.broadcast %cst_115 : f32 to vector<2x64xf32>
    %297 = arith.addf %296, %295 : vector<2x64xf32>
    %298 = arith.divf %296, %297 : vector<2x64xf32>
    %299 = vector.extract_strided_slice %286 {offsets = [0, 128], sizes = [2, 64], strides = [1, 1]} : vector<2x256xf32> to vector<2x64xf32>
    %300 = math.tanh %299 : vector<2x64xf32>
    %301 = vector.extract_strided_slice %286 {offsets = [0, 192], sizes = [2, 64], strides = [1, 1]} : vector<2x256xf32> to vector<2x64xf32>
    %302 = arith.negf %301 : vector<2x64xf32>
    %303 = math.exp %302 : vector<2x64xf32>
    %cst_116 = arith.constant 1.000000e+00 : f32
    %304 = vector.broadcast %cst_116 : f32 to vector<2x64xf32>
    %305 = arith.addf %304, %303 : vector<2x64xf32>
    %306 = arith.divf %304, %305 : vector<2x64xf32>
    %307 = arith.mulf %298, %268 : vector<2x64xf32>
    %308 = arith.mulf %292, %300 : vector<2x64xf32>
    %309 = arith.addf %307, %308 : vector<2x64xf32>
    %310 = math.tanh %309 : vector<2x64xf32>
    %311 = arith.mulf %306, %310 : vector<2x64xf32>
    %312 = vector.extract_strided_slice %311 {offsets = [0, 0], sizes = [2, 32], strides = [1, 1]} : vector<2x64xf32> to vector<2x32xf32>
    %313 = arith.index_cast %c5_i32 : i32 to index
    %c0_117 = arith.constant 0 : index
    %c0_118 = arith.constant 0 : index
    %314 = vector.load %arg13[%313, %c0_117, %c0_118] : memref<8x2x64xf32, #tpu.memory_space<vmem>>, vector<1x2x32xf32>
    %315 = vector.shape_cast %314 : vector<1x2x32xf32> to vector<2x32xf32>
    %316 = vector.shape_cast %312 : vector<2x32xf32> to vector<1x2x32xf32>
    tpu.vector_store %arg13[%313, %c0_117, %c0_118], %316 {strides = array<i32>} : memref<8x2x64xf32, #tpu.memory_space<vmem>>, vector<1x2x32xf32>,
    %317 = vector.extract_strided_slice %311 {offsets = [0, 32], sizes = [2, 32], strides = [1, 1]} : vector<2x64xf32> to vector<2x32xf32>
    %c7_i32_119 = arith.constant 7 : i32
    %318 = arith.subi %c7_i32_119, %c5_i32 : i32
    %319 = arith.index_cast %318 : i32 to index
    %c0_120 = arith.constant 0 : index
    %c32_121 = arith.constant 32 : index
    %320 = vector.load %arg13[%319, %c0_120, %c32_121] : memref<8x2x64xf32, #tpu.memory_space<vmem>>, vector<1x2x32xf32>
    %321 = vector.shape_cast %320 : vector<1x2x32xf32> to vector<2x32xf32>
    %322 = vector.shape_cast %317 : vector<2x32xf32> to vector<1x2x32xf32>
    tpu.vector_store %arg13[%319, %c0_120, %c32_121], %322 {strides = array<i32>} : memref<8x2x64xf32, #tpu.memory_space<vmem>>, vector<1x2x32xf32>,
    %c6_i32 = arith.constant 6 : i32
    %cst_122 = arith.constant dense<0.000000e+00> : vector<2x256xf32>
    %323 = tpu.matmul %311, %75, %cst_122 {dimension_numbers = #tpu.dot_dimension_numbers<[1], [0], [0], [1], [0, 0, 1, 1], [], []>} : vector<2x64xf32>, vector<64x256xf32>, vector<2x256xf32> -> vector<2x256xf32>
    %324 = arith.index_cast %c6_i32 : i32 to index
    %c0_123 = arith.constant 0 : index
    %c0_124 = arith.constant 0 : index
    %325 = vector.load %arg12[%324, %c0_123, %c0_124] : memref<8x2x256xf32, #tpu.memory_space<vmem>>, vector<1x2x256xf32>
    %326 = vector.shape_cast %325 : vector<1x2x256xf32> to vector<2x256xf32>
    %327 = arith.addf %323, %326 : vector<2x256xf32>
    %328 = vector.extract_strided_slice %327 {offsets = [0, 0], sizes = [2, 64], strides = [1, 1]} : vector<2x256xf32> to vector<2x64xf32>
    %329 = arith.negf %328 : vector<2x64xf32>
    %330 = math.exp %329 : vector<2x64xf32>
    %cst_125 = arith.constant 1.000000e+00 : f32
    %331 = vector.broadcast %cst_125 : f32 to vector<2x64xf32>
    %332 = arith.addf %331, %330 : vector<2x64xf32>
    %333 = arith.divf %331, %332 : vector<2x64xf32>
    %334 = vector.extract_strided_slice %327 {offsets = [0, 64], sizes = [2, 64], strides = [1, 1]} : vector<2x256xf32> to vector<2x64xf32>
    %335 = arith.negf %334 : vector<2x64xf32>
    %336 = math.exp %335 : vector<2x64xf32>
    %cst_126 = arith.constant 1.000000e+00 : f32
    %337 = vector.broadcast %cst_126 : f32 to vector<2x64xf32>
    %338 = arith.addf %337, %336 : vector<2x64xf32>
    %339 = arith.divf %337, %338 : vector<2x64xf32>
    %340 = vector.extract_strided_slice %327 {offsets = [0, 128], sizes = [2, 64], strides = [1, 1]} : vector<2x256xf32> to vector<2x64xf32>
    %341 = math.tanh %340 : vector<2x64xf32>
    %342 = vector.extract_strided_slice %327 {offsets = [0, 192], sizes = [2, 64], strides = [1, 1]} : vector<2x256xf32> to vector<2x64xf32>
    %343 = arith.negf %342 : vector<2x64xf32>
    %344 = math.exp %343 : vector<2x64xf32>
    %cst_127 = arith.constant 1.000000e+00 : f32
    %345 = vector.broadcast %cst_127 : f32 to vector<2x64xf32>
    %346 = arith.addf %345, %344 : vector<2x64xf32>
    %347 = arith.divf %345, %346 : vector<2x64xf32>
    %348 = arith.mulf %339, %309 : vector<2x64xf32>
    %349 = arith.mulf %333, %341 : vector<2x64xf32>
    %350 = arith.addf %348, %349 : vector<2x64xf32>
    %351 = math.tanh %350 : vector<2x64xf32>
    %352 = arith.mulf %347, %351 : vector<2x64xf32>
    %353 = vector.extract_strided_slice %352 {offsets = [0, 0], sizes = [2, 32], strides = [1, 1]} : vector<2x64xf32> to vector<2x32xf32>
    %354 = arith.index_cast %c6_i32 : i32 to index
    %c0_128 = arith.constant 0 : index
    %c0_129 = arith.constant 0 : index
    %355 = vector.load %arg13[%354, %c0_128, %c0_129] : memref<8x2x64xf32, #tpu.memory_space<vmem>>, vector<1x2x32xf32>
    %356 = vector.shape_cast %355 : vector<1x2x32xf32> to vector<2x32xf32>
    %357 = vector.shape_cast %353 : vector<2x32xf32> to vector<1x2x32xf32>
    tpu.vector_store %arg13[%354, %c0_128, %c0_129], %357 {strides = array<i32>} : memref<8x2x64xf32, #tpu.memory_space<vmem>>, vector<1x2x32xf32>,
    %358 = vector.extract_strided_slice %352 {offsets = [0, 32], sizes = [2, 32], strides = [1, 1]} : vector<2x64xf32> to vector<2x32xf32>
    %c7_i32_130 = arith.constant 7 : i32
    %359 = arith.subi %c7_i32_130, %c6_i32 : i32
    %360 = arith.index_cast %359 : i32 to index
    %c0_131 = arith.constant 0 : index
    %c32_132 = arith.constant 32 : index
    %361 = vector.load %arg13[%360, %c0_131, %c32_132] : memref<8x2x64xf32, #tpu.memory_space<vmem>>, vector<1x2x32xf32>
    %362 = vector.shape_cast %361 : vector<1x2x32xf32> to vector<2x32xf32>
    %363 = vector.shape_cast %358 : vector<2x32xf32> to vector<1x2x32xf32>
    tpu.vector_store %arg13[%360, %c0_131, %c32_132], %363 {strides = array<i32>} : memref<8x2x64xf32, #tpu.memory_space<vmem>>, vector<1x2x32xf32>,
    %c7_i32_133 = arith.constant 7 : i32
    %cst_134 = arith.constant dense<0.000000e+00> : vector<2x256xf32>
    %364 = tpu.matmul %352, %75, %cst_134 {dimension_numbers = #tpu.dot_dimension_numbers<[1], [0], [0], [1], [0, 0, 1, 1], [], []>} : vector<2x64xf32>, vector<64x256xf32>, vector<2x256xf32> -> vector<2x256xf32>
    %365 = arith.index_cast %c7_i32_133 : i32 to index
    %c0_135 = arith.constant 0 : index
    %c0_136 = arith.constant 0 : index
    %366 = vector.load %arg12[%365, %c0_135, %c0_136] : memref<8x2x256xf32, #tpu.memory_space<vmem>>, vector<1x2x256xf32>
    %367 = vector.shape_cast %366 : vector<1x2x256xf32> to vector<2x256xf32>
    %368 = arith.addf %364, %367 : vector<2x256xf32>
    %369 = vector.extract_strided_slice %368 {offsets = [0, 0], sizes = [2, 64], strides = [1, 1]} : vector<2x256xf32> to vector<2x64xf32>
    %370 = arith.negf %369 : vector<2x64xf32>
    %371 = math.exp %370 : vector<2x64xf32>
    %cst_137 = arith.constant 1.000000e+00 : f32
    %372 = vector.broadcast %cst_137 : f32 to vector<2x64xf32>
    %373 = arith.addf %372, %371 : vector<2x64xf32>
    %374 = arith.divf %372, %373 : vector<2x64xf32>
    %375 = vector.extract_strided_slice %368 {offsets = [0, 64], sizes = [2, 64], strides = [1, 1]} : vector<2x256xf32> to vector<2x64xf32>
    %376 = arith.negf %375 : vector<2x64xf32>
    %377 = math.exp %376 : vector<2x64xf32>
    %cst_138 = arith.constant 1.000000e+00 : f32
    %378 = vector.broadcast %cst_138 : f32 to vector<2x64xf32>
    %379 = arith.addf %378, %377 : vector<2x64xf32>
    %380 = arith.divf %378, %379 : vector<2x64xf32>
    %381 = vector.extract_strided_slice %368 {offsets = [0, 128], sizes = [2, 64], strides = [1, 1]} : vector<2x256xf32> to vector<2x64xf32>
    %382 = math.tanh %381 : vector<2x64xf32>
    %383 = vector.extract_strided_slice %368 {offsets = [0, 192], sizes = [2, 64], strides = [1, 1]} : vector<2x256xf32> to vector<2x64xf32>
    %384 = arith.negf %383 : vector<2x64xf32>
    %385 = math.exp %384 : vector<2x64xf32>
    %cst_139 = arith.constant 1.000000e+00 : f32
    %386 = vector.broadcast %cst_139 : f32 to vector<2x64xf32>
    %387 = arith.addf %386, %385 : vector<2x64xf32>
    %388 = arith.divf %386, %387 : vector<2x64xf32>
    %389 = arith.mulf %380, %350 : vector<2x64xf32>
    %390 = arith.mulf %374, %382 : vector<2x64xf32>
    %391 = arith.addf %389, %390 : vector<2x64xf32>
    %392 = math.tanh %391 : vector<2x64xf32>
    %393 = arith.mulf %388, %392 : vector<2x64xf32>
    %394 = vector.extract_strided_slice %393 {offsets = [0, 0], sizes = [2, 32], strides = [1, 1]} : vector<2x64xf32> to vector<2x32xf32>
    %395 = arith.index_cast %c7_i32_133 : i32 to index
    %c0_140 = arith.constant 0 : index
    %c0_141 = arith.constant 0 : index
    %396 = vector.load %arg13[%395, %c0_140, %c0_141] : memref<8x2x64xf32, #tpu.memory_space<vmem>>, vector<1x2x32xf32>
    %397 = vector.shape_cast %396 : vector<1x2x32xf32> to vector<2x32xf32>
    %398 = vector.shape_cast %394 : vector<2x32xf32> to vector<1x2x32xf32>
    tpu.vector_store %arg13[%395, %c0_140, %c0_141], %398 {strides = array<i32>} : memref<8x2x64xf32, #tpu.memory_space<vmem>>, vector<1x2x32xf32>,
    %399 = vector.extract_strided_slice %393 {offsets = [0, 32], sizes = [2, 32], strides = [1, 1]} : vector<2x64xf32> to vector<2x32xf32>
    %c7_i32_142 = arith.constant 7 : i32
    %400 = arith.subi %c7_i32_142, %c7_i32_133 : i32
    %401 = arith.index_cast %400 : i32 to index
    %c0_143 = arith.constant 0 : index
    %c32_144 = arith.constant 32 : index
    %402 = vector.load %arg13[%401, %c0_143, %c32_144] : memref<8x2x64xf32, #tpu.memory_space<vmem>>, vector<1x2x32xf32>
    %403 = vector.shape_cast %402 : vector<1x2x32xf32> to vector<2x32xf32>
    %404 = vector.shape_cast %399 : vector<2x32xf32> to vector<1x2x32xf32>
    tpu.vector_store %arg13[%401, %c0_143, %c32_144], %404 {strides = array<i32>} : memref<8x2x64xf32, #tpu.memory_space<vmem>>, vector<1x2x32xf32>,
    %c8_i32 = arith.constant 8 : i32
    %c0_145 = arith.constant 0 : index
    %c0_146 = arith.constant 0 : index
    %c0_147 = arith.constant 0 : index
    %405 = vector.load %arg13[%c0_145, %c0_146, %c0_147] : memref<8x2x64xf32, #tpu.memory_space<vmem>>, vector<8x2x64xf32>
    %c0_148 = arith.constant 0 : index
    %c0_149 = arith.constant 0 : index
    %406 = vector.load %arg4[%c0_148, %c0_149] : memref<64x256xf32, #tpu.memory_space<vmem>>, vector<64x256xf32>
    %cst_150 = arith.constant dense<0.000000e+00> : vector<8x2x256xf32>
    %407 = tpu.matmul %405, %406, %cst_150 {dimension_numbers = #tpu.dot_dimension_numbers<[2], [0], [0, 1], [1], [0, 0, 0, 1, 1, 1], [], []>} : vector<8x2x64xf32>, vector<64x256xf32>, vector<8x2x256xf32> -> vector<8x2x256xf32>
    %c0_151 = arith.constant 0 : index
    %c0_152 = arith.constant 0 : index
    %408 = vector.load %arg5[%c0_151, %c0_152] : memref<1x256xf32, #tpu.memory_space<vmem>>, vector<1x256xf32>
    %409 = vector.shape_cast %408 : vector<1x256xf32> to vector<1x1x256xf32>
    %410 = vector.broadcast %409 : vector<1x1x256xf32> to vector<8x2x256xf32>
    %411 = arith.addf %407, %410 : vector<8x2x256xf32>
    %c0_153 = arith.constant 0 : index
    %c0_154 = arith.constant 0 : index
    %c0_155 = arith.constant 0 : index
    %412 = vector.load %arg12[%c0_153, %c0_154, %c0_155] : memref<8x2x256xf32, #tpu.memory_space<vmem>>, vector<8x2x256xf32>
    tpu.vector_store %arg12[%c0_153, %c0_154, %c0_155], %411 {strides = array<i32>} : memref<8x2x256xf32, #tpu.memory_space<vmem>>, vector<8x2x256xf32>,
    %c0_156 = arith.constant 0 : index
    %c0_157 = arith.constant 0 : index
    %c0_158 = arith.constant 0 : index
    %413 = vector.load %arg12[%c0_156, %c0_157, %c0_158] : memref<8x2x256xf32, #tpu.memory_space<vmem>>, vector<1x2x256xf32>
    %414 = vector.shape_cast %413 : vector<1x2x256xf32> to vector<2x256xf32>
    %c7_159 = arith.constant 7 : index
    %c0_160 = arith.constant 0 : index
    %c0_161 = arith.constant 0 : index
    %415 = vector.load %arg12[%c7_159, %c0_160, %c0_161] : memref<8x2x256xf32, #tpu.memory_space<vmem>>, vector<1x2x256xf32>
    %416 = vector.shape_cast %415 : vector<1x2x256xf32> to vector<2x256xf32>
    %417 = arith.select %18, %414, %416 : vector<2x256xi1>, vector<2x256xf32>
    %c0_162 = arith.constant 0 : index
    %c0_163 = arith.constant 0 : index
    %c0_164 = arith.constant 0 : index
    %418 = vector.load %arg12[%c0_162, %c0_163, %c0_164] : memref<8x2x256xf32, #tpu.memory_space<vmem>>, vector<1x2x256xf32>
    %419 = vector.shape_cast %418 : vector<1x2x256xf32> to vector<2x256xf32>
    %420 = vector.shape_cast %417 : vector<2x256xf32> to vector<1x2x256xf32>
    tpu.vector_store %arg12[%c0_162, %c0_163, %c0_164], %420 {strides = array<i32>} : memref<8x2x256xf32, #tpu.memory_space<vmem>>, vector<1x2x256xf32>,
    %421 = arith.select %18, %416, %414 : vector<2x256xi1>, vector<2x256xf32>
    %c7_165 = arith.constant 7 : index
    %c0_166 = arith.constant 0 : index
    %c0_167 = arith.constant 0 : index
    %422 = vector.load %arg12[%c7_165, %c0_166, %c0_167] : memref<8x2x256xf32, #tpu.memory_space<vmem>>, vector<1x2x256xf32>
    %423 = vector.shape_cast %422 : vector<1x2x256xf32> to vector<2x256xf32>
    %424 = vector.shape_cast %421 : vector<2x256xf32> to vector<1x2x256xf32>
    tpu.vector_store %arg12[%c7_165, %c0_166, %c0_167], %424 {strides = array<i32>} : memref<8x2x256xf32, #tpu.memory_space<vmem>>, vector<1x2x256xf32>,
    %c1_168 = arith.constant 1 : index
    %c0_169 = arith.constant 0 : index
    %c0_170 = arith.constant 0 : index
    %425 = vector.load %arg12[%c1_168, %c0_169, %c0_170] : memref<8x2x256xf32, #tpu.memory_space<vmem>>, vector<1x2x256xf32>
    %426 = vector.shape_cast %425 : vector<1x2x256xf32> to vector<2x256xf32>
    %c6_171 = arith.constant 6 : index
    %c0_172 = arith.constant 0 : index
    %c0_173 = arith.constant 0 : index
    %427 = vector.load %arg12[%c6_171, %c0_172, %c0_173] : memref<8x2x256xf32, #tpu.memory_space<vmem>>, vector<1x2x256xf32>
    %428 = vector.shape_cast %427 : vector<1x2x256xf32> to vector<2x256xf32>
    %429 = arith.select %18, %426, %428 : vector<2x256xi1>, vector<2x256xf32>
    %c1_174 = arith.constant 1 : index
    %c0_175 = arith.constant 0 : index
    %c0_176 = arith.constant 0 : index
    %430 = vector.load %arg12[%c1_174, %c0_175, %c0_176] : memref<8x2x256xf32, #tpu.memory_space<vmem>>, vector<1x2x256xf32>
    %431 = vector.shape_cast %430 : vector<1x2x256xf32> to vector<2x256xf32>
    %432 = vector.shape_cast %429 : vector<2x256xf32> to vector<1x2x256xf32>
    tpu.vector_store %arg12[%c1_174, %c0_175, %c0_176], %432 {strides = array<i32>} : memref<8x2x256xf32, #tpu.memory_space<vmem>>, vector<1x2x256xf32>,
    %433 = arith.select %18, %428, %426 : vector<2x256xi1>, vector<2x256xf32>
    %c6_177 = arith.constant 6 : index
    %c0_178 = arith.constant 0 : index
    %c0_179 = arith.constant 0 : index
    %434 = vector.load %arg12[%c6_177, %c0_178, %c0_179] : memref<8x2x256xf32, #tpu.memory_space<vmem>>, vector<1x2x256xf32>
    %435 = vector.shape_cast %434 : vector<1x2x256xf32> to vector<2x256xf32>
    %436 = vector.shape_cast %433 : vector<2x256xf32> to vector<1x2x256xf32>
    tpu.vector_store %arg12[%c6_177, %c0_178, %c0_179], %436 {strides = array<i32>} : memref<8x2x256xf32, #tpu.memory_space<vmem>>, vector<1x2x256xf32>,
    %c2_180 = arith.constant 2 : index
    %c0_181 = arith.constant 0 : index
    %c0_182 = arith.constant 0 : index
    %437 = vector.load %arg12[%c2_180, %c0_181, %c0_182] : memref<8x2x256xf32, #tpu.memory_space<vmem>>, vector<1x2x256xf32>
    %438 = vector.shape_cast %437 : vector<1x2x256xf32> to vector<2x256xf32>
    %c5_183 = arith.constant 5 : index
    %c0_184 = arith.constant 0 : index
    %c0_185 = arith.constant 0 : index
    %439 = vector.load %arg12[%c5_183, %c0_184, %c0_185] : memref<8x2x256xf32, #tpu.memory_space<vmem>>, vector<1x2x256xf32>
    %440 = vector.shape_cast %439 : vector<1x2x256xf32> to vector<2x256xf32>
    %441 = arith.select %18, %438, %440 : vector<2x256xi1>, vector<2x256xf32>
    %c2_186 = arith.constant 2 : index
    %c0_187 = arith.constant 0 : index
    %c0_188 = arith.constant 0 : index
    %442 = vector.load %arg12[%c2_186, %c0_187, %c0_188] : memref<8x2x256xf32, #tpu.memory_space<vmem>>, vector<1x2x256xf32>
    %443 = vector.shape_cast %442 : vector<1x2x256xf32> to vector<2x256xf32>
    %444 = vector.shape_cast %441 : vector<2x256xf32> to vector<1x2x256xf32>
    tpu.vector_store %arg12[%c2_186, %c0_187, %c0_188], %444 {strides = array<i32>} : memref<8x2x256xf32, #tpu.memory_space<vmem>>, vector<1x2x256xf32>,
    %445 = arith.select %18, %440, %438 : vector<2x256xi1>, vector<2x256xf32>
    %c5_189 = arith.constant 5 : index
    %c0_190 = arith.constant 0 : index
    %c0_191 = arith.constant 0 : index
    %446 = vector.load %arg12[%c5_189, %c0_190, %c0_191] : memref<8x2x256xf32, #tpu.memory_space<vmem>>, vector<1x2x256xf32>
    %447 = vector.shape_cast %446 : vector<1x2x256xf32> to vector<2x256xf32>
    %448 = vector.shape_cast %445 : vector<2x256xf32> to vector<1x2x256xf32>
    tpu.vector_store %arg12[%c5_189, %c0_190, %c0_191], %448 {strides = array<i32>} : memref<8x2x256xf32, #tpu.memory_space<vmem>>, vector<1x2x256xf32>,
    %c3_192 = arith.constant 3 : index
    %c0_193 = arith.constant 0 : index
    %c0_194 = arith.constant 0 : index
    %449 = vector.load %arg12[%c3_192, %c0_193, %c0_194] : memref<8x2x256xf32, #tpu.memory_space<vmem>>, vector<1x2x256xf32>
    %450 = vector.shape_cast %449 : vector<1x2x256xf32> to vector<2x256xf32>
    %c4_195 = arith.constant 4 : index
    %c0_196 = arith.constant 0 : index
    %c0_197 = arith.constant 0 : index
    %451 = vector.load %arg12[%c4_195, %c0_196, %c0_197] : memref<8x2x256xf32, #tpu.memory_space<vmem>>, vector<1x2x256xf32>
    %452 = vector.shape_cast %451 : vector<1x2x256xf32> to vector<2x256xf32>
    %453 = arith.select %18, %450, %452 : vector<2x256xi1>, vector<2x256xf32>
    %c3_198 = arith.constant 3 : index
    %c0_199 = arith.constant 0 : index
    %c0_200 = arith.constant 0 : index
    %454 = vector.load %arg12[%c3_198, %c0_199, %c0_200] : memref<8x2x256xf32, #tpu.memory_space<vmem>>, vector<1x2x256xf32>
    %455 = vector.shape_cast %454 : vector<1x2x256xf32> to vector<2x256xf32>
    %456 = vector.shape_cast %453 : vector<2x256xf32> to vector<1x2x256xf32>
    tpu.vector_store %arg12[%c3_198, %c0_199, %c0_200], %456 {strides = array<i32>} : memref<8x2x256xf32, #tpu.memory_space<vmem>>, vector<1x2x256xf32>,
    %457 = arith.select %18, %452, %450 : vector<2x256xi1>, vector<2x256xf32>
    %c4_201 = arith.constant 4 : index
    %c0_202 = arith.constant 0 : index
    %c0_203 = arith.constant 0 : index
    %458 = vector.load %arg12[%c4_201, %c0_202, %c0_203] : memref<8x2x256xf32, #tpu.memory_space<vmem>>, vector<1x2x256xf32>
    %459 = vector.shape_cast %458 : vector<1x2x256xf32> to vector<2x256xf32>
    %460 = vector.shape_cast %457 : vector<2x256xf32> to vector<1x2x256xf32>
    tpu.vector_store %arg12[%c4_201, %c0_202, %c0_203], %460 {strides = array<i32>} : memref<8x2x256xf32, #tpu.memory_space<vmem>>, vector<1x2x256xf32>,
    %c0_204 = arith.constant 0 : index
    %c0_205 = arith.constant 0 : index
    %461 = vector.load %arg6[%c0_204, %c0_205] : memref<64x256xf32, #tpu.memory_space<vmem>>, vector<64x256xf32>
    %cst_206 = arith.constant 0.000000e+00 : f32
    %462 = vector.broadcast %cst_206 : f32 to vector<2x64xf32>
    %c0_i32_207 = arith.constant 0 : i32
    %cst_208 = arith.constant dense<0.000000e+00> : vector<2x256xf32>
    %463 = tpu.matmul %462, %461, %cst_208 {dimension_numbers = #tpu.dot_dimension_numbers<[1], [0], [0], [1], [0, 0, 1, 1], [], []>} : vector<2x64xf32>, vector<64x256xf32>, vector<2x256xf32> -> vector<2x256xf32>
    %464 = arith.index_cast %c0_i32_207 : i32 to index
    %c0_209 = arith.constant 0 : index
    %c0_210 = arith.constant 0 : index
    %465 = vector.load %arg12[%464, %c0_209, %c0_210] : memref<8x2x256xf32, #tpu.memory_space<vmem>>, vector<1x2x256xf32>
    %466 = vector.shape_cast %465 : vector<1x2x256xf32> to vector<2x256xf32>
    %467 = arith.addf %463, %466 : vector<2x256xf32>
    %468 = vector.extract_strided_slice %467 {offsets = [0, 0], sizes = [2, 64], strides = [1, 1]} : vector<2x256xf32> to vector<2x64xf32>
    %469 = arith.negf %468 : vector<2x64xf32>
    %470 = math.exp %469 : vector<2x64xf32>
    %cst_211 = arith.constant 1.000000e+00 : f32
    %471 = vector.broadcast %cst_211 : f32 to vector<2x64xf32>
    %472 = arith.addf %471, %470 : vector<2x64xf32>
    %473 = arith.divf %471, %472 : vector<2x64xf32>
    %474 = vector.extract_strided_slice %467 {offsets = [0, 64], sizes = [2, 64], strides = [1, 1]} : vector<2x256xf32> to vector<2x64xf32>
    %475 = arith.negf %474 : vector<2x64xf32>
    %476 = math.exp %475 : vector<2x64xf32>
    %cst_212 = arith.constant 1.000000e+00 : f32
    %477 = vector.broadcast %cst_212 : f32 to vector<2x64xf32>
    %478 = arith.addf %477, %476 : vector<2x64xf32>
    %479 = arith.divf %477, %478 : vector<2x64xf32>
    %480 = vector.extract_strided_slice %467 {offsets = [0, 128], sizes = [2, 64], strides = [1, 1]} : vector<2x256xf32> to vector<2x64xf32>
    %481 = math.tanh %480 : vector<2x64xf32>
    %482 = vector.extract_strided_slice %467 {offsets = [0, 192], sizes = [2, 64], strides = [1, 1]} : vector<2x256xf32> to vector<2x64xf32>
    %483 = arith.negf %482 : vector<2x64xf32>
    %484 = math.exp %483 : vector<2x64xf32>
    %cst_213 = arith.constant 1.000000e+00 : f32
    %485 = vector.broadcast %cst_213 : f32 to vector<2x64xf32>
    %486 = arith.addf %485, %484 : vector<2x64xf32>
    %487 = arith.divf %485, %486 : vector<2x64xf32>
    %488 = arith.mulf %479, %462 : vector<2x64xf32>
    %489 = arith.mulf %473, %481 : vector<2x64xf32>
    %490 = arith.addf %488, %489 : vector<2x64xf32>
    %491 = math.tanh %490 : vector<2x64xf32>
    %492 = arith.mulf %487, %491 : vector<2x64xf32>
    %493 = vector.extract_strided_slice %492 {offsets = [0, 0], sizes = [2, 32], strides = [1, 1]} : vector<2x64xf32> to vector<2x32xf32>
    %494 = arith.index_cast %c0_i32_207 : i32 to index
    %c0_214 = arith.constant 0 : index
    %c0_215 = arith.constant 0 : index
    %495 = vector.load %arg14[%494, %c0_214, %c0_215] : memref<8x2x64xf32, #tpu.memory_space<vmem>>, vector<1x2x32xf32>
    %496 = vector.shape_cast %495 : vector<1x2x32xf32> to vector<2x32xf32>
    %497 = vector.shape_cast %493 : vector<2x32xf32> to vector<1x2x32xf32>
    tpu.vector_store %arg14[%494, %c0_214, %c0_215], %497 {strides = array<i32>} : memref<8x2x64xf32, #tpu.memory_space<vmem>>, vector<1x2x32xf32>,
    %498 = vector.extract_strided_slice %492 {offsets = [0, 32], sizes = [2, 32], strides = [1, 1]} : vector<2x64xf32> to vector<2x32xf32>
    %c7_i32_216 = arith.constant 7 : i32
    %499 = arith.subi %c7_i32_216, %c0_i32_207 : i32
    %500 = arith.index_cast %499 : i32 to index
    %c0_217 = arith.constant 0 : index
    %c32_218 = arith.constant 32 : index
    %501 = vector.load %arg14[%500, %c0_217, %c32_218] : memref<8x2x64xf32, #tpu.memory_space<vmem>>, vector<1x2x32xf32>
    %502 = vector.shape_cast %501 : vector<1x2x32xf32> to vector<2x32xf32>
    %503 = vector.shape_cast %498 : vector<2x32xf32> to vector<1x2x32xf32>
    tpu.vector_store %arg14[%500, %c0_217, %c32_218], %503 {strides = array<i32>} : memref<8x2x64xf32, #tpu.memory_space<vmem>>, vector<1x2x32xf32>,
    %c1_i32_219 = arith.constant 1 : i32
    %cst_220 = arith.constant dense<0.000000e+00> : vector<2x256xf32>
    %504 = tpu.matmul %492, %461, %cst_220 {dimension_numbers = #tpu.dot_dimension_numbers<[1], [0], [0], [1], [0, 0, 1, 1], [], []>} : vector<2x64xf32>, vector<64x256xf32>, vector<2x256xf32> -> vector<2x256xf32>
    %505 = arith.index_cast %c1_i32_219 : i32 to index
    %c0_221 = arith.constant 0 : index
    %c0_222 = arith.constant 0 : index
    %506 = vector.load %arg12[%505, %c0_221, %c0_222] : memref<8x2x256xf32, #tpu.memory_space<vmem>>, vector<1x2x256xf32>
    %507 = vector.shape_cast %506 : vector<1x2x256xf32> to vector<2x256xf32>
    %508 = arith.addf %504, %507 : vector<2x256xf32>
    %509 = vector.extract_strided_slice %508 {offsets = [0, 0], sizes = [2, 64], strides = [1, 1]} : vector<2x256xf32> to vector<2x64xf32>
    %510 = arith.negf %509 : vector<2x64xf32>
    %511 = math.exp %510 : vector<2x64xf32>
    %cst_223 = arith.constant 1.000000e+00 : f32
    %512 = vector.broadcast %cst_223 : f32 to vector<2x64xf32>
    %513 = arith.addf %512, %511 : vector<2x64xf32>
    %514 = arith.divf %512, %513 : vector<2x64xf32>
    %515 = vector.extract_strided_slice %508 {offsets = [0, 64], sizes = [2, 64], strides = [1, 1]} : vector<2x256xf32> to vector<2x64xf32>
    %516 = arith.negf %515 : vector<2x64xf32>
    %517 = math.exp %516 : vector<2x64xf32>
    %cst_224 = arith.constant 1.000000e+00 : f32
    %518 = vector.broadcast %cst_224 : f32 to vector<2x64xf32>
    %519 = arith.addf %518, %517 : vector<2x64xf32>
    %520 = arith.divf %518, %519 : vector<2x64xf32>
    %521 = vector.extract_strided_slice %508 {offsets = [0, 128], sizes = [2, 64], strides = [1, 1]} : vector<2x256xf32> to vector<2x64xf32>
    %522 = math.tanh %521 : vector<2x64xf32>
    %523 = vector.extract_strided_slice %508 {offsets = [0, 192], sizes = [2, 64], strides = [1, 1]} : vector<2x256xf32> to vector<2x64xf32>
    %524 = arith.negf %523 : vector<2x64xf32>
    %525 = math.exp %524 : vector<2x64xf32>
    %cst_225 = arith.constant 1.000000e+00 : f32
    %526 = vector.broadcast %cst_225 : f32 to vector<2x64xf32>
    %527 = arith.addf %526, %525 : vector<2x64xf32>
    %528 = arith.divf %526, %527 : vector<2x64xf32>
    %529 = arith.mulf %520, %490 : vector<2x64xf32>
    %530 = arith.mulf %514, %522 : vector<2x64xf32>
    %531 = arith.addf %529, %530 : vector<2x64xf32>
    %532 = math.tanh %531 : vector<2x64xf32>
    %533 = arith.mulf %528, %532 : vector<2x64xf32>
    %534 = vector.extract_strided_slice %533 {offsets = [0, 0], sizes = [2, 32], strides = [1, 1]} : vector<2x64xf32> to vector<2x32xf32>
    %535 = arith.index_cast %c1_i32_219 : i32 to index
    %c0_226 = arith.constant 0 : index
    %c0_227 = arith.constant 0 : index
    %536 = vector.load %arg14[%535, %c0_226, %c0_227] : memref<8x2x64xf32, #tpu.memory_space<vmem>>, vector<1x2x32xf32>
    %537 = vector.shape_cast %536 : vector<1x2x32xf32> to vector<2x32xf32>
    %538 = vector.shape_cast %534 : vector<2x32xf32> to vector<1x2x32xf32>
    tpu.vector_store %arg14[%535, %c0_226, %c0_227], %538 {strides = array<i32>} : memref<8x2x64xf32, #tpu.memory_space<vmem>>, vector<1x2x32xf32>,
    %539 = vector.extract_strided_slice %533 {offsets = [0, 32], sizes = [2, 32], strides = [1, 1]} : vector<2x64xf32> to vector<2x32xf32>
    %c7_i32_228 = arith.constant 7 : i32
    %540 = arith.subi %c7_i32_228, %c1_i32_219 : i32
    %541 = arith.index_cast %540 : i32 to index
    %c0_229 = arith.constant 0 : index
    %c32_230 = arith.constant 32 : index
    %542 = vector.load %arg14[%541, %c0_229, %c32_230] : memref<8x2x64xf32, #tpu.memory_space<vmem>>, vector<1x2x32xf32>
    %543 = vector.shape_cast %542 : vector<1x2x32xf32> to vector<2x32xf32>
    %544 = vector.shape_cast %539 : vector<2x32xf32> to vector<1x2x32xf32>
    tpu.vector_store %arg14[%541, %c0_229, %c32_230], %544 {strides = array<i32>} : memref<8x2x64xf32, #tpu.memory_space<vmem>>, vector<1x2x32xf32>,
    %c2_i32_231 = arith.constant 2 : i32
    %cst_232 = arith.constant dense<0.000000e+00> : vector<2x256xf32>
    %545 = tpu.matmul %533, %461, %cst_232 {dimension_numbers = #tpu.dot_dimension_numbers<[1], [0], [0], [1], [0, 0, 1, 1], [], []>} : vector<2x64xf32>, vector<64x256xf32>, vector<2x256xf32> -> vector<2x256xf32>
    %546 = arith.index_cast %c2_i32_231 : i32 to index
    %c0_233 = arith.constant 0 : index
    %c0_234 = arith.constant 0 : index
    %547 = vector.load %arg12[%546, %c0_233, %c0_234] : memref<8x2x256xf32, #tpu.memory_space<vmem>>, vector<1x2x256xf32>
    %548 = vector.shape_cast %547 : vector<1x2x256xf32> to vector<2x256xf32>
    %549 = arith.addf %545, %548 : vector<2x256xf32>
    %550 = vector.extract_strided_slice %549 {offsets = [0, 0], sizes = [2, 64], strides = [1, 1]} : vector<2x256xf32> to vector<2x64xf32>
    %551 = arith.negf %550 : vector<2x64xf32>
    %552 = math.exp %551 : vector<2x64xf32>
    %cst_235 = arith.constant 1.000000e+00 : f32
    %553 = vector.broadcast %cst_235 : f32 to vector<2x64xf32>
    %554 = arith.addf %553, %552 : vector<2x64xf32>
    %555 = arith.divf %553, %554 : vector<2x64xf32>
    %556 = vector.extract_strided_slice %549 {offsets = [0, 64], sizes = [2, 64], strides = [1, 1]} : vector<2x256xf32> to vector<2x64xf32>
    %557 = arith.negf %556 : vector<2x64xf32>
    %558 = math.exp %557 : vector<2x64xf32>
    %cst_236 = arith.constant 1.000000e+00 : f32
    %559 = vector.broadcast %cst_236 : f32 to vector<2x64xf32>
    %560 = arith.addf %559, %558 : vector<2x64xf32>
    %561 = arith.divf %559, %560 : vector<2x64xf32>
    %562 = vector.extract_strided_slice %549 {offsets = [0, 128], sizes = [2, 64], strides = [1, 1]} : vector<2x256xf32> to vector<2x64xf32>
    %563 = math.tanh %562 : vector<2x64xf32>
    %564 = vector.extract_strided_slice %549 {offsets = [0, 192], sizes = [2, 64], strides = [1, 1]} : vector<2x256xf32> to vector<2x64xf32>
    %565 = arith.negf %564 : vector<2x64xf32>
    %566 = math.exp %565 : vector<2x64xf32>
    %cst_237 = arith.constant 1.000000e+00 : f32
    %567 = vector.broadcast %cst_237 : f32 to vector<2x64xf32>
    %568 = arith.addf %567, %566 : vector<2x64xf32>
    %569 = arith.divf %567, %568 : vector<2x64xf32>
    %570 = arith.mulf %561, %531 : vector<2x64xf32>
    %571 = arith.mulf %555, %563 : vector<2x64xf32>
    %572 = arith.addf %570, %571 : vector<2x64xf32>
    %573 = math.tanh %572 : vector<2x64xf32>
    %574 = arith.mulf %569, %573 : vector<2x64xf32>
    %575 = vector.extract_strided_slice %574 {offsets = [0, 0], sizes = [2, 32], strides = [1, 1]} : vector<2x64xf32> to vector<2x32xf32>
    %576 = arith.index_cast %c2_i32_231 : i32 to index
    %c0_238 = arith.constant 0 : index
    %c0_239 = arith.constant 0 : index
    %577 = vector.load %arg14[%576, %c0_238, %c0_239] : memref<8x2x64xf32, #tpu.memory_space<vmem>>, vector<1x2x32xf32>
    %578 = vector.shape_cast %577 : vector<1x2x32xf32> to vector<2x32xf32>
    %579 = vector.shape_cast %575 : vector<2x32xf32> to vector<1x2x32xf32>
    tpu.vector_store %arg14[%576, %c0_238, %c0_239], %579 {strides = array<i32>} : memref<8x2x64xf32, #tpu.memory_space<vmem>>, vector<1x2x32xf32>,
    %580 = vector.extract_strided_slice %574 {offsets = [0, 32], sizes = [2, 32], strides = [1, 1]} : vector<2x64xf32> to vector<2x32xf32>
    %c7_i32_240 = arith.constant 7 : i32
    %581 = arith.subi %c7_i32_240, %c2_i32_231 : i32
    %582 = arith.index_cast %581 : i32 to index
    %c0_241 = arith.constant 0 : index
    %c32_242 = arith.constant 32 : index
    %583 = vector.load %arg14[%582, %c0_241, %c32_242] : memref<8x2x64xf32, #tpu.memory_space<vmem>>, vector<1x2x32xf32>
    %584 = vector.shape_cast %583 : vector<1x2x32xf32> to vector<2x32xf32>
    %585 = vector.shape_cast %580 : vector<2x32xf32> to vector<1x2x32xf32>
    tpu.vector_store %arg14[%582, %c0_241, %c32_242], %585 {strides = array<i32>} : memref<8x2x64xf32, #tpu.memory_space<vmem>>, vector<1x2x32xf32>,
    %c3_i32_243 = arith.constant 3 : i32
    %cst_244 = arith.constant dense<0.000000e+00> : vector<2x256xf32>
    %586 = tpu.matmul %574, %461, %cst_244 {dimension_numbers = #tpu.dot_dimension_numbers<[1], [0], [0], [1], [0, 0, 1, 1], [], []>} : vector<2x64xf32>, vector<64x256xf32>, vector<2x256xf32> -> vector<2x256xf32>
    %587 = arith.index_cast %c3_i32_243 : i32 to index
    %c0_245 = arith.constant 0 : index
    %c0_246 = arith.constant 0 : index
    %588 = vector.load %arg12[%587, %c0_245, %c0_246] : memref<8x2x256xf32, #tpu.memory_space<vmem>>, vector<1x2x256xf32>
    %589 = vector.shape_cast %588 : vector<1x2x256xf32> to vector<2x256xf32>
    %590 = arith.addf %586, %589 : vector<2x256xf32>
    %591 = vector.extract_strided_slice %590 {offsets = [0, 0], sizes = [2, 64], strides = [1, 1]} : vector<2x256xf32> to vector<2x64xf32>
    %592 = arith.negf %591 : vector<2x64xf32>
    %593 = math.exp %592 : vector<2x64xf32>
    %cst_247 = arith.constant 1.000000e+00 : f32
    %594 = vector.broadcast %cst_247 : f32 to vector<2x64xf32>
    %595 = arith.addf %594, %593 : vector<2x64xf32>
    %596 = arith.divf %594, %595 : vector<2x64xf32>
    %597 = vector.extract_strided_slice %590 {offsets = [0, 64], sizes = [2, 64], strides = [1, 1]} : vector<2x256xf32> to vector<2x64xf32>
    %598 = arith.negf %597 : vector<2x64xf32>
    %599 = math.exp %598 : vector<2x64xf32>
    %cst_248 = arith.constant 1.000000e+00 : f32
    %600 = vector.broadcast %cst_248 : f32 to vector<2x64xf32>
    %601 = arith.addf %600, %599 : vector<2x64xf32>
    %602 = arith.divf %600, %601 : vector<2x64xf32>
    %603 = vector.extract_strided_slice %590 {offsets = [0, 128], sizes = [2, 64], strides = [1, 1]} : vector<2x256xf32> to vector<2x64xf32>
    %604 = math.tanh %603 : vector<2x64xf32>
    %605 = vector.extract_strided_slice %590 {offsets = [0, 192], sizes = [2, 64], strides = [1, 1]} : vector<2x256xf32> to vector<2x64xf32>
    %606 = arith.negf %605 : vector<2x64xf32>
    %607 = math.exp %606 : vector<2x64xf32>
    %cst_249 = arith.constant 1.000000e+00 : f32
    %608 = vector.broadcast %cst_249 : f32 to vector<2x64xf32>
    %609 = arith.addf %608, %607 : vector<2x64xf32>
    %610 = arith.divf %608, %609 : vector<2x64xf32>
    %611 = arith.mulf %602, %572 : vector<2x64xf32>
    %612 = arith.mulf %596, %604 : vector<2x64xf32>
    %613 = arith.addf %611, %612 : vector<2x64xf32>
    %614 = math.tanh %613 : vector<2x64xf32>
    %615 = arith.mulf %610, %614 : vector<2x64xf32>
    %616 = vector.extract_strided_slice %615 {offsets = [0, 0], sizes = [2, 32], strides = [1, 1]} : vector<2x64xf32> to vector<2x32xf32>
    %617 = arith.index_cast %c3_i32_243 : i32 to index
    %c0_250 = arith.constant 0 : index
    %c0_251 = arith.constant 0 : index
    %618 = vector.load %arg14[%617, %c0_250, %c0_251] : memref<8x2x64xf32, #tpu.memory_space<vmem>>, vector<1x2x32xf32>
    %619 = vector.shape_cast %618 : vector<1x2x32xf32> to vector<2x32xf32>
    %620 = vector.shape_cast %616 : vector<2x32xf32> to vector<1x2x32xf32>
    tpu.vector_store %arg14[%617, %c0_250, %c0_251], %620 {strides = array<i32>} : memref<8x2x64xf32, #tpu.memory_space<vmem>>, vector<1x2x32xf32>,
    %621 = vector.extract_strided_slice %615 {offsets = [0, 32], sizes = [2, 32], strides = [1, 1]} : vector<2x64xf32> to vector<2x32xf32>
    %c7_i32_252 = arith.constant 7 : i32
    %622 = arith.subi %c7_i32_252, %c3_i32_243 : i32
    %623 = arith.index_cast %622 : i32 to index
    %c0_253 = arith.constant 0 : index
    %c32_254 = arith.constant 32 : index
    %624 = vector.load %arg14[%623, %c0_253, %c32_254] : memref<8x2x64xf32, #tpu.memory_space<vmem>>, vector<1x2x32xf32>
    %625 = vector.shape_cast %624 : vector<1x2x32xf32> to vector<2x32xf32>
    %626 = vector.shape_cast %621 : vector<2x32xf32> to vector<1x2x32xf32>
    tpu.vector_store %arg14[%623, %c0_253, %c32_254], %626 {strides = array<i32>} : memref<8x2x64xf32, #tpu.memory_space<vmem>>, vector<1x2x32xf32>,
    %c4_i32_255 = arith.constant 4 : i32
    %cst_256 = arith.constant dense<0.000000e+00> : vector<2x256xf32>
    %627 = tpu.matmul %615, %461, %cst_256 {dimension_numbers = #tpu.dot_dimension_numbers<[1], [0], [0], [1], [0, 0, 1, 1], [], []>} : vector<2x64xf32>, vector<64x256xf32>, vector<2x256xf32> -> vector<2x256xf32>
    %628 = arith.index_cast %c4_i32_255 : i32 to index
    %c0_257 = arith.constant 0 : index
    %c0_258 = arith.constant 0 : index
    %629 = vector.load %arg12[%628, %c0_257, %c0_258] : memref<8x2x256xf32, #tpu.memory_space<vmem>>, vector<1x2x256xf32>
    %630 = vector.shape_cast %629 : vector<1x2x256xf32> to vector<2x256xf32>
    %631 = arith.addf %627, %630 : vector<2x256xf32>
    %632 = vector.extract_strided_slice %631 {offsets = [0, 0], sizes = [2, 64], strides = [1, 1]} : vector<2x256xf32> to vector<2x64xf32>
    %633 = arith.negf %632 : vector<2x64xf32>
    %634 = math.exp %633 : vector<2x64xf32>
    %cst_259 = arith.constant 1.000000e+00 : f32
    %635 = vector.broadcast %cst_259 : f32 to vector<2x64xf32>
    %636 = arith.addf %635, %634 : vector<2x64xf32>
    %637 = arith.divf %635, %636 : vector<2x64xf32>
    %638 = vector.extract_strided_slice %631 {offsets = [0, 64], sizes = [2, 64], strides = [1, 1]} : vector<2x256xf32> to vector<2x64xf32>
    %639 = arith.negf %638 : vector<2x64xf32>
    %640 = math.exp %639 : vector<2x64xf32>
    %cst_260 = arith.constant 1.000000e+00 : f32
    %641 = vector.broadcast %cst_260 : f32 to vector<2x64xf32>
    %642 = arith.addf %641, %640 : vector<2x64xf32>
    %643 = arith.divf %641, %642 : vector<2x64xf32>
    %644 = vector.extract_strided_slice %631 {offsets = [0, 128], sizes = [2, 64], strides = [1, 1]} : vector<2x256xf32> to vector<2x64xf32>
    %645 = math.tanh %644 : vector<2x64xf32>
    %646 = vector.extract_strided_slice %631 {offsets = [0, 192], sizes = [2, 64], strides = [1, 1]} : vector<2x256xf32> to vector<2x64xf32>
    %647 = arith.negf %646 : vector<2x64xf32>
    %648 = math.exp %647 : vector<2x64xf32>
    %cst_261 = arith.constant 1.000000e+00 : f32
    %649 = vector.broadcast %cst_261 : f32 to vector<2x64xf32>
    %650 = arith.addf %649, %648 : vector<2x64xf32>
    %651 = arith.divf %649, %650 : vector<2x64xf32>
    %652 = arith.mulf %643, %613 : vector<2x64xf32>
    %653 = arith.mulf %637, %645 : vector<2x64xf32>
    %654 = arith.addf %652, %653 : vector<2x64xf32>
    %655 = math.tanh %654 : vector<2x64xf32>
    %656 = arith.mulf %651, %655 : vector<2x64xf32>
    %657 = vector.extract_strided_slice %656 {offsets = [0, 0], sizes = [2, 32], strides = [1, 1]} : vector<2x64xf32> to vector<2x32xf32>
    %658 = arith.index_cast %c4_i32_255 : i32 to index
    %c0_262 = arith.constant 0 : index
    %c0_263 = arith.constant 0 : index
    %659 = vector.load %arg14[%658, %c0_262, %c0_263] : memref<8x2x64xf32, #tpu.memory_space<vmem>>, vector<1x2x32xf32>
    %660 = vector.shape_cast %659 : vector<1x2x32xf32> to vector<2x32xf32>
    %661 = vector.shape_cast %657 : vector<2x32xf32> to vector<1x2x32xf32>
    tpu.vector_store %arg14[%658, %c0_262, %c0_263], %661 {strides = array<i32>} : memref<8x2x64xf32, #tpu.memory_space<vmem>>, vector<1x2x32xf32>,
    %662 = vector.extract_strided_slice %656 {offsets = [0, 32], sizes = [2, 32], strides = [1, 1]} : vector<2x64xf32> to vector<2x32xf32>
    %c7_i32_264 = arith.constant 7 : i32
    %663 = arith.subi %c7_i32_264, %c4_i32_255 : i32
    %664 = arith.index_cast %663 : i32 to index
    %c0_265 = arith.constant 0 : index
    %c32_266 = arith.constant 32 : index
    %665 = vector.load %arg14[%664, %c0_265, %c32_266] : memref<8x2x64xf32, #tpu.memory_space<vmem>>, vector<1x2x32xf32>
    %666 = vector.shape_cast %665 : vector<1x2x32xf32> to vector<2x32xf32>
    %667 = vector.shape_cast %662 : vector<2x32xf32> to vector<1x2x32xf32>
    tpu.vector_store %arg14[%664, %c0_265, %c32_266], %667 {strides = array<i32>} : memref<8x2x64xf32, #tpu.memory_space<vmem>>, vector<1x2x32xf32>,
    %c5_i32_267 = arith.constant 5 : i32
    %cst_268 = arith.constant dense<0.000000e+00> : vector<2x256xf32>
    %668 = tpu.matmul %656, %461, %cst_268 {dimension_numbers = #tpu.dot_dimension_numbers<[1], [0], [0], [1], [0, 0, 1, 1], [], []>} : vector<2x64xf32>, vector<64x256xf32>, vector<2x256xf32> -> vector<2x256xf32>
    %669 = arith.index_cast %c5_i32_267 : i32 to index
    %c0_269 = arith.constant 0 : index
    %c0_270 = arith.constant 0 : index
    %670 = vector.load %arg12[%669, %c0_269, %c0_270] : memref<8x2x256xf32, #tpu.memory_space<vmem>>, vector<1x2x256xf32>
    %671 = vector.shape_cast %670 : vector<1x2x256xf32> to vector<2x256xf32>
    %672 = arith.addf %668, %671 : vector<2x256xf32>
    %673 = vector.extract_strided_slice %672 {offsets = [0, 0], sizes = [2, 64], strides = [1, 1]} : vector<2x256xf32> to vector<2x64xf32>
    %674 = arith.negf %673 : vector<2x64xf32>
    %675 = math.exp %674 : vector<2x64xf32>
    %cst_271 = arith.constant 1.000000e+00 : f32
    %676 = vector.broadcast %cst_271 : f32 to vector<2x64xf32>
    %677 = arith.addf %676, %675 : vector<2x64xf32>
    %678 = arith.divf %676, %677 : vector<2x64xf32>
    %679 = vector.extract_strided_slice %672 {offsets = [0, 64], sizes = [2, 64], strides = [1, 1]} : vector<2x256xf32> to vector<2x64xf32>
    %680 = arith.negf %679 : vector<2x64xf32>
    %681 = math.exp %680 : vector<2x64xf32>
    %cst_272 = arith.constant 1.000000e+00 : f32
    %682 = vector.broadcast %cst_272 : f32 to vector<2x64xf32>
    %683 = arith.addf %682, %681 : vector<2x64xf32>
    %684 = arith.divf %682, %683 : vector<2x64xf32>
    %685 = vector.extract_strided_slice %672 {offsets = [0, 128], sizes = [2, 64], strides = [1, 1]} : vector<2x256xf32> to vector<2x64xf32>
    %686 = math.tanh %685 : vector<2x64xf32>
    %687 = vector.extract_strided_slice %672 {offsets = [0, 192], sizes = [2, 64], strides = [1, 1]} : vector<2x256xf32> to vector<2x64xf32>
    %688 = arith.negf %687 : vector<2x64xf32>
    %689 = math.exp %688 : vector<2x64xf32>
    %cst_273 = arith.constant 1.000000e+00 : f32
    %690 = vector.broadcast %cst_273 : f32 to vector<2x64xf32>
    %691 = arith.addf %690, %689 : vector<2x64xf32>
    %692 = arith.divf %690, %691 : vector<2x64xf32>
    %693 = arith.mulf %684, %654 : vector<2x64xf32>
    %694 = arith.mulf %678, %686 : vector<2x64xf32>
    %695 = arith.addf %693, %694 : vector<2x64xf32>
    %696 = math.tanh %695 : vector<2x64xf32>
    %697 = arith.mulf %692, %696 : vector<2x64xf32>
    %698 = vector.extract_strided_slice %697 {offsets = [0, 0], sizes = [2, 32], strides = [1, 1]} : vector<2x64xf32> to vector<2x32xf32>
    %699 = arith.index_cast %c5_i32_267 : i32 to index
    %c0_274 = arith.constant 0 : index
    %c0_275 = arith.constant 0 : index
    %700 = vector.load %arg14[%699, %c0_274, %c0_275] : memref<8x2x64xf32, #tpu.memory_space<vmem>>, vector<1x2x32xf32>
    %701 = vector.shape_cast %700 : vector<1x2x32xf32> to vector<2x32xf32>
    %702 = vector.shape_cast %698 : vector<2x32xf32> to vector<1x2x32xf32>
    tpu.vector_store %arg14[%699, %c0_274, %c0_275], %702 {strides = array<i32>} : memref<8x2x64xf32, #tpu.memory_space<vmem>>, vector<1x2x32xf32>,
    %703 = vector.extract_strided_slice %697 {offsets = [0, 32], sizes = [2, 32], strides = [1, 1]} : vector<2x64xf32> to vector<2x32xf32>
    %c7_i32_276 = arith.constant 7 : i32
    %704 = arith.subi %c7_i32_276, %c5_i32_267 : i32
    %705 = arith.index_cast %704 : i32 to index
    %c0_277 = arith.constant 0 : index
    %c32_278 = arith.constant 32 : index
    %706 = vector.load %arg14[%705, %c0_277, %c32_278] : memref<8x2x64xf32, #tpu.memory_space<vmem>>, vector<1x2x32xf32>
    %707 = vector.shape_cast %706 : vector<1x2x32xf32> to vector<2x32xf32>
    %708 = vector.shape_cast %703 : vector<2x32xf32> to vector<1x2x32xf32>
    tpu.vector_store %arg14[%705, %c0_277, %c32_278], %708 {strides = array<i32>} : memref<8x2x64xf32, #tpu.memory_space<vmem>>, vector<1x2x32xf32>,
    %c6_i32_279 = arith.constant 6 : i32
    %cst_280 = arith.constant dense<0.000000e+00> : vector<2x256xf32>
    %709 = tpu.matmul %697, %461, %cst_280 {dimension_numbers = #tpu.dot_dimension_numbers<[1], [0], [0], [1], [0, 0, 1, 1], [], []>} : vector<2x64xf32>, vector<64x256xf32>, vector<2x256xf32> -> vector<2x256xf32>
    %710 = arith.index_cast %c6_i32_279 : i32 to index
    %c0_281 = arith.constant 0 : index
    %c0_282 = arith.constant 0 : index
    %711 = vector.load %arg12[%710, %c0_281, %c0_282] : memref<8x2x256xf32, #tpu.memory_space<vmem>>, vector<1x2x256xf32>
    %712 = vector.shape_cast %711 : vector<1x2x256xf32> to vector<2x256xf32>
    %713 = arith.addf %709, %712 : vector<2x256xf32>
    %714 = vector.extract_strided_slice %713 {offsets = [0, 0], sizes = [2, 64], strides = [1, 1]} : vector<2x256xf32> to vector<2x64xf32>
    %715 = arith.negf %714 : vector<2x64xf32>
    %716 = math.exp %715 : vector<2x64xf32>
    %cst_283 = arith.constant 1.000000e+00 : f32
    %717 = vector.broadcast %cst_283 : f32 to vector<2x64xf32>
    %718 = arith.addf %717, %716 : vector<2x64xf32>
    %719 = arith.divf %717, %718 : vector<2x64xf32>
    %720 = vector.extract_strided_slice %713 {offsets = [0, 64], sizes = [2, 64], strides = [1, 1]} : vector<2x256xf32> to vector<2x64xf32>
    %721 = arith.negf %720 : vector<2x64xf32>
    %722 = math.exp %721 : vector<2x64xf32>
    %cst_284 = arith.constant 1.000000e+00 : f32
    %723 = vector.broadcast %cst_284 : f32 to vector<2x64xf32>
    %724 = arith.addf %723, %722 : vector<2x64xf32>
    %725 = arith.divf %723, %724 : vector<2x64xf32>
    %726 = vector.extract_strided_slice %713 {offsets = [0, 128], sizes = [2, 64], strides = [1, 1]} : vector<2x256xf32> to vector<2x64xf32>
    %727 = math.tanh %726 : vector<2x64xf32>
    %728 = vector.extract_strided_slice %713 {offsets = [0, 192], sizes = [2, 64], strides = [1, 1]} : vector<2x256xf32> to vector<2x64xf32>
    %729 = arith.negf %728 : vector<2x64xf32>
    %730 = math.exp %729 : vector<2x64xf32>
    %cst_285 = arith.constant 1.000000e+00 : f32
    %731 = vector.broadcast %cst_285 : f32 to vector<2x64xf32>
    %732 = arith.addf %731, %730 : vector<2x64xf32>
    %733 = arith.divf %731, %732 : vector<2x64xf32>
    %734 = arith.mulf %725, %695 : vector<2x64xf32>
    %735 = arith.mulf %719, %727 : vector<2x64xf32>
    %736 = arith.addf %734, %735 : vector<2x64xf32>
    %737 = math.tanh %736 : vector<2x64xf32>
    %738 = arith.mulf %733, %737 : vector<2x64xf32>
    %739 = vector.extract_strided_slice %738 {offsets = [0, 0], sizes = [2, 32], strides = [1, 1]} : vector<2x64xf32> to vector<2x32xf32>
    %740 = arith.index_cast %c6_i32_279 : i32 to index
    %c0_286 = arith.constant 0 : index
    %c0_287 = arith.constant 0 : index
    %741 = vector.load %arg14[%740, %c0_286, %c0_287] : memref<8x2x64xf32, #tpu.memory_space<vmem>>, vector<1x2x32xf32>
    %742 = vector.shape_cast %741 : vector<1x2x32xf32> to vector<2x32xf32>
    %743 = vector.shape_cast %739 : vector<2x32xf32> to vector<1x2x32xf32>
    tpu.vector_store %arg14[%740, %c0_286, %c0_287], %743 {strides = array<i32>} : memref<8x2x64xf32, #tpu.memory_space<vmem>>, vector<1x2x32xf32>,
    %744 = vector.extract_strided_slice %738 {offsets = [0, 32], sizes = [2, 32], strides = [1, 1]} : vector<2x64xf32> to vector<2x32xf32>
    %c7_i32_288 = arith.constant 7 : i32
    %745 = arith.subi %c7_i32_288, %c6_i32_279 : i32
    %746 = arith.index_cast %745 : i32 to index
    %c0_289 = arith.constant 0 : index
    %c32_290 = arith.constant 32 : index
    %747 = vector.load %arg14[%746, %c0_289, %c32_290] : memref<8x2x64xf32, #tpu.memory_space<vmem>>, vector<1x2x32xf32>
    %748 = vector.shape_cast %747 : vector<1x2x32xf32> to vector<2x32xf32>
    %749 = vector.shape_cast %744 : vector<2x32xf32> to vector<1x2x32xf32>
    tpu.vector_store %arg14[%746, %c0_289, %c32_290], %749 {strides = array<i32>} : memref<8x2x64xf32, #tpu.memory_space<vmem>>, vector<1x2x32xf32>,
    %c7_i32_291 = arith.constant 7 : i32
    %cst_292 = arith.constant dense<0.000000e+00> : vector<2x256xf32>
    %750 = tpu.matmul %738, %461, %cst_292 {dimension_numbers = #tpu.dot_dimension_numbers<[1], [0], [0], [1], [0, 0, 1, 1], [], []>} : vector<2x64xf32>, vector<64x256xf32>, vector<2x256xf32> -> vector<2x256xf32>
    %751 = arith.index_cast %c7_i32_291 : i32 to index
    %c0_293 = arith.constant 0 : index
    %c0_294 = arith.constant 0 : index
    %752 = vector.load %arg12[%751, %c0_293, %c0_294] : memref<8x2x256xf32, #tpu.memory_space<vmem>>, vector<1x2x256xf32>
    %753 = vector.shape_cast %752 : vector<1x2x256xf32> to vector<2x256xf32>
    %754 = arith.addf %750, %753 : vector<2x256xf32>
    %755 = vector.extract_strided_slice %754 {offsets = [0, 0], sizes = [2, 64], strides = [1, 1]} : vector<2x256xf32> to vector<2x64xf32>
    %756 = arith.negf %755 : vector<2x64xf32>
    %757 = math.exp %756 : vector<2x64xf32>
    %cst_295 = arith.constant 1.000000e+00 : f32
    %758 = vector.broadcast %cst_295 : f32 to vector<2x64xf32>
    %759 = arith.addf %758, %757 : vector<2x64xf32>
    %760 = arith.divf %758, %759 : vector<2x64xf32>
    %761 = vector.extract_strided_slice %754 {offsets = [0, 64], sizes = [2, 64], strides = [1, 1]} : vector<2x256xf32> to vector<2x64xf32>
    %762 = arith.negf %761 : vector<2x64xf32>
    %763 = math.exp %762 : vector<2x64xf32>
    %cst_296 = arith.constant 1.000000e+00 : f32
    %764 = vector.broadcast %cst_296 : f32 to vector<2x64xf32>
    %765 = arith.addf %764, %763 : vector<2x64xf32>
    %766 = arith.divf %764, %765 : vector<2x64xf32>
    %767 = vector.extract_strided_slice %754 {offsets = [0, 128], sizes = [2, 64], strides = [1, 1]} : vector<2x256xf32> to vector<2x64xf32>
    %768 = math.tanh %767 : vector<2x64xf32>
    %769 = vector.extract_strided_slice %754 {offsets = [0, 192], sizes = [2, 64], strides = [1, 1]} : vector<2x256xf32> to vector<2x64xf32>
    %770 = arith.negf %769 : vector<2x64xf32>
    %771 = math.exp %770 : vector<2x64xf32>
    %cst_297 = arith.constant 1.000000e+00 : f32
    %772 = vector.broadcast %cst_297 : f32 to vector<2x64xf32>
    %773 = arith.addf %772, %771 : vector<2x64xf32>
    %774 = arith.divf %772, %773 : vector<2x64xf32>
    %775 = arith.mulf %766, %736 : vector<2x64xf32>
    %776 = arith.mulf %760, %768 : vector<2x64xf32>
    %777 = arith.addf %775, %776 : vector<2x64xf32>
    %778 = math.tanh %777 : vector<2x64xf32>
    %779 = arith.mulf %774, %778 : vector<2x64xf32>
    %780 = vector.extract_strided_slice %779 {offsets = [0, 0], sizes = [2, 32], strides = [1, 1]} : vector<2x64xf32> to vector<2x32xf32>
    %781 = arith.index_cast %c7_i32_291 : i32 to index
    %c0_298 = arith.constant 0 : index
    %c0_299 = arith.constant 0 : index
    %782 = vector.load %arg14[%781, %c0_298, %c0_299] : memref<8x2x64xf32, #tpu.memory_space<vmem>>, vector<1x2x32xf32>
    %783 = vector.shape_cast %782 : vector<1x2x32xf32> to vector<2x32xf32>
    %784 = vector.shape_cast %780 : vector<2x32xf32> to vector<1x2x32xf32>
    tpu.vector_store %arg14[%781, %c0_298, %c0_299], %784 {strides = array<i32>} : memref<8x2x64xf32, #tpu.memory_space<vmem>>, vector<1x2x32xf32>,
    %785 = vector.extract_strided_slice %779 {offsets = [0, 32], sizes = [2, 32], strides = [1, 1]} : vector<2x64xf32> to vector<2x32xf32>
    %c7_i32_300 = arith.constant 7 : i32
    %786 = arith.subi %c7_i32_300, %c7_i32_291 : i32
    %787 = arith.index_cast %786 : i32 to index
    %c0_301 = arith.constant 0 : index
    %c32_302 = arith.constant 32 : index
    %788 = vector.load %arg14[%787, %c0_301, %c32_302] : memref<8x2x64xf32, #tpu.memory_space<vmem>>, vector<1x2x32xf32>
    %789 = vector.shape_cast %788 : vector<1x2x32xf32> to vector<2x32xf32>
    %790 = vector.shape_cast %785 : vector<2x32xf32> to vector<1x2x32xf32>
    tpu.vector_store %arg14[%787, %c0_301, %c32_302], %790 {strides = array<i32>} : memref<8x2x64xf32, #tpu.memory_space<vmem>>, vector<1x2x32xf32>,
    %c8_i32_303 = arith.constant 8 : i32
    %c0_304 = arith.constant 0 : index
    %c0_305 = arith.constant 0 : index
    %c0_306 = arith.constant 0 : index
    %791 = vector.load %arg14[%c0_304, %c0_305, %c0_306] : memref<8x2x64xf32, #tpu.memory_space<vmem>>, vector<8x2x64xf32>
    %c0_307 = arith.constant 0 : index
    %c0_308 = arith.constant 0 : index
    %792 = vector.load %arg7[%c0_307, %c0_308] : memref<64x64xf32, #tpu.memory_space<vmem>>, vector<64x64xf32>
    %cst_309 = arith.constant dense<0.000000e+00> : vector<8x2x64xf32>
    %793 = tpu.matmul %791, %792, %cst_309 {dimension_numbers = #tpu.dot_dimension_numbers<[2], [0], [0, 1], [1], [0, 0, 0, 1, 1, 1], [], []>} : vector<8x2x64xf32>, vector<64x64xf32>, vector<8x2x64xf32> -> vector<8x2x64xf32>
    %c0_310 = arith.constant 0 : index
    %c0_311 = arith.constant 0 : index
    %794 = vector.load %arg8[%c0_310, %c0_311] : memref<1x64xf32, #tpu.memory_space<vmem>>, vector<1x64xf32>
    %795 = vector.shape_cast %794 : vector<1x64xf32> to vector<1x1x64xf32>
    %796 = vector.broadcast %795 : vector<1x1x64xf32> to vector<8x2x64xf32>
    %797 = arith.addf %793, %796 : vector<8x2x64xf32>
    %798 = math.tanh %797 : vector<8x2x64xf32>
    %799 = math.exp %798 : vector<8x2x64xf32>
    %cst_312 = arith.constant dense<0.000000e+00> : vector<2x64xf32>
    %800 = vector.multi_reduction <add>, %799, %cst_312 [0] : vector<8x2x64xf32> to vector<2x64xf32>
    %801 = arith.mulf %799, %791 : vector<8x2x64xf32>
    %cst_313 = arith.constant dense<0.000000e+00> : vector<2x64xf32>
    %802 = vector.multi_reduction <add>, %801, %cst_313 [0] : vector<8x2x64xf32> to vector<2x64xf32>
    %803 = tpu.reciprocal %800 {approx = true} : vector<2x64xf32> -> vector<2x64xf32>
    %804 = arith.mulf %800, %803 : vector<2x64xf32>
    %cst_314 = arith.constant 2.000000e+00 : f32
    %805 = vector.broadcast %cst_314 : f32 to vector<2x64xf32>
    %806 = arith.subf %805, %804 : vector<2x64xf32>
    %807 = arith.mulf %803, %806 : vector<2x64xf32>
    %808 = arith.mulf %802, %807 : vector<2x64xf32>
    %c0_315 = arith.constant 0 : index
    %c0_316 = arith.constant 0 : index
    %809 = vector.load %arg9[%c0_315, %c0_316] : memref<64x4xf32, #tpu.memory_space<vmem>>, vector<64x4xf32>
    %cst_317 = arith.constant dense<0.000000e+00> : vector<2x4xf32>
    %810 = tpu.matmul %808, %809, %cst_317 {dimension_numbers = #tpu.dot_dimension_numbers<[1], [0], [0], [1], [0, 0, 1, 1], [], []>} : vector<2x64xf32>, vector<64x4xf32>, vector<2x4xf32> -> vector<2x4xf32>
    %c0_318 = arith.constant 0 : index
    %c0_319 = arith.constant 0 : index
    %811 = vector.load %arg10[%c0_318, %c0_319] : memref<1x4xf32, #tpu.memory_space<vmem>>, vector<1x4xf32>
    %812 = vector.broadcast %811 : vector<1x4xf32> to vector<2x4xf32>
    %813 = arith.addf %810, %812 : vector<2x4xf32>
    %c0_320 = arith.constant 0 : index
    %c0_321 = arith.constant 0 : index
    %814 = vector.load %arg11[%c0_320, %c0_321] : memref<2x4xf32, #tpu.memory_space<vmem>>, vector<2x4xf32>
    tpu.vector_store %arg11[%c0_320, %c0_321], %813 {strides = array<i32>} : memref<2x4xf32, #tpu.memory_space<vmem>>, vector<2x4xf32>,
    return
  }
}

</mosaic_0001>

<bundles_post_ra>
// kernel: tpu_custom_call.1
= control target key start
LH: loop header
LB: loop body
LE: loop exit
PB: predicated region body
PF: predicated region fallthrough
CT: control target
= control target key end

     0   :  { %16 = vsyncpa [#allocation6], 0  ;;  %s4739_s0 = inlined_call_operand.vmem [shape: f32[8,2,16], index: 0, kind: input, shape index: {}]   ;;  %s4740_s1 = inlined_call_operand.hbm [shape: f32[16,256], index: 1, kind: input, shape index: {}]   ;;  %s4741_s2 = inlined_call_operand.vmem [shape: f32[1,256], index: 2, kind: input, shape index: {}]   ;;  %s4742_s3 = inlined_call_operand.hbm [shape: f32[64,256], index: 3, kind: input, shape index: {}]   ;;  %s4743_s4 = inlined_call_operand.hbm [shape: f32[64,256], index: 4, kind: input, shape index: {}]   ;;  %s4744_s5 = inlined_call_operand.vmem [shape: f32[1,256], index: 5, kind: input, shape index: {}]   ;;  %s4745_s6 = inlined_call_operand.hbm [shape: f32[64,256], index: 6, kind: input, shape index: {}]   ;;  %s4746_s7 = inlined_call_operand.vmem [shape: f32[64,64], index: 7, kind: input, shape index: {}]   ;;  %s4747_s8 = inlined_call_operand.vmem [shape: f32[1,64], index: 8, kind: input, shape index: {}]   ;;  %s4748_s9 = inlined_call_operand.vmem [shape: f32[64,4], index: 9, kind: input, shape index: {}]   ;;  %s4749_s10 = inlined_call_operand.vmem [shape: f32[1,4], index: 10, kind: input, shape index: {}]   ;;  %s4750_s11 = inlined_call_operand.hbm [shape: f32[2,4], index: 11, kind: output, shape index: {}]  }
   0x1   :  { %17 = vsyncpa [#allocation9], 0 }
   0x2   :  { %18 = vsyncpa [#allocation12], 0 }
   0x3   :  { %19 = vsyncpa [#allocation7], 0  ;;  %s4057_s17 = smov [#allocation8]   ;;  %s4058_s19 = smov [#allocation5]  }
   0x4   :  { %s41_s18 = sshll.u32 %s4057_s17, 4  ;;  %s27_s20 = sshll.u32 %s4058_s19, 4  ;;  %s42_s18 = int_to_ptr.vmem [resolvable:$true] %s41_s18  ;;  %s4129_s20 = int_to_ptr.vmem [resolvable:$true] %s27_s20 }
   0x5   :  { %s3939_s23 = scalar_lea.hbm %s4742_s3, 2048 }
   0x6   :  { %p3940_p0 = scmp.ne.s32.totalorder %s4742_s3, %s3939_s23  ;;  %p3943_p1 = scmp.lt.u32.totalorder %s3939_s23, %s4742_s3 }
   0x8   :  { %p3945_p2 = pnand %p3943_p1, %p3940_p0 }
   0xa   :  { %3948 = shalt.err (!%p3945_p2)
}
   0xb   :  { %s3949_s28 = scalar_lea.vmem %s42_s18, 2048  ;;  %p3954_p4 = scmp.lt.s32.totalorder %s42_s18, %s42_s18 }
   0xc   :  { %p3950_p3 = scmp.ne.s32.totalorder %s42_s18, %s3949_s28  ;;  %p3955_p5 = scmp.lt.s32.totalorder %s3949_s28, %s3949_s28 }
   0xe   :  { %p3956_p6 = por %p3955_p5, %p3954_p4 }
  0x10   :  { %p3957_p7 = pnand %p3956_p6, %p3950_p3 }
  0x12   :  { %3960 = shalt.err (!%p3957_p7)
}
  0x13   :  { %s4059_s29 = smov 256   ;;  %s4060_s30 = smov 16  }
  0x14   :  { %47 = dma.hbm_to_vmem [thread:$0]  %s4742_s3, 2048, %s42_s18, [#allocation9], %s4059_s29, %s4059_s29, %s4060_s30  }
  0x15   :  { %s3961_s16 = scalar_lea.hbm %s4740_s1, 512 }
  0x16   :  { %p3962_p8 = scmp.ne.s32.totalorder %s4740_s1, %s3961_s16  ;;  %p3965_p9 = scmp.lt.u32.totalorder %s3961_s16, %s4740_s1 }
  0x18   :  { %p3967_p10 = pnand %p3965_p9, %p3962_p8 }
  0x1a   :  { %3970 = shalt.err (!%p3967_p10)
}
  0x1b   :  { %s3971_s23 = scalar_lea.vmem %s4129_s20, 512  ;;  %p3976_p12 = scmp.lt.s32.totalorder %s4129_s20, %s4129_s20 }
  0x1c   :  { %p3972_p11 = scmp.ne.s32.totalorder %s4129_s20, %s3971_s23  ;;  %p3977_p13 = scmp.lt.s32.totalorder %s3971_s23, %s3971_s23 }
  0x1e   :  { %p3978_p0 = por %p3977_p13, %p3976_p12 }
  0x20   :  { %p3979_p1 = pnand %p3978_p0, %p3972_p11 }
  0x22   :  { %3982 = shalt.err (!%p3979_p1)
}
  0x23   :  { %33 = dma.hbm_to_vmem [thread:$0]  %s4740_s1, 512, %s4129_s20, [#allocation6], %s4059_s29, %s4059_s29, %s4060_s30  }
  0x24   :  { %s4061_s24 = smov [#allocation10]   ;;  %s4062_s26 = smov [#allocation11]  }
  0x25   :  { %s53_s25 = sshll.u32 %s4061_s24, 4  ;;  %s67_s27 = sshll.u32 %s4062_s26, 4  ;;  %s54_s25 = int_to_ptr.vmem [resolvable:$true] %s53_s25  ;;  %s4166_s27 = int_to_ptr.vmem [resolvable:$true] %s67_s27 }
  0x26   :  { %s3983_s13 = scalar_lea.hbm %s4743_s4, 2048 }
  0x27   :  { %p3984_p2 = scmp.ne.s32.totalorder %s4743_s4, %s3983_s13  ;;  %p3987_p3 = scmp.lt.u32.totalorder %s3983_s13, %s4743_s4 }
  0x29   :  { %p3989_p4 = pnand %p3987_p3, %p3984_p2 }
  0x2b   :  { %3992 = shalt.err (!%p3989_p4)
}
  0x2c   :  { %s3993_s1 = scalar_lea.vmem %s54_s25, 2048  ;;  %p3998_p6 = scmp.lt.s32.totalorder %s54_s25, %s54_s25 }
  0x2d   :  { %p3994_p5 = scmp.ne.s32.totalorder %s54_s25, %s3993_s1  ;;  %p3999_p7 = scmp.lt.s32.totalorder %s3993_s1, %s3993_s1 }
  0x2f   :  { %p4000_p8 = por %p3999_p7, %p3998_p6 }
  0x31   :  { %p4001_p9 = pnand %p4000_p8, %p3994_p5 }
  0x33   :  { %4004 = shalt.err (!%p4001_p9)
}
  0x34   :  { %59 = dma.hbm_to_vmem [thread:$0]  %s4743_s4, 2048, %s54_s25, [#allocation9], %s4059_s29, %s4059_s29, %s4060_s30  }
  0x35   :  { %s4005_s23 = scalar_lea.hbm %s4745_s6, 2048 }
  0x36   :  { %p4006_p10 = scmp.ne.s32.totalorder %s4745_s6, %s4005_s23  ;;  %p4009_p11 = scmp.lt.u32.totalorder %s4005_s23, %s4745_s6 }
  0x38   :  { %p4011_p12 = pnand %p4009_p11, %p4006_p10 }
  0x3a   :  { %4014 = shalt.err (!%p4011_p12)
}
  0x3b   :  { %s4015_s28 = scalar_lea.vmem %s4166_s27, 2048  ;;  %p4020_p0 = scmp.lt.s32.totalorder %s4166_s27, %s4166_s27 }
  0x3c   :  { %p4016_p13 = scmp.ne.s32.totalorder %s4166_s27, %s4015_s28  ;;  %p4021_p1 = scmp.lt.s32.totalorder %s4015_s28, %s4015_s28 }
  0x3e   :  { %p4022_p2 = por %p4021_p1, %p4020_p0 }
  0x40   :  { %p4023_p3 = pnand %p4022_p2, %p4016_p13 }
  0x42   :  { %4026 = shalt.err (!%p4023_p3)
}
  0x43   :  { %73 = dma.hbm_to_vmem [thread:$0]  %s4745_s6, 2048, %s4166_s27, [#allocation12], %s4059_s29, %s4059_s29, %s4060_s30  }
  0x44   :  { %4049 = dma.done.wait [#allocation6], 512  }
  0x45   :  { %4050 = vsyncadd [#allocation6], 4294966784 }
  0x46   :  { %4051 = dma.done.wait [#allocation9], 4096  }
  0x47   :  { %4052 = vsyncadd [#allocation9], 4294963200 }
  0x48   :  { %4053 = dma.done.wait [#allocation12], 2048  }
  0x49   :  { %4054 = vsyncadd [#allocation12], 4294965248  ;;  %v94_v0 = vlaneseq  ;;  %v4063_v1 = vmov 0.0   ;;  %v4064_v2 = vmov 1983009808   ;;  %v132_v6 = vld [vmem:[#allocation5 + $0x8] sm:$0xff] }
  0x4a   :  { %276 = vmatprep.mubr.f32.mxu0 %v4063_v1  ;;  %v147_v3 = vunpack.c.l.s4 %v4064_v2  ;;  %656 = vmatprep.mubr.f32.mxu1 %v4063_v1  ;;  %v134_v7 = vld [vmem:[#allocation5 + $0x18] sm:$0xff]  ;;  %v131_v8 = vld [vmem:[#allocation5] sm:$0xff]  ;;  %v133_v11 = vld [vmem:[#allocation5 + $0x10] sm:$0xff]  ;;  %vm207_vm0 = vcmask 130048   ;;  %vm689_vm3 = vcmask 254976   ;;  %vm692_vm4 = vcmask 517376  }
  0x4b   :  { %v4206_v4 = vshrl.u32 %v94_v0, 7  ;;  %v3397_v10 = vpack.c.bf16 %v134_v7, %v132_v6  ;;  %v123_v12 = vld [vmem:[%s4739_s0] sm:$0x3]  ;;  %v124_v13 = vld [vmem:[%s4739_s0 + $0x2] sm:$0x3]  ;;  %v3399_v14 = vpack.c.bf16 %v133_v11, %v131_v8  ;;  %v561_v26 = vld [vmem:[#allocation8 + $0x8] sm:$0xff] }
  0x4c   :  { %v148_v5 = vunpack.c.0.s8 %v147_v3  ;;  %v125_v15 = vld [vmem:[%s4739_s0 + $0x4] sm:$0x3]  ;;  %v126_v16 = vld [vmem:[%s4739_s0 + $0x6] sm:$0x3]  ;;  %v161_v17 = vcombine.low %v123_v12, %v124_v13  ;;  %v127_v18 = vld [vmem:[%s4739_s0 + $0x8] sm:$0x3] }
  0x4d   :  { %3398 = vmatprep.subr.bf16.mxu0 %v3397_v10  ;;  %v162_v19 = vcombine.low %v125_v15, %v126_v16  ;;  %v128_v20 = vld [vmem:[%s4739_s0 + $0xa] sm:$0x3]  ;;  %v129_v21 = vld [vmem:[%s4739_s0 + $0xc] sm:$0x3]  ;;  %v130_v22 = vld [vmem:[%s4739_s0 + $0xe] sm:$0x3] }
  0x4e   :  { %v4209_v9 = vsub.s32 %v148_v5, %v4206_v4  ;;  %3400 = vmatpush1.bf16.msra.mxu0 %v3399_v14  ;;  %v178_v24 = vcombine.low %v127_v18, %v128_v20  ;;  %v179_v25 = vcombine.low %v129_v21, %v130_v22  ;;  %v563_v27 = vld [vmem:[#allocation8 + $0x18] sm:$0xff]  ;;  %v560_v28 = vld [vmem:[#allocation8] sm:$0xff]  ;;  %v562_v31 = vld [vmem:[#allocation8 + $0x10] sm:$0xff]  ;;  %v139_v55 = vsub.s32 0, %v4206_v4  ;;  %s4068_s30 = smov [#allocation13]  }
  0x4f   :  { %v4237_v30 = vpack.c.bf16 %v563_v27, %v561_v26  ;;  %v565_v32 = vld [vmem:[#allocation8 + $0x28] sm:$0xff]  ;;  %v567_v33 = vld [vmem:[#allocation8 + $0x38] sm:$0xff]  ;;  %v4241_v36 = vpack.c.bf16 %v562_v31, %v560_v28  ;;  %v564_v38 = vld [vmem:[#allocation8 + $0x20] sm:$0xff]  ;;  %v143_v56 = vsub.s32 1, %v4206_v4  ;;  %vm588_vm5 = vcmask 523264   ;;  %s3218_s27 = sshll.u32 %s4068_s30, 4  ;;  %s3219_s27 = int_to_ptr.vmem [resolvable:$true] %s3218_s27 }
  0x50   :  { %v169_v23 = vrot.slane %v161_v17, %v4209_v9  ;;  %v176_v29 = vrot.slane %v162_v19, %v4209_v9  ;;  %v186_v34 = vrot.slane %v178_v24, %v4209_v9  ;;  %v193_v35 = vrot.slane %v179_v25, %v4209_v9  ;;  %v566_v39 = vld [vmem:[#allocation8 + $0x30] sm:$0xff]  ;;  %v569_v40 = vld [vmem:[#allocation8 + $0x48] sm:$0xff]  ;;  %v571_v42 = vld [vmem:[#allocation8 + $0x58] sm:$0xff]  ;;  %s4027_s12 = scalar_lea.vmem %s3219_s27, 32  ;;  %p4032_p5 = scmp.lt.s32.totalorder %s3219_s27, %s3219_s27 }
  0x51   :  { %v4243_v37 = vpack.c.bf16 %v567_v33, %v565_v32  ;;  %3402 = vmatprep.subr.bf16.mxu1 %v4237_v30  ;;  %3418 = vmatprep.subr.bf16.mxu0 %v4237_v30  ;;  %v4248_v43 = vpack.c.bf16 %v566_v39, %v564_v38  ;;  %v4252_v45 = vpack.c.bf16 %v571_v42, %v569_v40  ;;  %v568_v46 = vld [vmem:[#allocation8 + $0x40] sm:$0xff]  ;;  %v570_v47 = vld [vmem:[#allocation8 + $0x50] sm:$0xff]  ;;  %v573_v48 = vld [vmem:[#allocation8 + $0x68] sm:$0xff]  ;;  %v95_v17 = vand.u32 127, %v94_v0  ;;  %p4028_p4 = scmp.ne.s32.totalorder %s3219_s27, %s4027_s12  ;;  %p4033_p6 = scmp.lt.s32.totalorder %s4027_s12, %s4027_s12 }
  0x52   :  { %v177_v41 = vcombine.low %v169_v23, %v176_v29  ;;  %3404 = vmatpush1.bf16.msra.mxu1 %v4241_v36  ;;  %v194_v44 = vcombine.low %v186_v34, %v193_v35  ;;  %v575_v49 = vld [vmem:[#allocation8 + $0x78] sm:$0xff]  ;;  %v4258_v50 = vpack.c.bf16 %v570_v47, %v568_v46  ;;  %v572_v52 = vld [vmem:[#allocation8 + $0x60] sm:$0xff]  ;;  %v574_v53 = vld [vmem:[#allocation8 + $0x70] sm:$0xff]  ;;  %vm4067_vm6 = vmmov 0  }
  0x53   :  { %3406 = vmatprep.subr.bf16.mxu1 %v4243_v37  ;;  %v4262_v51 = vpack.c.bf16 %v575_v49, %v573_v48  ;;  %v4268_v54 = vpack.c.bf16 %v574_v53, %v572_v52  ;;  %v135_v57 = vld [vmem:[%s4741_s2] sm:$0x3]  ;;  %v96_v23 = vadd.s32 128, %v95_v17  ;;  %v101_v28 = vand.u32 63, %v95_v17  ;;  %s4065_s2 = smov 64   ;;  %p4034_p7 = por %p4033_p6, %p4032_p5 }
  0x54   :  { %3229 = vmatmul.mubr.msk.f32.vlgmr.msra.gmra.mrb[0].mxu0 %vm207_vm0, %v177_v41  ;;  %v140_v58 = vrot.slane %v135_v57, %v139_v55  ;;  %v144_v59 = vrot.slane %v135_v57, %v143_v56  ;;  %vm3078_vm7 = vcmask 517120   ;;  %vm3210_vm8 = vcmask 25600  }
  0x55   :  { %282 = vmatprep.mubr.f32.mxu0 %v4063_v1  ;;  %3420 = vmatpush1.bf16.msra.mxu0 %v4241_v36  ;;  %v108_v29 = vand.u32 63, %v96_v23  ;;  %vm4303_vm1 = vcmp.lt.s32.totalorder %v101_v28, 32  ;;  %p4035_p8 = pnand %p4034_p7, %p4028_p4 }
  0x56   :  { %3422 = vmatprep.subr.bf16.mxu0 %v4243_v37  ;;  %3408 = vmatpush1.bf16.msra.mxu1 %v4248_v43  ;;  %v145_v60 = vcombine.low %v140_v58, %v144_v59 }
  0x57   :  { %3410 = vmatprep.subr.bf16.mxu1 %v4252_v45  ;;  %vm4307_vm2 = vcmp.lt.s32.totalorder %v108_v29, 32 }
  0x58   :  { %3230 = vmatmul.mubr.msk.f32.gmra.mrb[2].mxu0 %vm207_vm0, %v194_v44  ;;  %v152_v61 = vrot.slane %v145_v60, %v4209_v9 }
  0x59   :  { %3424 = vmatpush1.bf16.msra.mxu0 %v4248_v43  ;;  %772 = vmatprep.mubr.f32.mxu0 %v4063_v1 }
  0x5a   :  { %3426 = vmatprep.subr.bf16.mxu0 %v4252_v45  ;;  %3412 = vmatpush1.bf16.msra.mxu1 %v4258_v50  ;;  %v195_v62 = vcombine.low %v152_v61, %v152_v61 }
  0x5b   :  { %3414 = vmatprep.subr.bf16.mxu1 %v4262_v51 }
  0x5c   :  { %v202_v63 = vrot.slane %v195_v62, %v4209_v9 }
  0x5d   :  { %3428 = vmatpush1.bf16.msra.mxu0 %v4258_v50 }
  0x5e   :  { %3430 = vmatprep.subr.bf16.mxu0 %v4262_v51  ;;  %3416 = vmatpush1.bf16.msra.mxu1 %v4268_v54  ;;  %v203_v2 = vcombine.low %v202_v63, %v202_v63  ;;  %v204_v3 = vcombine.high %v202_v63, %v202_v63 }
  0x5f   :  { %3434 = vmatprep.subr.bf16.mxu1 %v4237_v30 }
  0x61   :  { %3432 = vmatpush1.bf16.msra.mxu0 %v4268_v54  ;;  %657 = vmatmul.mubr.f32.vlgmr.msra.gmra.mrb[0].mxu1 %v4063_v1 }
  0x62   :  { %3450 = vmatprep.subr.bf16.mxu0 %v4237_v30  ;;  %3436 = vmatpush1.bf16.msra.mxu1 %v4241_v36 }
  0x63   :  { %887 = vmatprep.mubr.f32.mxu1 %v4063_v1  ;;  %3438 = vmatprep.subr.bf16.mxu1 %v4243_v37 }
  0x66   :  { %3440 = vmatpush1.bf16.msra.mxu1 %v4248_v43 }
  0x67   :  { %3442 = vmatprep.subr.bf16.mxu1 %v4252_v45 }
  0x6a   :  { %3444 = vmatpush1.bf16.msra.mxu1 %v4258_v50 }
  0x6b   :  { %3446 = vmatprep.subr.bf16.mxu1 %v4262_v51 }
  0x6e   :  { %3448 = vmatpush1.bf16.msra.mxu1 %v4268_v54 }
  0x6f   :  { %3466 = vmatprep.subr.bf16.mxu1 %v4237_v30 }
 0x127   :  { %v278_v5 = vpop.f32.mrb[0].mxu0 }
 0x128   :  { %v279_v6 = vadd.f32 %v278_v5, %v203_v2  ;;  %v280_v7 = vpop.f32.mrb[1].mxu0 }
 0x129   :  { %v281_v8 = vadd.f32 %v280_v7, %v204_v3 }
 0x12b   :  { %v293_v10 = vcombine.low %v279_v6, %v281_v8  ;;  %v294_v11 = vcombine.high %v279_v6, %v281_v8  ;;  %v284_v12 = vpop.f32.mrb[2].mxu0 }
 0x12c   :  { %v285_v13 = vadd.f32 %v284_v12, %v203_v2  ;;  %v286_v14 = vpop.f32.mrb[3].mxu0 }
 0x12d   :  { %v301_v15 = vrot.slane %v293_v10, %v4209_v9  ;;  %v308_v16 = vrot.slane %v294_v11, %v4209_v9  ;;  %3231 = vst.sshfl [vmem:[#allocation2] sm:$0x33 pattern:$0x76325410] %v293_v10  ;;  %v287_v18 = vadd.f32 %v286_v14, %v204_v3 }
 0x12e   :  { %3232 = vst.sshfl [vmem:[#allocation2 + $0x8] sm:$0x33 pattern:$0x76325410] %v294_v11 }
 0x12f   :  { %v309_v19 = vcombine.high %v301_v15, %v301_v15  ;;  %v310_v20 = vcombine.high %v308_v16, %v308_v16  ;;  %v311_v21 = vcombine.low %v285_v13, %v287_v18  ;;  %v312_v22 = vcombine.high %v285_v13, %v287_v18 }
 0x131   :  { %338 = vst [vmem:[#allocation2 + $0x4] sm:$0xf] %v309_v19  ;;  %340 = vst [vmem:[#allocation2 + $0xc] sm:$0xf] %v310_v20  ;;  %v319_v24 = vrot.slane %v311_v21, %v4209_v9  ;;  %v326_v25 = vrot.slane %v312_v22, %v4209_v9 }
 0x132   :  { %3233 = vst.sshfl [vmem:[#allocation2 + $0x10] sm:$0x33 pattern:$0x76325410] %v311_v21 }
 0x133   :  { %3234 = vst.sshfl [vmem:[#allocation2 + $0x18] sm:$0x33 pattern:$0x76325410] %v312_v22  ;;  %v327_v26 = vcombine.high %v319_v24, %v319_v24  ;;  %v328_v27 = vcombine.high %v326_v25, %v326_v25 }
 0x134   :  { %v658_v0 = vpop.f32.mrb[0].mxu1  ;;  %v3235_v31 = vld.sshfl [vmem:[#allocation2] sm:$0x33 pattern:$0x76325410] }
 0x135   :  { %342 = vst [vmem:[#allocation2 + $0x14] sm:$0xf] %v327_v26  ;;  %344 = vst [vmem:[#allocation2 + $0x1c] sm:$0xf] %v328_v27  ;;  %v660_v32 = vpop.f32.mrb[1].mxu1  ;;  %v356_v41 = vcombine.high %v3235_v31, %v3235_v31 }
 0x136   :  { %v3243_v33 = vld.sshfl [vmem:[#allocation2 + $0x8] sm:$0x33 pattern:$0x76325410] }
 0x137   :  { %v464_v48 = vcombine.high %v3243_v33, %v3243_v33 }
 0x138   :  { %v3239_v35 = vld.sshfl [vmem:[#allocation2 + $0x4] sm:$0x33 pattern:$0x76325410] }
 0x139   :  { %v410_v40 = vcombine.high %v3239_v35, %v3239_v35  ;;  %v3247_v44 = vld.sshfl [vmem:[#allocation2 + $0xc] sm:$0x33 pattern:$0x76325410] }
 0x13a   :  { %v3240_v39 = vld.sshfl [vmem:[#allocation2 + $0x18] sm:$0x33 pattern:$0x76325410]  ;;  %v518_v52 = vcombine.high %v3247_v44, %v3247_v44 }
 0x13b   :  { %v421_v42 = vcombine.high %v3240_v39, %v3240_v39  ;;  %v424_v46 = vsel %vm4303_vm1, %v3239_v35, %v3240_v39  ;;  %v438_v47 = vsel %vm4303_vm1, %v3240_v39, %v3239_v35  ;;  %v3248_v49 = vld.sshfl [vmem:[#allocation2 + $0x10] sm:$0x33 pattern:$0x76325410] }
 0x13c   :  { %v3236_v53 = vld.sshfl [vmem:[#allocation2 + $0x1c] sm:$0x33 pattern:$0x76325410]  ;;  %v529_v59 = vcombine.high %v3248_v49, %v3248_v49  ;;  %v532_v60 = vsel %vm4303_vm1, %v3247_v44, %v3248_v49  ;;  %v546_v13 = vsel %vm4303_vm1, %v3248_v49, %v3247_v44 }
 0x13d   :  { %v425_v57 = vsel %vm4307_vm2, %v410_v40, %v421_v42  ;;  %v439_v58 = vsel %vm4307_vm2, %v421_v42, %v410_v40  ;;  %v367_v61 = vcombine.high %v3236_v53, %v3236_v53  ;;  %v370_v62 = vsel %vm4303_vm1, %v3235_v31, %v3236_v53  ;;  %v3244_v3 = vld.sshfl [vmem:[#allocation2 + $0x14] sm:$0x33 pattern:$0x76325410] }
 0x13e   :  { %v384_v63 = vsel %vm4303_vm1, %v3236_v53, %v3235_v31  ;;  %v428_v2 = vcombine.low %v424_v46, %v425_v57  ;;  %v442_v5 = vcombine.low %v438_v47, %v439_v58  ;;  %v475_v6 = vcombine.high %v3244_v3, %v3244_v3 }
 0x13f   :  { %v478_v7 = vsel %vm4303_vm1, %v3243_v33, %v3244_v3  ;;  %v492_v8 = vsel %vm4303_vm1, %v3244_v3, %v3243_v33  ;;  %v371_v10 = vsel %vm4307_vm2, %v356_v41, %v367_v61  ;;  %v385_v11 = vsel %vm4307_vm2, %v367_v61, %v356_v41 }
 0x140   :  { %3241 = vst.sshfl [vmem:[#allocation2 + $0x4] sm:$0x33 pattern:$0x76325410] %v428_v2  ;;  %v533_v12 = vsel %vm4307_vm2, %v518_v52, %v529_v59  ;;  %v374_v14 = vcombine.low %v370_v62, %v371_v10  ;;  %v388_v15 = vcombine.low %v384_v63, %v385_v11  ;;  %v479_v16 = vsel %vm4307_vm2, %v464_v48, %v475_v6 }
 0x141   :  { %3242 = vst.sshfl [vmem:[#allocation2 + $0x18] sm:$0x33 pattern:$0x76325410] %v442_v5  ;;  %v493_v17 = vsel %vm4307_vm2, %v475_v6, %v464_v48  ;;  %v482_v18 = vcombine.low %v478_v7, %v479_v16  ;;  %v536_v20 = vcombine.low %v532_v60, %v533_v12  ;;  %v547_v21 = vsel %vm4307_vm2, %v529_v59, %v518_v52 }
 0x142   :  { %v496_v19 = vcombine.low %v492_v8, %v493_v17  ;;  %3238 = vst.sshfl [vmem:[#allocation2 + $0x1c] sm:$0x33 pattern:$0x76325410] %v388_v15  ;;  %v550_v22 = vcombine.low %v546_v13, %v547_v21 }
 0x143   :  { %3237 = vst.sshfl [vmem:[#allocation2] sm:$0x33 pattern:$0x76325410] %v374_v14 }
 0x144   :  { %3246 = vst.sshfl [vmem:[#allocation2 + $0x14] sm:$0x33 pattern:$0x76325410] %v496_v19 }
 0x145   :  { %3249 = vst.sshfl [vmem:[#allocation2 + $0xc] sm:$0x33 pattern:$0x76325410] %v536_v20 }
 0x146   :  { %3245 = vst.sshfl [vmem:[#allocation2 + $0x8] sm:$0x33 pattern:$0x76325410] %v482_v18 }
 0x147   :  { %3250 = vst.sshfl [vmem:[#allocation2 + $0x10] sm:$0x33 pattern:$0x76325410] %v550_v22 }
 0x148   :  { %v3254_v49 = vld.sshfl [vmem:[#allocation2 + $0x4] sm:$0x33 pattern:$0x76325410] }
 0x149   :  { %v703_v59 = vcombine.high %v3254_v49, %v3254_v49 }
 0x14a   :  { %v3251_v23 = vld.sshfl [vmem:[#allocation2] sm:$0x33 pattern:$0x76325410] }
 0x14b   :  { %v659_v24 = vadd.f32 %v3251_v23, %v658_v0  ;;  %v585_v26 = vcombine.high %v3251_v23, %v3251_v23 }
 0x14d   :  { %v3252_v25 = vmul.f32 -1.442695, %v659_v24  ;;  %v661_v27 = vadd.f32 %v660_v32, %v585_v26  ;;  %v3258_v16 = vld.sshfl [vmem:[#allocation2 + $0x8] sm:$0x33 pattern:$0x76325410] }
 0x14e   :  { %v818_v21 = vcombine.high %v3258_v16, %v3258_v16 }
 0x14f   :  { %3713 = vpow2.f32 %v3252_v25  ;;  %v3253_v39 = vmul.f32 -1.442695, %v661_v27 }
 0x150   :  { %3715 = vtanh.f32 %v661_v27 }
 0x159   :  { %v3714_v28 = vpop.eup %3713 }
 0x15a   :  { %v666_v29 = vadd.f32 1.0, %v3714_v28  ;;  %v3716_v31 = vpop.eup %3715 }
 0x15c   :  { %3717 = vrcp.f32 %v666_v29 }
 0x15d   :  { %3719 = vpow2.f32 %v3253_v39 }
 0x166   :  { %v3718_v33 = vpop.eup %3717 }
 0x167   :  { %v677_v35 = vmul.f32 %v3718_v33, %v3716_v31  ;;  %v3720_v40 = vpop.eup %3719  ;;  %v676_v42 = vmul.f32 0.0, %v3718_v33 }
 0x168   :  { %v673_v41 = vadd.f32 1.0, %v3720_v40 }
 0x169   :  { %679 = vrot.lane.b32.xlu0 %v677_v35, %s4065_s2 }
 0x16a   :  { %3721 = vrcp.f32 %v673_v41 }
 0x174   :  { %v3722_v32 = vpop.eup %3721 }
 0x1db   :  { %v680_v0 = vpop.permute.xlu0 %679 }
 0x1dc   :  { %v682_v44 = vadd.f32 %v680_v0, %v676_v42 }
 0x1de   :  { %3723 = vtanh.f32 %v682_v44 }
 0x1e8   :  { %v3724_v46 = vpop.eup %3723 }
 0x1e9   :  { %v684_v47 = vmul.f32 %v3724_v46, %v3722_v32 }
 0x1eb   :  { %686 = vrot.lane.b32.xlu0 %v684_v47, %s4065_s2 }
 0x25d   :  { %v687_v48 = vpop.permute.xlu0 %686 }
 0x25e   :  { %690 = vst.msk [vmem:[#allocation3] sm:$0x3] %vm689_vm3, %v687_v48  ;;  %3255 = vmatmul.mubr.msk.f32.vlgmr.msra.gmra.mrb[4].mxu0 %vm588_vm5, %v687_v48 }
 0x25f   :  { %693 = vst.msk [vmem:[#allocation3 + $0xe] sm:$0x3] %vm692_vm4, %v687_v48  ;;  %3452 = vmatpush1.bf16.msra.mxu0 %v4241_v36  ;;  %1002 = vmatprep.mubr.f32.mxu0 %v4063_v1 }
 0x260   :  { %3454 = vmatprep.subr.bf16.mxu0 %v4243_v37 }
 0x263   :  { %3456 = vmatpush1.bf16.msra.mxu0 %v4248_v43 }
 0x264   :  { %3458 = vmatprep.subr.bf16.mxu0 %v4252_v45 }
 0x267   :  { %3460 = vmatpush1.bf16.msra.mxu0 %v4258_v50 }
 0x268   :  { %3462 = vmatprep.subr.bf16.mxu0 %v4262_v51 }
 0x26b   :  { %3464 = vmatpush1.bf16.msra.mxu0 %v4268_v54 }
 0x26c   :  { %3482 = vmatprep.subr.bf16.mxu0 %v4237_v30 }
 0x331   :  { %v774_v52 = vpop.f32.mrb[4].mxu0 }
 0x332   :  { %v775_v53 = vadd.f32 %v3254_v49, %v774_v52  ;;  %v776_v57 = vpop.f32.mrb[5].mxu0 }
 0x333   :  { %v777_v60 = vadd.f32 %v776_v57, %v703_v59 }
 0x334   :  { %v3256_v58 = vmul.f32 -1.442695, %v775_v53 }
 0x335   :  { %v3257_v5 = vmul.f32 -1.442695, %v777_v60 }
 0x336   :  { %3725 = vpow2.f32 %v3256_v58 }
 0x337   :  { %3727 = vtanh.f32 %v777_v60 }
 0x340   :  { %v3726_v61 = vpop.eup %3725 }
 0x341   :  { %v782_v62 = vadd.f32 1.0, %v3726_v61  ;;  %v3728_v63 = vpop.eup %3727 }
 0x343   :  { %3729 = vrcp.f32 %v782_v62 }
 0x344   :  { %3731 = vpow2.f32 %v3257_v5 }
 0x34d   :  { %v3730_v2 = vpop.eup %3729 }
 0x34e   :  { %v793_v3 = vmul.f32 %v3730_v2, %v3728_v63  ;;  %v3732_v6 = vpop.eup %3731  ;;  %v792_v8 = vmul.f32 %v3730_v2, %v682_v44  ;;  %v3262_v44 = vld.sshfl [vmem:[#allocation2 + $0xc] sm:$0x33 pattern:$0x76325410] }
 0x34f   :  { %v789_v7 = vadd.f32 1.0, %v3732_v6  ;;  %v933_v49 = vcombine.high %v3262_v44, %v3262_v44 }
 0x350   :  { %795 = vrot.lane.b32.xlu1 %v793_v3, %s4065_s2 }
 0x351   :  { %3733 = vrcp.f32 %v789_v7 }
 0x35b   :  { %v3734_v12 = vpop.eup %3733 }
 0x3c2   :  { %v796_v10 = vpop.permute.xlu1 %795 }
 0x3c3   :  { %v798_v11 = vadd.f32 %v796_v10, %v792_v8  ;;  %v3266_v10 = vld.sshfl [vmem:[#allocation2 + $0x10] sm:$0x33 pattern:$0x76325410] }
 0x3c5   :  { %3735 = vtanh.f32 %v798_v11 }
 0x3cf   :  { %v3736_v13 = vpop.eup %3735 }
 0x3d0   :  { %v800_v14 = vmul.f32 %v3736_v13, %v3734_v12 }
 0x3d2   :  { %802 = vrot.lane.b32.xlu1 %v800_v14, %s4065_s2 }
 0x444   :  { %v803_v15 = vpop.permute.xlu1 %802 }
 0x445   :  { %806 = vst.msk [vmem:[#allocation3 + $0x2] sm:$0x3] %vm689_vm3, %v803_v15  ;;  %3259 = vmatmul.mubr.msk.f32.vlgmr.msra.gmra.mrb[2].mxu1 %vm588_vm5, %v803_v15 }
 0x446   :  { %808 = vst.msk [vmem:[#allocation3 + $0xc] sm:$0x3] %vm692_vm4, %v803_v15  ;;  %3468 = vmatpush1.bf16.msra.mxu1 %v4241_v36  ;;  %1117 = vmatprep.mubr.f32.mxu1 %v4063_v1  ;;  %v1048_v15 = vcombine.high %v3266_v10, %v3266_v10 }
 0x447   :  { %3470 = vmatprep.subr.bf16.mxu1 %v4243_v37 }
 0x44a   :  { %3472 = vmatpush1.bf16.msra.mxu1 %v4248_v43 }
 0x44b   :  { %3474 = vmatprep.subr.bf16.mxu1 %v4252_v45 }
 0x44e   :  { %3476 = vmatpush1.bf16.msra.mxu1 %v4258_v50 }
 0x44f   :  { %3478 = vmatprep.subr.bf16.mxu1 %v4262_v51 }
 0x452   :  { %3480 = vmatpush1.bf16.msra.mxu1 %v4268_v54 }
 0x453   :  { %3498 = vmatprep.subr.bf16.mxu1 %v4237_v30 }
 0x518   :  { %v889_v17 = vpop.f32.mrb[2].mxu1 }
 0x519   :  { %v890_v18 = vadd.f32 %v3258_v16, %v889_v17  ;;  %v891_v19 = vpop.f32.mrb[3].mxu1 }
 0x51a   :  { %v892_v22 = vadd.f32 %v891_v19, %v818_v21 }
 0x51b   :  { %v3260_v20 = vmul.f32 -1.442695, %v890_v18 }
 0x51c   :  { %v3261_v28 = vmul.f32 -1.442695, %v892_v22 }
 0x51d   :  { %3737 = vpow2.f32 %v3260_v20 }
 0x51e   :  { %3739 = vtanh.f32 %v892_v22 }
 0x527   :  { %v3738_v23 = vpop.eup %3737 }
 0x528   :  { %v897_v24 = vadd.f32 1.0, %v3738_v23  ;;  %v3740_v25 = vpop.eup %3739 }
 0x52a   :  { %3741 = vrcp.f32 %v897_v24 }
 0x52b   :  { %3743 = vpow2.f32 %v3261_v28 }
 0x534   :  { %v3742_v26 = vpop.eup %3741 }
 0x535   :  { %v908_v27 = vmul.f32 %v3742_v26, %v3740_v25  ;;  %v3744_v29 = vpop.eup %3743  ;;  %v907_v33 = vmul.f32 %v3742_v26, %v798_v11 }
 0x536   :  { %v904_v31 = vadd.f32 1.0, %v3744_v29 }
 0x537   :  { %910 = vrot.lane.b32.xlu0 %v908_v27, %s4065_s2 }
 0x538   :  { %3745 = vrcp.f32 %v904_v31 }
 0x542   :  { %v3746_v40 = vpop.eup %3745 }
 0x5a9   :  { %v911_v35 = vpop.permute.xlu0 %910 }
 0x5aa   :  { %v913_v39 = vadd.f32 %v911_v35, %v907_v33  ;;  %v3270_v35 = vld.sshfl [vmem:[#allocation2 + $0x14] sm:$0x33 pattern:$0x76325410] }
 0x5ac   :  { %3747 = vtanh.f32 %v913_v39 }
 0x5b6   :  { %v3748_v41 = vpop.eup %3747 }
 0x5b7   :  { %v915_v42 = vmul.f32 %v3748_v41, %v3746_v40 }
 0x5b9   :  { %917 = vrot.lane.b32.xlu1 %v915_v42, %s4065_s2 }
 0x62b   :  { %v918_v0 = vpop.permute.xlu1 %917 }
 0x62c   :  { %921 = vst.msk [vmem:[#allocation3 + $0x4] sm:$0x3] %vm689_vm3, %v918_v0  ;;  %3263 = vmatmul.mubr.msk.f32.vlgmr.msra.gmra.mrb[6].mxu0 %vm588_vm5, %v918_v0 }
 0x62d   :  { %923 = vst.msk [vmem:[#allocation3 + $0xa] sm:$0x3] %vm692_vm4, %v918_v0  ;;  %3484 = vmatpush1.bf16.msra.mxu0 %v4241_v36  ;;  %1230 = vmatprep.mubr.f32.mxu0 %v4063_v1 }
 0x62e   :  { %3486 = vmatprep.subr.bf16.mxu0 %v4243_v37 }
 0x631   :  { %3488 = vmatpush1.bf16.msra.mxu0 %v4248_v43 }
 0x632   :  { %3490 = vmatprep.subr.bf16.mxu0 %v4252_v45 }
 0x635   :  { %3492 = vmatpush1.bf16.msra.mxu0 %v4258_v50 }
 0x636   :  { %3494 = vmatprep.subr.bf16.mxu0 %v4262_v51 }
 0x639   :  { %3496 = vmatpush1.bf16.msra.mxu0 %v4268_v54 }
 0x63a   :  { %3514 = vmatprep.subr.bf16.mxu0 %v4237_v30 }
 0x6ff   :  { %v1004_v32 = vpop.f32.mrb[6].mxu0 }
 0x700   :  { %v1005_v46 = vadd.f32 %v3262_v44, %v1004_v32  ;;  %v1006_v47 = vpop.f32.mrb[7].mxu0 }
 0x701   :  { %v1007_v52 = vadd.f32 %v1006_v47, %v933_v49 }
 0x702   :  { %v3264_v48 = vmul.f32 -1.442695, %v1005_v46 }
 0x703   :  { %v3265_v61 = vmul.f32 -1.442695, %v1007_v52 }
 0x704   :  { %3749 = vpow2.f32 %v3264_v48 }
 0x705   :  { %3751 = vtanh.f32 %v1007_v52 }
 0x70e   :  { %v3750_v53 = vpop.eup %3749 }
 0x70f   :  { %v1012_v57 = vadd.f32 1.0, %v3750_v53  ;;  %v3752_v58 = vpop.eup %3751 }
 0x711   :  { %3753 = vrcp.f32 %v1012_v57 }
 0x712   :  { %3755 = vpow2.f32 %v3265_v61 }
 0x71b   :  { %v3754_v59 = vpop.eup %3753 }
 0x71c   :  { %v1023_v60 = vmul.f32 %v3754_v59, %v3752_v58  ;;  %v3756_v30 = vpop.eup %3755  ;;  %v1022_v63 = vmul.f32 %v3754_v59, %v913_v39  ;;  %v3274_v58 = vld.sshfl [vmem:[#allocation2 + $0x18] sm:$0x33 pattern:$0x76325410] }
 0x71d   :  { %v1019_v62 = vadd.f32 1.0, %v3756_v30 }
 0x71e   :  { %1025 = vrot.lane.b32.xlu0 %v1023_v60, %s4065_s2 }
 0x71f   :  { %3757 = vrcp.f32 %v1019_v62  ;;  %v1274_v62 = vcombine.high %v3274_v58, %v3274_v58 }
 0x729   :  { %v3758_v5 = vpop.eup %3757 }
 0x790   :  { %v1026_v2 = vpop.permute.xlu0 %1025 }
 0x791   :  { %v1028_v3 = vadd.f32 %v1026_v2, %v1022_v63 }
 0x793   :  { %3759 = vtanh.f32 %v1028_v3 }
 0x79d   :  { %v3760_v6 = vpop.eup %3759 }
 0x79e   :  { %v1030_v7 = vmul.f32 %v3760_v6, %v3758_v5 }
 0x7a0   :  { %1032 = vrot.lane.b32.xlu1 %v1030_v7, %s4065_s2 }
 0x812   :  { %v1033_v8 = vpop.permute.xlu1 %1032 }
 0x813   :  { %1036 = vst.msk [vmem:[#allocation3 + $0x6] sm:$0x3] %vm689_vm3, %v1033_v8  ;;  %3267 = vmatmul.mubr.msk.f32.vlgmr.msra.gmra.mrb[4].mxu1 %vm588_vm5, %v1033_v8 }
 0x814   :  { %1038 = vst.msk [vmem:[#allocation3 + $0x8] sm:$0x3] %vm692_vm4, %v1033_v8  ;;  %3500 = vmatpush1.bf16.msra.mxu1 %v4241_v36  ;;  %1343 = vmatprep.mubr.f32.mxu1 %v4063_v1 }
 0x815   :  { %3502 = vmatprep.subr.bf16.mxu1 %v4243_v37 }
 0x818   :  { %3504 = vmatpush1.bf16.msra.mxu1 %v4248_v43 }
 0x819   :  { %3506 = vmatprep.subr.bf16.mxu1 %v4252_v45 }
 0x81c   :  { %3508 = vmatpush1.bf16.msra.mxu1 %v4258_v50 }
 0x81d   :  { %3510 = vmatprep.subr.bf16.mxu1 %v4262_v51 }
 0x820   :  { %3512 = vmatpush1.bf16.msra.mxu1 %v4268_v54 }
 0x8e6   :  { %v1119_v11 = vpop.f32.mrb[4].mxu1 }
 0x8e7   :  { %v1120_v12 = vadd.f32 %v3266_v10, %v1119_v11  ;;  %v1121_v13 = vpop.f32.mrb[5].mxu1 }
 0x8e8   :  { %v1122_v16 = vadd.f32 %v1121_v13, %v1048_v15 }
 0x8e9   :  { %v3268_v14 = vmul.f32 -1.442695, %v1120_v12 }
 0x8ea   :  { %v3269_v22 = vmul.f32 -1.442695, %v1122_v16 }
 0x8eb   :  { %3761 = vpow2.f32 %v3268_v14 }
 0x8ec   :  { %3763 = vtanh.f32 %v1122_v16 }
 0x8f5   :  { %v3762_v17 = vpop.eup %3761 }
 0x8f6   :  { %v1127_v18 = vadd.f32 1.0, %v3762_v17  ;;  %v3764_v19 = vpop.eup %3763 }
 0x8f8   :  { %3765 = vrcp.f32 %v1127_v18 }
 0x8f9   :  { %3767 = vpow2.f32 %v3269_v22 }
 0x902   :  { %v3766_v20 = vpop.eup %3765 }
 0x903   :  { %v1138_v21 = vmul.f32 %v3766_v20, %v3764_v19  ;;  %v3768_v23 = vpop.eup %3767  ;;  %v1137_v25 = vmul.f32 %v3766_v20, %v1028_v3  ;;  %v3278_v19 = vld.sshfl [vmem:[#allocation2 + $0x1c] sm:$0x33 pattern:$0x76325410] }
 0x904   :  { %v1134_v24 = vadd.f32 1.0, %v3768_v23 }
 0x905   :  { %1140 = vrot.lane.b32.xlu0 %v1138_v21, %s4065_s2 }
 0x906   :  { %3769 = vrcp.f32 %v1134_v24  ;;  %v1387_v24 = vcombine.high %v3278_v19, %v3278_v19 }
 0x910   :  { %v3770_v28 = vpop.eup %3769 }
 0x977   :  { %v1141_v26 = vpop.permute.xlu0 %1140 }
 0x978   :  { %v1143_v27 = vadd.f32 %v1141_v26, %v1137_v25 }
 0x97a   :  { %3771 = vtanh.f32 %v1143_v27 }
 0x984   :  { %v3772_v29 = vpop.eup %3771 }
 0x985   :  { %v1145_v31 = vmul.f32 %v3772_v29, %v3770_v28 }
 0x987   :  { %1147 = vrot.lane.b32.xlu1 %v1145_v31, %s4065_s2 }
 0x9f9   :  { %v1148_v33 = vpop.permute.xlu1 %1147 }
 0x9fa   :  { %1150 = vst.msk [vmem:[#allocation3 + $0x8] sm:$0x3] %vm689_vm3, %v1148_v33  ;;  %3271 = vmatmul.mubr.msk.f32.vlgmr.msra.gmra.mrb[8].mxu0 %vm588_vm5, %v1148_v33 }
 0x9fb   :  { %1151 = vst.msk [vmem:[#allocation3 + $0x6] sm:$0x3] %vm692_vm4, %v1148_v33  ;;  %3516 = vmatpush1.bf16.msra.mxu0 %v4241_v36  ;;  %1456 = vmatprep.mubr.f32.mxu0 %v4063_v1  ;;  %v1161_v36 = vcombine.high %v3270_v35, %v3270_v35  ;;  %v1500_v33 = vld [vmem:[#allocation10 + $0x8] sm:$0xff] }
 0x9fc   :  { %3518 = vmatprep.subr.bf16.mxu0 %v4243_v37 }
 0x9ff   :  { %3520 = vmatpush1.bf16.msra.mxu0 %v4248_v43 }
 0xa00   :  { %3522 = vmatprep.subr.bf16.mxu0 %v4252_v45 }
 0xa03   :  { %3524 = vmatpush1.bf16.msra.mxu0 %v4258_v50 }
 0xa04   :  { %3526 = vmatprep.subr.bf16.mxu0 %v4262_v51 }
 0xa07   :  { %3528 = vmatpush1.bf16.msra.mxu0 %v4268_v54 }
 0xacd   :  { %v1232_v39 = vpop.f32.mrb[8].mxu0 }
 0xace   :  { %v1233_v40 = vadd.f32 %v3270_v35, %v1232_v39  ;;  %v1234_v41 = vpop.f32.mrb[9].mxu0  ;;  %v1502_v35 = vld [vmem:[#allocation10 + $0x18] sm:$0xff]  ;;  %v1499_v39 = vld [vmem:[#allocation10] sm:$0xff] }
 0xacf   :  { %v1235_v0 = vadd.f32 %v1234_v41, %v1161_v36  ;;  %v1501_v41 = vld [vmem:[#allocation10 + $0x10] sm:$0xff] }
 0xad0   :  { %v3272_v42 = vmul.f32 -1.442695, %v1233_v40  ;;  %v3529_v40 = vpack.c.bf16 %v1502_v35, %v1500_v33 }
 0xad1   :  { %v3273_v50 = vmul.f32 -1.442695, %v1235_v0 }
 0xad2   :  { %3773 = vpow2.f32 %v3272_v42  ;;  %v3531_v42 = vpack.c.bf16 %v1501_v41, %v1499_v39  ;;  %3530 = vmatprep.subr.bf16.mxu1 %v3529_v40  ;;  %v1494_v39 = vld [vmem:[#allocation3 + $0x6] sm:$0x3] }
 0xad3   :  { %3775 = vtanh.f32 %v1235_v0 }
 0xadc   :  { %v3774_v44 = vpop.eup %3773 }
 0xadd   :  { %v1240_v37 = vadd.f32 1.0, %v3774_v44  ;;  %v3776_v43 = vpop.eup %3775 }
 0xadf   :  { %3777 = vrcp.f32 %v1240_v37 }
 0xae0   :  { %3779 = vpow2.f32 %v3273_v50  ;;  %v1506_v50 = vld [vmem:[#allocation10 + $0x38] sm:$0xff] }
 0xae9   :  { %v3778_v45 = vpop.eup %3777 }
 0xaea   :  { %v1251_v32 = vmul.f32 %v3778_v45, %v3776_v43  ;;  %v3780_v51 = vpop.eup %3779  ;;  %v1250_v46 = vmul.f32 %v3778_v45, %v1143_v27 }
 0xaeb   :  { %v1247_v54 = vadd.f32 1.0, %v3780_v51  ;;  %v1503_v51 = vld [vmem:[#allocation10 + $0x20] sm:$0xff] }
 0xaec   :  { %1253 = vrot.lane.b32.xlu0 %v1251_v32, %s4065_s2  ;;  %v1504_v32 = vld [vmem:[#allocation10 + $0x28] sm:$0xff] }
 0xaed   :  { %3781 = vrcp.f32 %v1247_v54  ;;  %v3533_v54 = vpack.c.bf16 %v1506_v50, %v1504_v32 }
 0xaf7   :  { %v3782_v49 = vpop.eup %3781 }
 0xb5e   :  { %v1254_v47 = vpop.permute.xlu0 %1253 }
 0xb5f   :  { %v1256_v48 = vadd.f32 %v1254_v47, %v1250_v46  ;;  %v1505_v46 = vld [vmem:[#allocation10 + $0x30] sm:$0xff]  ;;  %v1508_v47 = vld [vmem:[#allocation10 + $0x48] sm:$0xff] }
 0xb61   :  { %3783 = vtanh.f32 %v1256_v48 }
 0xb6b   :  { %v3784_v52 = vpop.eup %3783 }
 0xb6c   :  { %v1258_v53 = vmul.f32 %v3784_v52, %v3782_v49  ;;  %v3535_v49 = vpack.c.bf16 %v1505_v46, %v1503_v51 }
 0xb6e   :  { %1260 = vrot.lane.b32.xlu1 %v1258_v53, %s4065_s2  ;;  %v1507_v53 = vld [vmem:[#allocation10 + $0x40] sm:$0xff] }
 0xbe0   :  { %v1261_v57 = vpop.permute.xlu1 %1260 }
 0xbe1   :  { %1263 = vst.msk [vmem:[#allocation3 + $0xa] sm:$0x3] %vm689_vm3, %v1261_v57  ;;  %3275 = vmatmul.mubr.msk.f32.vlgmr.msra.gmra.mrb[6].mxu1 %vm588_vm5, %v1261_v57 }
 0xbe2   :  { %1264 = vst.msk [vmem:[#allocation3 + $0x4] sm:$0x3] %vm692_vm4, %v1261_v57  ;;  %1655 = vmatprep.mubr.f32.mxu1 %v4063_v1  ;;  %3532 = vmatpush1.bf16.msra.mxu1 %v3531_v42  ;;  %v1509_v57 = vld [vmem:[#allocation10 + $0x50] sm:$0xff] }
 0xbe3   :  { %3534 = vmatprep.subr.bf16.mxu1 %v3533_v54 }
 0xbe6   :  { %3536 = vmatpush1.bf16.msra.mxu1 %v3535_v49 }
 0xbe8   :  { %v1496_v42 = vld [vmem:[#allocation3 + $0xa] sm:$0x3] }
 0xbe9   :  { %v1493_v35 = vld [vmem:[#allocation3 + $0x4] sm:$0x3] }
 0xbea   :  { %v1542_v41 = vcombine.low %v1493_v35, %v1494_v39 }
 0xbec   :  { %v1556_v50 = vrot.slane %v1542_v41, %v4209_v9 }
 0xcb4   :  { %v1345_v59 = vpop.f32.mrb[6].mxu1 }
 0xcb5   :  { %v1346_v60 = vadd.f32 %v3274_v58, %v1345_v59  ;;  %v1347_v61 = vpop.f32.mrb[7].mxu1  ;;  %v1512_v58 = vld [vmem:[#allocation10 + $0x68] sm:$0xff]  ;;  %v1514_v59 = vld [vmem:[#allocation10 + $0x78] sm:$0xff] }
 0xcb6   :  { %v1348_v63 = vadd.f32 %v1347_v61, %v1274_v62  ;;  %v3541_v61 = vpack.c.bf16 %v1514_v59, %v1512_v58  ;;  %v1513_v62 = vld [vmem:[#allocation10 + $0x70] sm:$0xff] }
 0xcb7   :  { %v3276_v30 = vmul.f32 -1.442695, %v1346_v60  ;;  %v3539_v60 = vpack.c.bf16 %v1509_v57, %v1507_v53  ;;  %v1515_v53 = vld [vmem:[%s4744_s5] sm:$0x3] }
 0xcb8   :  { %v3277_v8 = vmul.f32 -1.442695, %v1348_v63  ;;  %v1520_v57 = vrot.slane %v1515_v53, %v139_v55  ;;  %v1524_v58 = vrot.slane %v1515_v53, %v143_v56 }
 0xcb9   :  { %3785 = vpow2.f32 %v3276_v30  ;;  %v1511_v30 = vld [vmem:[#allocation10 + $0x60] sm:$0xff] }
 0xcba   :  { %3787 = vtanh.f32 %v1348_v63  ;;  %v3543_v63 = vpack.c.bf16 %v1513_v62, %v1511_v30  ;;  %v1525_v59 = vcombine.low %v1520_v57, %v1524_v58 }
 0xcc3   :  { %v3786_v2 = vpop.eup %3785 }
 0xcc4   :  { %v1353_v3 = vadd.f32 1.0, %v3786_v2  ;;  %v3788_v5 = vpop.eup %3787 }
 0xcc6   :  { %3789 = vrcp.f32 %v1353_v3 }
 0xcc7   :  { %3791 = vpow2.f32 %v3277_v8  ;;  %v1932_v8 = vld [vmem:[#allocation11] sm:$0xff] }
 0xcd0   :  { %v3790_v6 = vpop.eup %3789 }
 0xcd1   :  { %v1364_v7 = vmul.f32 %v3790_v6, %v3788_v5  ;;  %v3792_v10 = vpop.eup %3791  ;;  %v1363_v12 = vmul.f32 %v3790_v6, %v1256_v48  ;;  %v1510_v48 = vld [vmem:[#allocation10 + $0x58] sm:$0xff]  ;;  %v1933_v6 = vld [vmem:[#allocation11 + $0x8] sm:$0xff] }
 0xcd2   :  { %v1360_v11 = vadd.f32 1.0, %v3792_v10  ;;  %v3537_v52 = vpack.c.bf16 %v1510_v48, %v1508_v47 }
 0xcd3   :  { %1366 = vrot.lane.b32.xlu0 %v1364_v7, %s4065_s2  ;;  %v1935_v7 = vld [vmem:[#allocation11 + $0x18] sm:$0xff] }
 0xcd4   :  { %3793 = vrcp.f32 %v1360_v11  ;;  %3538 = vmatprep.subr.bf16.mxu1 %v3537_v52  ;;  %v4425_v10 = vpack.c.bf16 %v1935_v7, %v1933_v6  ;;  %v1934_v11 = vld [vmem:[#allocation11 + $0x10] sm:$0xff] }
 0xcd5   :  { %3540 = vmatpush1.bf16.msra.mxu1 %v3539_v60  ;;  %v1532_v60 = vrot.slane %v1525_v59, %v4209_v9 }
 0xcd6   :  { %3542 = vmatprep.subr.bf16.mxu1 %v3541_v61  ;;  %3546 = vmatprep.subr.bf16.mxu0 %v4425_v10 }
 0xcd7   :  { %v1575_v61 = vcombine.low %v1532_v60, %v1532_v60 }
 0xcd9   :  { %3544 = vmatpush1.bf16.msra.mxu1 %v3543_v63  ;;  %v1582_v30 = vrot.slane %v1575_v61, %v4209_v9 }
 0xcda   :  { %3562 = vmatprep.subr.bf16.mxu1 %v4425_v10 }
 0xcdb   :  { %v1583_v62 = vcombine.low %v1582_v30, %v1582_v30  ;;  %v1584_v63 = vcombine.high %v1582_v30, %v1582_v30 }
 0xcde   :  { %v3794_v15 = vpop.eup %3793 }
 0xd45   :  { %v1367_v13 = vpop.permute.xlu0 %1366 }
 0xd46   :  { %v1369_v14 = vadd.f32 %v1367_v13, %v1363_v12  ;;  %v1937_v12 = vld [vmem:[#allocation11 + $0x28] sm:$0xff]  ;;  %v1939_v13 = vld [vmem:[#allocation11 + $0x38] sm:$0xff] }
 0xd48   :  { %3795 = vtanh.f32 %v1369_v14 }
 0xd52   :  { %v3796_v16 = vpop.eup %3795 }
 0xd53   :  { %v1371_v17 = vmul.f32 %v3796_v16, %v3794_v15  ;;  %v4429_v15 = vpack.c.bf16 %v1939_v13, %v1937_v12  ;;  %v1936_v16 = vld [vmem:[#allocation11 + $0x20] sm:$0xff] }
 0xd55   :  { %1373 = vrot.lane.b32.xlu1 %v1371_v17, %s4065_s2  ;;  %v1938_v17 = vld [vmem:[#allocation11 + $0x30] sm:$0xff] }
 0xdc7   :  { %v1374_v18 = vpop.permute.xlu1 %1373 }
 0xdc8   :  { %1376 = vst.msk [vmem:[#allocation3 + $0xc] sm:$0x3] %vm689_vm3, %v1374_v18  ;;  %3279 = vmatmul.mubr.msk.f32.vlgmr.msra.gmra.mrb[10].mxu0 %vm588_vm5, %v1374_v18 }
 0xdc9   :  { %1377 = vst.msk [vmem:[#allocation3 + $0x2] sm:$0x3] %vm692_vm4, %v1374_v18  ;;  %2024 = vmatprep.mubr.f32.mxu0 %v4063_v1  ;;  %v1941_v18 = vld [vmem:[#allocation11 + $0x48] sm:$0xff] }
 0xdd0   :  { %v1492_v40 = vld [vmem:[#allocation3 + $0x2] sm:$0x3] }
 0xe9b   :  { %v1458_v20 = vpop.f32.mrb[10].mxu0 }
 0xe9c   :  { %v1459_v21 = vadd.f32 %v3278_v19, %v1458_v20  ;;  %v1460_v22 = vpop.f32.mrb[11].mxu0  ;;  %v1943_v19 = vld [vmem:[#allocation11 + $0x58] sm:$0xff]  ;;  %v4434_v20 = vpack.c.bf16 %v1938_v17, %v1936_v16 }
 0xe9d   :  { %v1461_v25 = vadd.f32 %v1460_v22, %v1387_v24  ;;  %v1940_v22 = vld [vmem:[#allocation11 + $0x40] sm:$0xff]  ;;  %v1945_v24 = vld [vmem:[#allocation11 + $0x68] sm:$0xff] }
 0xe9e   :  { %v3280_v23 = vmul.f32 -1.442695, %v1459_v21  ;;  %v4437_v21 = vpack.c.bf16 %v1943_v19, %v1941_v18 }
 0xe9f   :  { %v3281_v36 = vmul.f32 -1.442695, %v1461_v25 }
 0xea0   :  { %3797 = vpow2.f32 %v3280_v23  ;;  %v1942_v23 = vld [vmem:[#allocation11 + $0x50] sm:$0xff] }
 0xea1   :  { %3799 = vtanh.f32 %v1461_v25  ;;  %v1947_v25 = vld [vmem:[#allocation11 + $0x78] sm:$0xff] }
 0xeaa   :  { %v3798_v26 = vpop.eup %3797 }
 0xeab   :  { %v1466_v27 = vadd.f32 1.0, %v3798_v26  ;;  %v3800_v28 = vpop.eup %3799  ;;  %v4440_v26 = vpack.c.bf16 %v1942_v23, %v1940_v22 }
 0xead   :  { %3801 = vrcp.f32 %v1466_v27  ;;  %v4443_v27 = vpack.c.bf16 %v1947_v25, %v1945_v24 }
 0xeae   :  { %3803 = vpow2.f32 %v3281_v36 }
 0xeb7   :  { %v3802_v29 = vpop.eup %3801 }
 0xeb8   :  { %v1477_v31 = vmul.f32 %v3802_v29, %v3800_v28  ;;  %v3804_v0 = vpop.eup %3803  ;;  %v1476_v37 = vmul.f32 %v3802_v29, %v1369_v14  ;;  %v4427_v14 = vpack.c.bf16 %v1934_v11, %v1932_v8  ;;  %v1944_v28 = vld [vmem:[#allocation11 + $0x60] sm:$0xff]  ;;  %v1946_v29 = vld [vmem:[#allocation11 + $0x70] sm:$0xff] }
 0xeb9   :  { %v1473_v44 = vadd.f32 1.0, %v3804_v0  ;;  %v1497_v0 = vld [vmem:[#allocation3 + $0xc] sm:$0x3] }
 0xeba   :  { %1479 = vrot.lane.b32.xlu0 %v1477_v31, %s4065_s2  ;;  %3548 = vmatpush1.bf16.msra.mxu0 %v4427_v14  ;;  %v4446_v31 = vpack.c.bf16 %v1946_v29, %v1944_v28 }
 0xebb   :  { %3805 = vrcp.f32 %v1473_v44  ;;  %3550 = vmatprep.subr.bf16.mxu0 %v4429_v15 }
 0xebe   :  { %3552 = vmatpush1.bf16.msra.mxu0 %v4434_v20 }
 0xebf   :  { %3554 = vmatprep.subr.bf16.mxu0 %v4437_v21 }
 0xec2   :  { %3556 = vmatpush1.bf16.msra.mxu0 %v4440_v26 }
 0xec3   :  { %3558 = vmatprep.subr.bf16.mxu0 %v4443_v27 }
 0xec5   :  { %v3806_v2 = vpop.eup %3805 }
 0xec6   :  { %3560 = vmatpush1.bf16.msra.mxu0 %v4446_v31 }
 0xec7   :  { %3578 = vmatprep.subr.bf16.mxu0 %v4425_v10 }
 0xec9   :  { %2025 = vmatmul.mubr.f32.vlgmr.msra.gmra.mrb[12].mxu0 %v4063_v1 }
 0xeca   :  { %3580 = vmatpush1.bf16.msra.mxu0 %v4427_v14  ;;  %2253 = vmatprep.mubr.f32.mxu0 %v4063_v1 }
 0xecb   :  { %3582 = vmatprep.subr.bf16.mxu0 %v4429_v15 }
 0xece   :  { %3584 = vmatpush1.bf16.msra.mxu0 %v4434_v20 }
 0xecf   :  { %3586 = vmatprep.subr.bf16.mxu0 %v4437_v21 }
 0xed2   :  { %3588 = vmatpush1.bf16.msra.mxu0 %v4440_v26 }
 0xed3   :  { %3590 = vmatprep.subr.bf16.mxu0 %v4443_v27 }
 0xed6   :  { %3592 = vmatpush1.bf16.msra.mxu0 %v4446_v31 }
 0xed7   :  { %3610 = vmatprep.subr.bf16.mxu0 %v4425_v10 }
 0xf2c   :  { %v1480_v43 = vpop.permute.xlu0 %1479 }
 0xf2d   :  { %v1482_v45 = vadd.f32 %v1480_v43, %v1476_v37 }
 0xf2f   :  { %3807 = vtanh.f32 %v1482_v45  ;;  %v1495_v45 = vld [vmem:[#allocation3 + $0x8] sm:$0x3] }
 0xf30   :  { %v1558_v51 = vcombine.low %v1495_v45, %v1496_v42 }
 0xf32   :  { %v1566_v47 = vrot.slane %v1558_v51, %v4209_v9 }
 0xf39   :  { %v3808_v3 = vpop.eup %3807 }
 0xf3a   :  { %v1484_v5 = vmul.f32 %v3808_v3, %v3806_v2 }
 0xf3c   :  { %1486 = vrot.lane.b32.xlu1 %v1484_v5, %s4065_s2 }
 0xf9c   :  { %v4479_v49 = vpop.f32.mrb[12].mxu0 }
 0xf9d   :  { %v4481_v52 = vpop.f32.mrb[13].mxu0 }
 0xfae   :  { %v1487_v33 = vpop.permute.xlu1 %1486 }
 0xfaf   :  { %1489 = vst.msk [vmem:[#allocation3 + $0xe] sm:$0x3] %vm689_vm3, %v1487_v33 }
 0xfb0   :  { %1490 = vst.msk [vmem:[#allocation3] sm:$0x3] %vm692_vm4, %v1487_v33 }
 0xfb6   :  { %v1498_v44 = vld [vmem:[#allocation3 + $0xe] sm:$0x3] }
 0xfb7   :  { %v1491_v36 = vld [vmem:[#allocation3] sm:$0x3]  ;;  %v1559_v43 = vcombine.low %v1497_v0, %v1498_v44 }
 0xfb8   :  { %v1541_v37 = vcombine.low %v1491_v36, %v1492_v40 }
 0xfb9   :  { %v1573_v46 = vrot.slane %v1559_v43, %v4209_v9 }
 0xfba   :  { %v1549_v32 = vrot.slane %v1541_v37, %v4209_v9 }
 0xfbb   :  { %v1574_v48 = vcombine.low %v1566_v47, %v1573_v46 }
 0xfbc   :  { %v1557_v54 = vcombine.low %v1549_v32, %v1556_v50 }
 0xfbe   :  { %3282 = vmatmul.mubr.msk.f32.vlgmr.msra.gmra.mrb[8].mxu1 %vm588_vm5, %v1557_v54 }
 0xfbf   :  { %1661 = vmatprep.mubr.f32.mxu1 %v4063_v1  ;;  %3564 = vmatpush1.bf16.msra.mxu1 %v4427_v14 }
 0xfc0   :  { %3566 = vmatprep.subr.bf16.mxu1 %v4429_v15 }
 0xfc2   :  { %3283 = vmatmul.mubr.msk.f32.gmra.mrb[10].mxu1 %vm588_vm5, %v1574_v48 }
 0xfc3   :  { %3568 = vmatpush1.bf16.msra.mxu1 %v4434_v20  ;;  %2138 = vmatprep.mubr.f32.mxu1 %v4063_v1 }
 0xfc4   :  { %3570 = vmatprep.subr.bf16.mxu1 %v4437_v21 }
 0xfc7   :  { %3572 = vmatpush1.bf16.msra.mxu1 %v4440_v26 }
 0xfc8   :  { %3574 = vmatprep.subr.bf16.mxu1 %v4443_v27 }
 0xfcb   :  { %3576 = vmatpush1.bf16.msra.mxu1 %v4446_v31 }
 0xfcc   :  { %3594 = vmatprep.subr.bf16.mxu1 %v4425_v10 }
0x1091   :  { %v1657_v2 = vpop.f32.mrb[8].mxu1 }
0x1092   :  { %v1658_v3 = vadd.f32 %v1657_v2, %v1583_v62  ;;  %v1659_v5 = vpop.f32.mrb[9].mxu1 }
0x1093   :  { %v1660_v6 = vadd.f32 %v1659_v5, %v1584_v63 }
0x1095   :  { %v1672_v7 = vcombine.low %v1658_v3, %v1660_v6  ;;  %v1673_v8 = vcombine.high %v1658_v3, %v1660_v6  ;;  %v1663_v11 = vpop.f32.mrb[10].mxu1 }
0x1096   :  { %v1664_v12 = vadd.f32 %v1663_v11, %v1583_v62  ;;  %v1665_v55 = vpop.f32.mrb[11].mxu1 }
0x1097   :  { %v1680_v4 = vrot.slane %v1672_v7, %v4209_v9  ;;  %v1687_v56 = vrot.slane %v1673_v8, %v4209_v9  ;;  %3284 = vst.sshfl [vmem:[#allocation2] sm:$0x33 pattern:$0x76325410] %v1672_v7  ;;  %v1666_v13 = vadd.f32 %v1665_v55, %v1584_v63 }
0x1098   :  { %3285 = vst.sshfl [vmem:[#allocation2 + $0x8] sm:$0x33 pattern:$0x76325410] %v1673_v8 }
0x1099   :  { %v1688_v16 = vcombine.high %v1680_v4, %v1680_v4  ;;  %v1689_v17 = vcombine.high %v1687_v56, %v1687_v56  ;;  %v1690_v18 = vcombine.low %v1664_v12, %v1666_v13  ;;  %v1691_v19 = vcombine.high %v1664_v12, %v1666_v13 }
0x109b   :  { %1717 = vst [vmem:[#allocation2 + $0x4] sm:$0xf] %v1688_v16  ;;  %1719 = vst [vmem:[#allocation2 + $0xc] sm:$0xf] %v1689_v17  ;;  %v1698_v22 = vrot.slane %v1690_v18, %v4209_v9  ;;  %v1705_v23 = vrot.slane %v1691_v19, %v4209_v9 }
0x109c   :  { %3286 = vst.sshfl [vmem:[#allocation2 + $0x10] sm:$0x33 pattern:$0x76325410] %v1690_v18 }
0x109d   :  { %3287 = vst.sshfl [vmem:[#allocation2 + $0x18] sm:$0x33 pattern:$0x76325410] %v1691_v19  ;;  %v1706_v24 = vcombine.high %v1698_v22, %v1698_v22  ;;  %v1707_v25 = vcombine.high %v1705_v23, %v1705_v23 }
0x109e   :  { %v3288_v28 = vld.sshfl [vmem:[#allocation2] sm:$0x33 pattern:$0x76325410] }
0x109f   :  { %1721 = vst [vmem:[#allocation2 + $0x14] sm:$0xf] %v1706_v24  ;;  %1723 = vst [vmem:[#allocation2 + $0x1c] sm:$0xf] %v1707_v25  ;;  %v1734_v40 = vcombine.high %v3288_v28, %v3288_v28 }
0x10a0   :  { %v3296_v29 = vld.sshfl [vmem:[#allocation2 + $0x8] sm:$0x33 pattern:$0x76325410] }
0x10a1   :  { %v1838_v44 = vcombine.high %v3296_v29, %v3296_v29 }
0x10a2   :  { %v3292_v33 = vld.sshfl [vmem:[#allocation2 + $0x4] sm:$0x33 pattern:$0x76325410] }
0x10a3   :  { %v1786_v39 = vcombine.high %v3292_v33, %v3292_v33  ;;  %v3300_v42 = vld.sshfl [vmem:[#allocation2 + $0xc] sm:$0x33 pattern:$0x76325410] }
0x10a4   :  { %v3293_v35 = vld.sshfl [vmem:[#allocation2 + $0x18] sm:$0x33 pattern:$0x76325410]  ;;  %v1890_v43 = vcombine.high %v3300_v42, %v3300_v42 }
0x10a5   :  { %v1797_v41 = vcombine.high %v3293_v35, %v3293_v35  ;;  %v1800_v36 = vsel %vm4303_vm1, %v3292_v33, %v3293_v35  ;;  %v1814_v0 = vsel %vm4303_vm1, %v3293_v35, %v3292_v33  ;;  %v3301_v37 = vld.sshfl [vmem:[#allocation2 + $0x10] sm:$0x33 pattern:$0x76325410] }
0x10a6   :  { %v3289_v45 = vld.sshfl [vmem:[#allocation2 + $0x1c] sm:$0x33 pattern:$0x76325410]  ;;  %v1901_v51 = vcombine.high %v3301_v37, %v3301_v37  ;;  %v1904_v54 = vsel %vm4303_vm1, %v3300_v42, %v3301_v37  ;;  %v1918_v2 = vsel %vm4303_vm1, %v3301_v37, %v3300_v42 }
0x10a7   :  { %v1801_v32 = vsel %vm4307_vm2, %v1786_v39, %v1797_v41  ;;  %v1815_v50 = vsel %vm4307_vm2, %v1797_v41, %v1786_v39  ;;  %v1745_v46 = vcombine.high %v3289_v45, %v3289_v45  ;;  %v1748_v47 = vsel %vm4303_vm1, %v3288_v28, %v3289_v45  ;;  %v3297_v57 = vld.sshfl [vmem:[#allocation2 + $0x14] sm:$0x33 pattern:$0x76325410] }
0x10a8   :  { %v1762_v48 = vsel %vm4303_vm1, %v3289_v45, %v3288_v28  ;;  %v1804_v53 = vcombine.low %v1800_v36, %v1801_v32  ;;  %v1818_v58 = vcombine.low %v1814_v0, %v1815_v50  ;;  %v1849_v59 = vcombine.high %v3297_v57, %v3297_v57 }
0x10a9   :  { %v1852_v60 = vsel %vm4303_vm1, %v3296_v29, %v3297_v57  ;;  %v1866_v61 = vsel %vm4303_vm1, %v3297_v57, %v3296_v29  ;;  %v1749_v30 = vsel %vm4307_vm2, %v1734_v40, %v1745_v46  ;;  %v1763_v62 = vsel %vm4307_vm2, %v1745_v46, %v1734_v40 }
0x10aa   :  { %v1905_v63 = vsel %vm4307_vm2, %v1890_v43, %v1901_v51  ;;  %3294 = vst.sshfl [vmem:[#allocation2 + $0x4] sm:$0x33 pattern:$0x76325410] %v1804_v53  ;;  %v1752_v3 = vcombine.low %v1748_v47, %v1749_v30  ;;  %v1766_v5 = vcombine.low %v1762_v48, %v1763_v62  ;;  %v1853_v6 = vsel %vm4307_vm2, %v1838_v44, %v1849_v59 }
0x10ab   :  { %3295 = vst.sshfl [vmem:[#allocation2 + $0x18] sm:$0x33 pattern:$0x76325410] %v1818_v58  ;;  %v1867_v7 = vsel %vm4307_vm2, %v1849_v59, %v1838_v44  ;;  %v1856_v8 = vcombine.low %v1852_v60, %v1853_v6  ;;  %v1908_v12 = vcombine.low %v1904_v54, %v1905_v63  ;;  %v1919_v55 = vsel %vm4307_vm2, %v1901_v51, %v1890_v43 }
0x10ac   :  { %v1870_v11 = vcombine.low %v1866_v61, %v1867_v7  ;;  %3291 = vst.sshfl [vmem:[#allocation2 + $0x1c] sm:$0x33 pattern:$0x76325410] %v1766_v5  ;;  %v1922_v4 = vcombine.low %v1918_v2, %v1919_v55 }
0x10ad   :  { %3290 = vst.sshfl [vmem:[#allocation2] sm:$0x33 pattern:$0x76325410] %v1752_v3 }
0x10ae   :  { %3299 = vst.sshfl [vmem:[#allocation2 + $0x14] sm:$0x33 pattern:$0x76325410] %v1870_v11 }
0x10af   :  { %3298 = vst.sshfl [vmem:[#allocation2 + $0x8] sm:$0x33 pattern:$0x76325410] %v1856_v8 }
0x10b0   :  { %3302 = vst.sshfl [vmem:[#allocation2 + $0xc] sm:$0x33 pattern:$0x76325410] %v1908_v12 }
0x10b1   :  { %3303 = vst.sshfl [vmem:[#allocation2 + $0x10] sm:$0x33 pattern:$0x76325410] %v1922_v4 }
0x10b2   :  { %v3307_v41 = vld.sshfl [vmem:[#allocation2 + $0x4] sm:$0x33 pattern:$0x76325410] }
0x10b3   :  { %v2069_v37 = vcombine.high %v3307_v41, %v3307_v41 }
0x10b4   :  { %v3304_v34 = vld.sshfl [vmem:[#allocation2] sm:$0x33 pattern:$0x76325410] }
0x10b5   :  { %v2027_v56 = vadd.f32 %v3304_v34, %v4479_v49  ;;  %v1957_v16 = vcombine.high %v3304_v34, %v3304_v34 }
0x10b6   :  { %v3311_v62 = vld.sshfl [vmem:[#allocation2 + $0x8] sm:$0x33 pattern:$0x76325410] }
0x10b7   :  { %v3305_v13 = vmul.f32 -1.442695, %v2027_v56  ;;  %v2029_v17 = vadd.f32 %v4481_v52, %v1957_v16  ;;  %v2184_v6 = vcombine.high %v3311_v62, %v3311_v62 }
0x10b9   :  { %3809 = vpow2.f32 %v3305_v13  ;;  %v3306_v24 = vmul.f32 -1.442695, %v2029_v17 }
0x10ba   :  { %3811 = vtanh.f32 %v2029_v17 }
0x10c3   :  { %v3810_v18 = vpop.eup %3809 }
0x10c4   :  { %v2034_v19 = vadd.f32 1.0, %v3810_v18  ;;  %v3812_v38 = vpop.eup %3811 }
0x10c6   :  { %3813 = vrcp.f32 %v2034_v19 }
0x10c7   :  { %3815 = vpow2.f32 %v3306_v24  ;;  %v3315_v24 = vld.sshfl [vmem:[#allocation2 + $0xc] sm:$0x33 pattern:$0x76325410] }
0x10d0   :  { %v3814_v22 = vpop.eup %3813 }
0x10d1   :  { %v2045_v23 = vmul.f32 %v3814_v22, %v3812_v38  ;;  %v3816_v25 = vpop.eup %3815  ;;  %v2044_v29 = vmul.f32 0.0, %v3814_v22 }
0x10d2   :  { %v2041_v28 = vadd.f32 1.0, %v3816_v25 }
0x10d3   :  { %2047 = vrot.lane.b32.xlu0 %v2045_v23, %s4065_s2 }
0x10d4   :  { %3817 = vrcp.f32 %v2041_v28 }
0x10de   :  { %v3818_v35 = vpop.eup %3817 }
0x1145   :  { %v2048_v49 = vpop.permute.xlu0 %2047 }
0x1146   :  { %v2050_v33 = vadd.f32 %v2048_v49, %v2044_v29 }
0x1148   :  { %3819 = vtanh.f32 %v2050_v33 }
0x1152   :  { %v3820_v52 = vpop.eup %3819 }
0x1153   :  { %v2052_v39 = vmul.f32 %v3820_v52, %v3818_v35 }
0x1155   :  { %2054 = vrot.lane.b32.xlu1 %v2052_v39, %s4065_s2 }
0x11c7   :  { %v2055_v40 = vpop.permute.xlu1 %2054 }
0x11c8   :  { %2057 = vst.msk [vmem:[#allocation4] sm:$0x3] %vm689_vm3, %v2055_v40  ;;  %3308 = vmatmul.mubr.msk.f32.vlgmr.msra.gmra.mrb[12].mxu1 %vm588_vm5, %v2055_v40 }
0x11c9   :  { %2059 = vst.msk [vmem:[#allocation4 + $0xe] sm:$0x3] %vm692_vm4, %v2055_v40  ;;  %3596 = vmatpush1.bf16.msra.mxu1 %v4427_v14  ;;  %2368 = vmatprep.mubr.f32.mxu1 %v4063_v1 }
0x11ca   :  { %3598 = vmatprep.subr.bf16.mxu1 %v4429_v15 }
0x11cd   :  { %3600 = vmatpush1.bf16.msra.mxu1 %v4434_v20 }
0x11ce   :  { %3602 = vmatprep.subr.bf16.mxu1 %v4437_v21 }
0x11d1   :  { %3604 = vmatpush1.bf16.msra.mxu1 %v4440_v26 }
0x11d2   :  { %3606 = vmatprep.subr.bf16.mxu1 %v4443_v27 }
0x11d5   :  { %3608 = vmatpush1.bf16.msra.mxu1 %v4446_v31 }
0x11d6   :  { %3626 = vmatprep.subr.bf16.mxu1 %v4425_v10 }
0x129b   :  { %v2140_v42 = vpop.f32.mrb[12].mxu1 }
0x129c   :  { %v2141_v36 = vadd.f32 %v3307_v41, %v2140_v42  ;;  %v2142_v0 = vpop.f32.mrb[13].mxu1 }
0x129d   :  { %v2143_v43 = vadd.f32 %v2142_v0, %v2069_v37 }
0x129e   :  { %v3309_v44 = vmul.f32 -1.442695, %v2141_v36 }
0x129f   :  { %v3310_v46 = vmul.f32 -1.442695, %v2143_v43 }
0x12a0   :  { %3821 = vpow2.f32 %v3309_v44 }
0x12a1   :  { %3823 = vtanh.f32 %v2143_v43 }
0x12aa   :  { %v3822_v45 = vpop.eup %3821 }
0x12ab   :  { %v2148_v32 = vadd.f32 1.0, %v3822_v45  ;;  %v3824_v50 = vpop.eup %3823 }
0x12ad   :  { %3825 = vrcp.f32 %v2148_v32 }
0x12ae   :  { %3827 = vpow2.f32 %v3310_v46 }
0x12b7   :  { %v3826_v51 = vpop.eup %3825 }
0x12b8   :  { %v2159_v54 = vmul.f32 %v3826_v51, %v3824_v50  ;;  %v3828_v47 = vpop.eup %3827  ;;  %v2158_v53 = vmul.f32 %v3826_v51, %v2050_v33  ;;  %v2299_v33 = vcombine.high %v3315_v24, %v3315_v24 }
0x12b9   :  { %v2155_v48 = vadd.f32 1.0, %v3828_v47 }
0x12ba   :  { %2161 = vrot.lane.b32.xlu0 %v2159_v54, %s4065_s2  ;;  %v3319_v54 = vld.sshfl [vmem:[#allocation2 + $0x10] sm:$0x33 pattern:$0x76325410] }
0x12bb   :  { %3829 = vrcp.f32 %v2155_v48 }
0x12c5   :  { %v3830_v59 = vpop.eup %3829 }
0x132c   :  { %v2162_v57 = vpop.permute.xlu0 %2161 }
0x132d   :  { %v2164_v58 = vadd.f32 %v2162_v57, %v2158_v53  ;;  %v2414_v57 = vcombine.high %v3319_v54, %v3319_v54 }
0x132f   :  { %3831 = vtanh.f32 %v2164_v58 }
0x1339   :  { %v3832_v60 = vpop.eup %3831 }
0x133a   :  { %v2166_v61 = vmul.f32 %v3832_v60, %v3830_v59 }
0x133c   :  { %2168 = vrot.lane.b32.xlu1 %v2166_v61, %s4065_s2 }
0x13ae   :  { %v2169_v30 = vpop.permute.xlu1 %2168 }
0x13af   :  { %2172 = vst.msk [vmem:[#allocation4 + $0x2] sm:$0x3] %vm689_vm3, %v2169_v30  ;;  %3312 = vmatmul.mubr.msk.f32.vlgmr.msra.gmra.mrb[14].mxu0 %vm588_vm5, %v2169_v30 }
0x13b0   :  { %2174 = vst.msk [vmem:[#allocation4 + $0xc] sm:$0x3] %vm692_vm4, %v2169_v30  ;;  %3612 = vmatpush1.bf16.msra.mxu0 %v4427_v14  ;;  %2483 = vmatprep.mubr.f32.mxu0 %v4063_v1 }
0x13b1   :  { %3614 = vmatprep.subr.bf16.mxu0 %v4429_v15 }
0x13b4   :  { %3616 = vmatpush1.bf16.msra.mxu0 %v4434_v20 }
0x13b5   :  { %3618 = vmatprep.subr.bf16.mxu0 %v4437_v21 }
0x13b8   :  { %3620 = vmatpush1.bf16.msra.mxu0 %v4440_v26 }
0x13b9   :  { %3622 = vmatprep.subr.bf16.mxu0 %v4443_v27 }
0x13bc   :  { %3624 = vmatpush1.bf16.msra.mxu0 %v4446_v31 }
0x13bd   :  { %3642 = vmatprep.subr.bf16.mxu0 %v4425_v10 }
0x1482   :  { %v2255_v63 = vpop.f32.mrb[14].mxu0 }
0x1483   :  { %v2256_v2 = vadd.f32 %v3311_v62, %v2255_v63  ;;  %v2257_v3 = vpop.f32.mrb[15].mxu0 }
0x1484   :  { %v2258_v7 = vadd.f32 %v2257_v3, %v2184_v6 }
0x1485   :  { %v3313_v5 = vmul.f32 -1.442695, %v2256_v2 }
0x1486   :  { %v3314_v34 = vmul.f32 -1.442695, %v2258_v7 }
0x1487   :  { %3833 = vpow2.f32 %v3313_v5 }
0x1488   :  { %3835 = vtanh.f32 %v2258_v7 }
0x1491   :  { %v3834_v8 = vpop.eup %3833 }
0x1492   :  { %v2263_v11 = vadd.f32 1.0, %v3834_v8  ;;  %v3836_v12 = vpop.eup %3835 }
0x1494   :  { %3837 = vrcp.f32 %v2263_v11 }
0x1495   :  { %3839 = vpow2.f32 %v3314_v34 }
0x149e   :  { %v3838_v55 = vpop.eup %3837 }
0x149f   :  { %v2274_v4 = vmul.f32 %v3838_v55, %v3836_v12  ;;  %v3840_v56 = vpop.eup %3839  ;;  %v2273_v16 = vmul.f32 %v3838_v55, %v2164_v58 }
0x14a0   :  { %v2270_v13 = vadd.f32 1.0, %v3840_v56 }
0x14a1   :  { %2276 = vrot.lane.b32.xlu0 %v2274_v4, %s4065_s2  ;;  %v3323_v4 = vld.sshfl [vmem:[#allocation2 + $0x14] sm:$0x33 pattern:$0x76325410] }
0x14a2   :  { %3841 = vrcp.f32 %v2270_v13 }
0x14ac   :  { %v3842_v19 = vpop.eup %3841 }
0x1513   :  { %v2277_v17 = vpop.permute.xlu0 %2276 }
0x1514   :  { %v2279_v18 = vadd.f32 %v2277_v17, %v2273_v16 }
0x1516   :  { %3843 = vtanh.f32 %v2279_v18 }
0x1520   :  { %v3844_v38 = vpop.eup %3843 }
0x1521   :  { %v2281_v22 = vmul.f32 %v3844_v38, %v3842_v19 }
0x1523   :  { %2283 = vrot.lane.b32.xlu1 %v2281_v22, %s4065_s2 }
0x1595   :  { %v2284_v23 = vpop.permute.xlu1 %2283 }
0x1596   :  { %2287 = vst.msk [vmem:[#allocation4 + $0x4] sm:$0x3] %vm689_vm3, %v2284_v23  ;;  %3316 = vmatmul.mubr.msk.f32.vlgmr.msra.gmra.mrb[14].mxu1 %vm588_vm5, %v2284_v23 }
0x1597   :  { %2289 = vst.msk [vmem:[#allocation4 + $0xa] sm:$0x3] %vm692_vm4, %v2284_v23  ;;  %3628 = vmatpush1.bf16.msra.mxu1 %v4427_v14  ;;  %2596 = vmatprep.mubr.f32.mxu1 %v4063_v1 }
0x1598   :  { %3630 = vmatprep.subr.bf16.mxu1 %v4429_v15 }
0x159b   :  { %3632 = vmatpush1.bf16.msra.mxu1 %v4434_v20 }
0x159c   :  { %3634 = vmatprep.subr.bf16.mxu1 %v4437_v21 }
0x159f   :  { %3636 = vmatpush1.bf16.msra.mxu1 %v4440_v26 }
0x15a0   :  { %3638 = vmatprep.subr.bf16.mxu1 %v4443_v27 }
0x15a3   :  { %3640 = vmatpush1.bf16.msra.mxu1 %v4446_v31 }
0x15a4   :  { %3658 = vmatprep.subr.bf16.mxu1 %v4425_v10 }
0x1669   :  { %v2370_v25 = vpop.f32.mrb[14].mxu1 }
0x166a   :  { %v2371_v28 = vadd.f32 %v3315_v24, %v2370_v25  ;;  %v2372_v29 = vpop.f32.mrb[15].mxu1 }
0x166b   :  { %v2373_v35 = vadd.f32 %v2372_v29, %v2299_v33 }
0x166c   :  { %v3317_v49 = vmul.f32 -1.442695, %v2371_v28 }
0x166d   :  { %v3318_v36 = vmul.f32 -1.442695, %v2373_v35 }
0x166e   :  { %3845 = vpow2.f32 %v3317_v49  ;;  %v3327_v49 = vld.sshfl [vmem:[#allocation2 + $0x18] sm:$0x33 pattern:$0x76325410] }
0x166f   :  { %3847 = vtanh.f32 %v2373_v35 }
0x1678   :  { %v3846_v52 = vpop.eup %3845 }
0x1679   :  { %v2378_v39 = vadd.f32 1.0, %v3846_v52  ;;  %v3848_v40 = vpop.eup %3847 }
0x167b   :  { %3849 = vrcp.f32 %v2378_v39 }
0x167c   :  { %3851 = vpow2.f32 %v3318_v36 }
0x1685   :  { %v3850_v41 = vpop.eup %3849 }
0x1686   :  { %v2389_v42 = vmul.f32 %v3850_v41, %v3848_v40  ;;  %v3852_v10 = vpop.eup %3851  ;;  %v2388_v44 = vmul.f32 %v3850_v41, %v2279_v18  ;;  %v2640_v40 = vcombine.high %v3327_v49, %v3327_v49 }
0x1687   :  { %v2385_v0 = vadd.f32 1.0, %v3852_v10 }
0x1688   :  { %2391 = vrot.lane.b32.xlu0 %v2389_v42, %s4065_s2 }
0x1689   :  { %3853 = vrcp.f32 %v2385_v0 }
0x1693   :  { %v3854_v45 = vpop.eup %3853 }
0x16fa   :  { %v2392_v37 = vpop.permute.xlu0 %2391 }
0x16fb   :  { %v2394_v43 = vadd.f32 %v2392_v37, %v2388_v44 }
0x16fd   :  { %3855 = vtanh.f32 %v2394_v43 }
0x1707   :  { %v3856_v32 = vpop.eup %3855 }
0x1708   :  { %v2396_v50 = vmul.f32 %v3856_v32, %v3854_v45 }
0x170a   :  { %2398 = vrot.lane.b32.xlu1 %v2396_v50, %s4065_s2 }
0x177c   :  { %v2399_v51 = vpop.permute.xlu1 %2398 }
0x177d   :  { %2402 = vst.msk [vmem:[#allocation4 + $0x6] sm:$0x3] %vm689_vm3, %v2399_v51  ;;  %3320 = vmatmul.mubr.msk.f32.vlgmr.msra.gmra.mrb[16].mxu0 %vm588_vm5, %v2399_v51 }
0x177e   :  { %2404 = vst.msk [vmem:[#allocation4 + $0x8] sm:$0x3] %vm692_vm4, %v2399_v51  ;;  %3644 = vmatpush1.bf16.msra.mxu0 %v4427_v14  ;;  %2709 = vmatprep.mubr.f32.mxu0 %v4063_v1 }
0x177f   :  { %3646 = vmatprep.subr.bf16.mxu0 %v4429_v15 }
0x1782   :  { %3648 = vmatpush1.bf16.msra.mxu0 %v4434_v20 }
0x1783   :  { %3650 = vmatprep.subr.bf16.mxu0 %v4437_v21 }
0x1786   :  { %3652 = vmatpush1.bf16.msra.mxu0 %v4440_v26 }
0x1787   :  { %3654 = vmatprep.subr.bf16.mxu0 %v4443_v27 }
0x178a   :  { %3656 = vmatpush1.bf16.msra.mxu0 %v4446_v31 }
0x1850   :  { %v2485_v46 = vpop.f32.mrb[16].mxu0 }
0x1851   :  { %v2486_v47 = vadd.f32 %v3319_v54, %v2485_v46  ;;  %v2487_v48 = vpop.f32.mrb[17].mxu0 }
0x1852   :  { %v2488_v58 = vadd.f32 %v2487_v48, %v2414_v57 }
0x1853   :  { %v3321_v53 = vmul.f32 -1.442695, %v2486_v47 }
0x1854   :  { %v3322_v63 = vmul.f32 -1.442695, %v2488_v58 }
0x1855   :  { %3857 = vpow2.f32 %v3321_v53  ;;  %v3331_v53 = vld.sshfl [vmem:[#allocation2 + $0x1c] sm:$0x33 pattern:$0x76325410] }
0x1856   :  { %3859 = vtanh.f32 %v2488_v58 }
0x185f   :  { %v3858_v59 = vpop.eup %3857 }
0x1860   :  { %v2493_v60 = vadd.f32 1.0, %v3858_v59  ;;  %v3860_v61 = vpop.eup %3859 }
0x1862   :  { %3861 = vrcp.f32 %v2493_v60 }
0x1863   :  { %3863 = vpow2.f32 %v3322_v63 }
0x186c   :  { %v3862_v30 = vpop.eup %3861 }
0x186d   :  { %v2504_v62 = vmul.f32 %v3862_v30, %v3860_v61  ;;  %v3864_v2 = vpop.eup %3863  ;;  %v2503_v5 = vmul.f32 %v3862_v30, %v2394_v43  ;;  %v2753_v61 = vcombine.high %v3331_v53, %v3331_v53 }
0x186e   :  { %v2500_v3 = vadd.f32 1.0, %v3864_v2 }
0x186f   :  { %2506 = vrot.lane.b32.xlu0 %v2504_v62, %s4065_s2 }
0x1870   :  { %3865 = vrcp.f32 %v2500_v3 }
0x187a   :  { %v3866_v8 = vpop.eup %3865 }
0x18e1   :  { %v2507_v6 = vpop.permute.xlu0 %2506 }
0x18e2   :  { %v2509_v7 = vadd.f32 %v2507_v6, %v2503_v5  ;;  %v2865_v6 = vld [vmem:[%s4746_s7] sm:$0xff] }
0x18e4   :  { %3867 = vtanh.f32 %v2509_v7 }
0x18ee   :  { %v3868_v11 = vpop.eup %3867 }
0x18ef   :  { %v2511_v12 = vmul.f32 %v3868_v11, %v3866_v8 }
0x18f1   :  { %2513 = vrot.lane.b32.xlu1 %v2511_v12, %s4065_s2 }
0x1963   :  { %v2514_v55 = vpop.permute.xlu1 %2513 }
0x1964   :  { %2516 = vst.msk [vmem:[#allocation4 + $0x8] sm:$0x3] %vm689_vm3, %v2514_v55  ;;  %3324 = vmatmul.mubr.msk.f32.vlgmr.msra.gmra.mrb[16].mxu1 %vm588_vm5, %v2514_v55 }
0x1965   :  { %2517 = vst.msk [vmem:[#allocation4 + $0x6] sm:$0x3] %vm692_vm4, %v2514_v55  ;;  %3660 = vmatpush1.bf16.msra.mxu1 %v4427_v14  ;;  %2822 = vmatprep.mubr.f32.mxu1 %v4063_v1  ;;  %v2527_v14 = vcombine.high %v3323_v4, %v3323_v4 }
0x1966   :  { %3662 = vmatprep.subr.bf16.mxu1 %v4429_v15 }
0x1969   :  { %3664 = vmatpush1.bf16.msra.mxu1 %v4434_v20 }
0x196a   :  { %3666 = vmatprep.subr.bf16.mxu1 %v4437_v21 }
0x196d   :  { %3668 = vmatpush1.bf16.msra.mxu1 %v4440_v26 }
0x196e   :  { %3670 = vmatprep.subr.bf16.mxu1 %v4443_v27 }
0x1971   :  { %3672 = vmatpush1.bf16.msra.mxu1 %v4446_v31 }
0x1a37   :  { %v2598_v34 = vpop.f32.mrb[16].mxu1 }
0x1a38   :  { %v2599_v56 = vadd.f32 %v3323_v4, %v2598_v34  ;;  %v2600_v13 = vpop.f32.mrb[17].mxu1 }
0x1a39   :  { %v2601_v17 = vadd.f32 %v2600_v13, %v2527_v14  ;;  %v2867_v13 = vld [vmem:[%s4746_s7 + $0x10] sm:$0xff]  ;;  %v2869_v14 = vld [vmem:[%s4746_s7 + $0x20] sm:$0xff] }
0x1a3a   :  { %v3325_v16 = vmul.f32 -1.442695, %v2599_v56 }
0x1a3b   :  { %v3326_v26 = vmul.f32 -1.442695, %v2601_v17 }
0x1a3c   :  { %3869 = vpow2.f32 %v3325_v16  ;;  %v2868_v16 = vld [vmem:[%s4746_s7 + $0x18] sm:$0xff] }
0x1a3d   :  { %3871 = vtanh.f32 %v2601_v17  ;;  %v3677_v17 = vpack.c.bf16 %v2868_v16, %v2867_v13 }
0x1a46   :  { %v3870_v18 = vpop.eup %3869 }
0x1a47   :  { %v2606_v15 = vadd.f32 1.0, %v3870_v18  ;;  %v3872_v20 = vpop.eup %3871  ;;  %v2870_v18 = vld [vmem:[%s4746_s7 + $0x28] sm:$0xff] }
0x1a49   :  { %3873 = vrcp.f32 %v2606_v15  ;;  %v3681_v15 = vpack.c.bf16 %v2870_v18, %v2869_v14 }
0x1a4a   :  { %3875 = vpow2.f32 %v3326_v26 }
0x1a53   :  { %v3874_v21 = vpop.eup %3873 }
0x1a54   :  { %v2617_v19 = vmul.f32 %v3874_v21, %v3872_v20  ;;  %v3876_v27 = vpop.eup %3875  ;;  %v2616_v38 = vmul.f32 %v3874_v21, %v2509_v7  ;;  %v2866_v7 = vld [vmem:[%s4746_s7 + $0x8] sm:$0xff]  ;;  %v2871_v20 = vld [vmem:[%s4746_s7 + $0x30] sm:$0xff]  ;;  %v2872_v21 = vld [vmem:[%s4746_s7 + $0x38] sm:$0xff] }
0x1a55   :  { %v2613_v31 = vadd.f32 1.0, %v3876_v27  ;;  %v3673_v8 = vpack.c.bf16 %v2866_v7, %v2865_v6 }
0x1a56   :  { %2619 = vrot.lane.b32.xlu0 %v2617_v19, %s4065_s2  ;;  %v3685_v19 = vpack.c.bf16 %v2872_v21, %v2871_v20 }
0x1a57   :  { %3877 = vrcp.f32 %v2613_v31  ;;  %3674 = vmatprep.subr.bf16.mxu0 %v3673_v8 }
0x1a61   :  { %v3878_v24 = vpop.eup %3877 }
0x1ac8   :  { %v2620_v22 = vpop.permute.xlu0 %2619 }
0x1ac9   :  { %v2622_v23 = vadd.f32 %v2620_v22, %v2616_v38 }
0x1acb   :  { %3879 = vtanh.f32 %v2622_v23 }
0x1ad5   :  { %v3880_v25 = vpop.eup %3879 }
0x1ad6   :  { %v2624_v28 = vmul.f32 %v3880_v25, %v3878_v24  ;;  %v4640_v24 = vld [vmem:[#allocation4 + $0x6] sm:$0x3]  ;;  %v4642_v25 = vld [vmem:[#allocation4 + $0x8] sm:$0x3] }
0x1ad8   :  { %2626 = vrot.lane.b32.xlu1 %v2624_v28, %s4065_s2 }
0x1b4a   :  { %v2627_v29 = vpop.permute.xlu1 %2626 }
0x1b4b   :  { %2629 = vst.msk [vmem:[#allocation4 + $0xa] sm:$0x3] %vm689_vm3, %v2627_v29  ;;  %3328 = vmatmul.mubr.msk.f32.vlgmr.msra.gmra.mrb[18].mxu0 %vm588_vm5, %v2627_v29 }
0x1b4c   :  { %2630 = vst.msk [vmem:[#allocation4 + $0x4] sm:$0x3] %vm692_vm4, %v2627_v29  ;;  %3676 = vmatpush3.bf16.msra.mxu0 %v3673_v8 }
0x1b4d   :  { %3678 = vmatprep.subr.bf16.mxu0 %v3677_v17 }
0x1b50   :  { %3680 = vmatpush3.bf16.msra.mxu0 %v3677_v17 }
0x1b51   :  { %3682 = vmatprep.subr.bf16.mxu0 %v3681_v15 }
0x1b53   :  { %v4636_v22 = vld [vmem:[#allocation4 + $0x4] sm:$0x3] }
0x1b54   :  { %3684 = vmatpush3.bf16.msra.mxu0 %v3681_v15  ;;  %v2888_v29 = vcombine.low %v4636_v22, %v4640_v24 }
0x1b55   :  { %3686 = vmatprep.subr.bf16.mxu0 %v3685_v19 }
0x1b58   :  { %3688 = vmatpush3.bf16.msra.mxu0 %v3685_v19 }
0x1c1e   :  { %v2711_v33 = vpop.f32.mrb[18].mxu0 }
0x1c1f   :  { %v2712_v35 = vadd.f32 %v3327_v49, %v2711_v33  ;;  %v2713_v52 = vpop.f32.mrb[19].mxu0 }
0x1c20   :  { %v2714_v41 = vadd.f32 %v2713_v52, %v2640_v40 }
0x1c21   :  { %v3329_v39 = vmul.f32 -1.442695, %v2712_v35 }
0x1c22   :  { %v3330_v37 = vmul.f32 -1.442695, %v2714_v41 }
0x1c23   :  { %3881 = vpow2.f32 %v3329_v39 }
0x1c24   :  { %3883 = vtanh.f32 %v2714_v41 }
0x1c2d   :  { %v3882_v42 = vpop.eup %3881 }
0x1c2e   :  { %v2719_v36 = vadd.f32 1.0, %v3882_v42  ;;  %v3884_v10 = vpop.eup %3883  ;;  %v2902_v42 = vrot.slane %v2888_v29, %v4209_v9 }
0x1c30   :  { %3885 = vrcp.f32 %v2719_v36 }
0x1c31   :  { %3887 = vpow2.f32 %v3330_v37  ;;  %v3122_v37 = vld [vmem:[%s4748_s9] sm:$0xff] }
0x1c3a   :  { %v3886_v0 = vpop.eup %3885 }
0x1c3b   :  { %v2730_v44 = vmul.f32 %v3886_v0, %v3884_v10  ;;  %v3888_v43 = vpop.eup %3887  ;;  %v2729_v32 = vmul.f32 %v3886_v0, %v2622_v23  ;;  %v4638_v23 = vld [vmem:[#allocation4 + $0xa] sm:$0x3] }
0x1c3c   :  { %v2726_v45 = vadd.f32 1.0, %v3888_v43  ;;  %v2904_v49 = vcombine.low %v4642_v25, %v4638_v23  ;;  %v3123_v43 = vld [vmem:[%s4748_s9 + $0x8] sm:$0xff] }
0x1c3d   :  { %2732 = vrot.lane.b32.xlu0 %v2730_v44, %s4065_s2 }
0x1c3e   :  { %3889 = vrcp.f32 %v2726_v45  ;;  %v2912_v36 = vrot.slane %v2904_v49, %v4209_v9  ;;  %v3124_v45 = vld [vmem:[%s4748_s9 + $0x10] sm:$0xff] }
0x1c48   :  { %v3890_v54 = vpop.eup %3889 }
0x1caf   :  { %v2733_v50 = vpop.permute.xlu0 %2732 }
0x1cb0   :  { %v2735_v51 = vadd.f32 %v2733_v50, %v2729_v32  ;;  %v4066_v32 = vmov 0.0|0.0   ;;  %v3690_v50 = vpack.c.bf16 %v3123_v43, %v3122_v37 }
0x1cb1   :  { %3689 = vmatprep.subr.bf16.mxu1 %v4066_v32 }
0x1cb2   :  { %3891 = vtanh.f32 %v2735_v51 }
0x1cbc   :  { %v3892_v46 = vpop.eup %3891 }
0x1cbd   :  { %v2737_v47 = vmul.f32 %v3892_v46, %v3890_v54  ;;  %v3126_v46 = vld [vmem:[%s4748_s9 + $0x20] sm:$0xff] }
0x1cbf   :  { %2739 = vrot.lane.b32.xlu1 %v2737_v47, %s4065_s2  ;;  %v3127_v47 = vld [vmem:[%s4748_s9 + $0x28] sm:$0xff] }
0x1d31   :  { %v2740_v48 = vpop.permute.xlu1 %2739 }
0x1d32   :  { %2742 = vst.msk [vmem:[#allocation4 + $0xc] sm:$0x3] %vm689_vm3, %v2740_v48  ;;  %3332 = vmatmul.mubr.msk.f32.vlgmr.msra.gmra.mrb[18].mxu1 %vm588_vm5, %v2740_v48 }
0x1d33   :  { %2743 = vst.msk [vmem:[#allocation4 + $0x2] sm:$0x3] %vm692_vm4, %v2740_v48  ;;  %3394 = vmatprep.mubr.msk.f32.mxu1 %vm4067_vm6, %v4063_v1  ;;  %3691 = vmatpush3.bf16.msra.mxu1 %v3690_v50  ;;  %v3696_v48 = vpack.c.bf16 %v3127_v47, %v3126_v46  ;;  %v3129_v1 = vld [vmem:[%s4748_s9 + $0x38] sm:$0xff] }
0x1d34   :  { %3692 = vmatprep.subr.bf16.mxu1 %v4066_v32 }
0x1d39   :  { %v4652_v35 = vld [vmem:[#allocation4 + $0xc] sm:$0x3] }
0x1d3a   :  { %v4644_v28 = vld [vmem:[#allocation4 + $0x2] sm:$0x3] }
0x1e05   :  { %v2824_v57 = vpop.f32.mrb[18].mxu1 }
0x1e06   :  { %v2825_v58 = vadd.f32 %v3331_v53, %v2824_v57  ;;  %v2826_v59 = vpop.f32.mrb[19].mxu1  ;;  %v3128_v53 = vld [vmem:[%s4748_s9 + $0x30] sm:$0xff] }
0x1e07   :  { %v2827_v30 = vadd.f32 %v2826_v59, %v2753_v61  ;;  %v3699_v57 = vpack.c.bf16 %v3129_v1, %v3128_v53 }
0x1e08   :  { %v3333_v60 = vmul.f32 -1.442695, %v2825_v58  ;;  %v3335_v58 = vld [vmem:[%s4747_s8] ss:$0 sm:$0xff] }
0x1e09   :  { %v3334_v11 = vmul.f32 -1.442695, %v2827_v30  ;;  %v2921_v59 = vcombine.low %v3335_v58, %v3335_v58 }
0x1e0a   :  { %3893 = vpow2.f32 %v3333_v60 }
0x1e0b   :  { %3895 = vtanh.f32 %v2827_v30  ;;  %v2928_v60 = vrot.slane %v2921_v59, %v4209_v9 }
0x1e0d   :  { %v2929_v61 = vcombine.low %v2928_v60, %v2928_v60 }
0x1e14   :  { %v3894_v62 = vpop.eup %3893 }
0x1e15   :  { %v2832_v63 = vadd.f32 1.0, %v3894_v62  ;;  %v3896_v2 = vpop.eup %3895 }
0x1e17   :  { %3897 = vrcp.f32 %v2832_v63 }
0x1e18   :  { %3899 = vpow2.f32 %v3334_v11 }
0x1e21   :  { %v3898_v3 = vpop.eup %3897 }
0x1e22   :  { %v2843_v5 = vmul.f32 %v3898_v3, %v3896_v2  ;;  %v3900_v12 = vpop.eup %3899  ;;  %v2842_v4 = vmul.f32 %v3898_v3, %v2735_v51  ;;  %v3125_v51 = vld [vmem:[%s4748_s9 + $0x18] sm:$0xff] }
0x1e23   :  { %v2839_v55 = vadd.f32 1.0, %v3900_v12  ;;  %v3693_v54 = vpack.c.bf16 %v3125_v51, %v3124_v45 }
0x1e24   :  { %2845 = vrot.lane.b32.xlu0 %v2843_v5, %s4065_s2 }
0x1e25   :  { %3901 = vrcp.f32 %v2839_v55  ;;  %3694 = vmatpush3.bf16.msra.mxu1 %v3693_v54 }
0x1e26   :  { %3695 = vmatprep.subr.bf16.mxu1 %v4066_v32 }
0x1e29   :  { %3697 = vmatpush3.bf16.msra.mxu1 %v3696_v48 }
0x1e2a   :  { %3698 = vmatprep.subr.bf16.mxu1 %v4066_v32 }
0x1e2d   :  { %3700 = vmatpush3.bf16.msra.mxu1 %v3699_v57 }
0x1e2f   :  { %v3902_v26 = vpop.eup %3901 }
0x1e96   :  { %v2846_v34 = vpop.permute.xlu0 %2845 }
0x1e97   :  { %v2848_v56 = vadd.f32 %v2846_v34, %v2842_v4 }
0x1e99   :  { %3903 = vtanh.f32 %v2848_v56 }
0x1ea3   :  { %v3904_v27 = vpop.eup %3903 }
0x1ea4   :  { %v2850_v31 = vmul.f32 %v3904_v27, %v3902_v26 }
0x1ea6   :  { %2852 = vrot.lane.b32.xlu1 %v2850_v31, %s4065_s2 }
0x1f18   :  { %v2853_v38 = vpop.permute.xlu1 %2852 }
0x1f19   :  { %2855 = vst.msk [vmem:[#allocation4 + $0xe] sm:$0x3] %vm689_vm3, %v2853_v38 }
0x1f1a   :  { %2856 = vst.msk [vmem:[#allocation4] sm:$0x3] %vm692_vm4, %v2853_v38 }
0x1f20   :  { %v4654_v52 = vld [vmem:[#allocation4 + $0xe] sm:$0x3] }
0x1f21   :  { %v4650_v33 = vld [vmem:[#allocation4] sm:$0x3]  ;;  %v2905_v40 = vcombine.low %v4652_v35, %v4654_v52 }
0x1f22   :  { %v2887_v39 = vcombine.low %v4650_v33, %v4644_v28 }
0x1f23   :  { %v2919_v10 = vrot.slane %v2905_v40, %v4209_v9 }
0x1f24   :  { %v2895_v41 = vrot.slane %v2887_v39, %v4209_v9 }
0x1f25   :  { %v2920_v44 = vcombine.low %v2912_v36, %v2919_v10 }
0x1f26   :  { %v2903_v0 = vcombine.low %v2895_v41, %v2902_v42 }
0x1f28   :  { %3375 = vmatprep.mubr.msk.f32.mxu0 %vm588_vm5, %v2903_v0 }
0x1f29   :  { %3376 = vmatmul.mubr.msk.f32.vlgmr.msra.gmra.mrb[20].mxu0 %vm588_vm5, %v2920_v44 }
0x1ffc   :  { %v3377_v30 = vpop.f32.mrb[20].mxu0 }
0x1ffd   :  { %v3007_v62 = vadd.f32 %v3377_v30, %v2929_v61  ;;  %v3001_v63 = vpop.f32.mrb[21].mxu0 }
0x1ffe   :  { %v3002_v2 = vadd.f32 %v3001_v63, %v2929_v61 }
0x1fff   :  { %v3029_v3 = vcombine.high %v3007_v62, %v3007_v62  ;;  %v3036_v5 = vrot.slane %v3007_v62, %v4209_v9 }
0x2000   :  { %v3012_v6 = vcombine.high %v3002_v2, %v3002_v2  ;;  %v3019_v7 = vrot.slane %v3002_v2, %v4209_v9 }
0x2001   :  { %v3043_v8 = vrot.slane %v3029_v3, %v4209_v9  ;;  %v3044_v11 = vcombine.high %v3036_v5, %v3036_v5  ;;  %3905 = vtanh.f32 %v3036_v5 }
0x2002   :  { %v3026_v12 = vrot.slane %v3012_v6, %v4209_v9  ;;  %v3027_v55 = vcombine.high %v3019_v7, %v3019_v7  ;;  %3907 = vtanh.f32 %v3019_v7 }
0x2003   :  { %3909 = vtanh.f32 %v3044_v11  ;;  %v3045_v34 = vcombine.high %v3043_v8, %v3043_v8 }
0x2004   :  { %v3028_v4 = vcombine.high %v3026_v12, %v3026_v12  ;;  %3911 = vtanh.f32 %v3043_v8 }
0x2005   :  { %3913 = vtanh.f32 %v3027_v55 }
0x2006   :  { %3915 = vtanh.f32 %v3026_v12 }
0x2007   :  { %3917 = vtanh.f32 %v3028_v4 }
0x2008   :  { %3919 = vtanh.f32 %v3045_v34 }
0x200b   :  { %v3906_v56 = vpop.eup %3905 }
0x200c   :  { %v3908_v13 = vpop.eup %3907  ;;  %v3070_v17 = vmul.f32 1.442695, %v3906_v56 }
0x200d   :  { %v3062_v16 = vmul.f32 1.442695, %v3908_v13  ;;  %v3910_v14 = vpop.eup %3909 }
0x200e   :  { %v3912_v18 = vpop.eup %3911  ;;  %v3072_v26 = vmul.f32 1.442695, %v3910_v14 }
0x200f   :  { %3921 = vpow2.f32 %v3062_v16  ;;  %v3914_v15 = vpop.eup %3913  ;;  %v3074_v38 = vmul.f32 1.442695, %v3912_v18 }
0x2010   :  { %v3916_v20 = vpop.eup %3915  ;;  %v3064_v9 = vmul.f32 1.442695, %v3914_v15  ;;  %3923 = vpow2.f32 %v3070_v17 }
0x2011   :  { %v3918_v21 = vpop.eup %3917  ;;  %v3066_v19 = vmul.f32 1.442695, %v3916_v20 }
0x2012   :  { %3925 = vpow2.f32 %v3064_v9  ;;  %v3068_v27 = vmul.f32 1.442695, %v3918_v21  ;;  %v3920_v31 = vpop.eup %3919 }
0x2013   :  { %3927 = vpow2.f32 %v3066_v19  ;;  %v3076_v29 = vmul.f32 1.442695, %v3920_v31 }
0x2014   :  { %3929 = vpow2.f32 %v3068_v27 }
0x2015   :  { %3931 = vpow2.f32 %v3072_v26 }
0x2016   :  { %3933 = vpow2.f32 %v3074_v38 }
0x2017   :  { %3935 = vpow2.f32 %v3076_v29 }
0x2019   :  { %v3922_v49 = vpop.eup %3921 }
0x201a   :  { %v3924_v39 = vpop.eup %3923  ;;  %v3094_v40 = vmul.f32 %v3922_v49, %v4650_v33  ;;  %v3079_v36 = vsel %vm3078_vm7, %v3922_v49, 0.0 }
0x201b   :  { %v3098_v47 = vmul.f32 %v3924_v39, %v4642_v25  ;;  %v3086_v57 = vsel %vm3078_vm7, %v3924_v39, 0.0 }
0x201c   :  { %v3926_v41 = vpop.eup %3925  ;;  %v3102_v50 = vsel %vm3078_vm7, %v3094_v40, 0.0 }
0x201d   :  { %v3928_v42 = vpop.eup %3927  ;;  %v3080_v10 = vsel %vm3078_vm7, %v3926_v41, 0.0  ;;  %v3095_v0 = vmul.f32 %v3926_v41, %v4644_v28  ;;  %v3109_v25 = vsel %vm3078_vm7, %v3098_v47, 0.0 }
0x201e   :  { %v3930_v44 = vpop.eup %3929  ;;  %v3081_v37 = vadd.f32 %v3080_v10, %v3079_v36  ;;  %v3096_v43 = vmul.f32 %v3928_v42, %v4636_v22  ;;  %v3082_v45 = vsel %vm3078_vm7, %v3928_v42, 0.0 }
0x201f   :  { %v3097_v32 = vmul.f32 %v3930_v44, %v4640_v24  ;;  %v3103_v33 = vsel %vm3078_vm7, %v3095_v0, 0.0  ;;  %v3932_v51 = vpop.eup %3931  ;;  %v3084_v48 = vsel %vm3078_vm7, %v3930_v44, 0.0 }
0x2020   :  { %v3083_v54 = vadd.f32 %v3082_v45, %v3081_v37  ;;  %v3104_v46 = vadd.f32 %v3103_v33, %v3102_v50  ;;  %v3105_v28 = vsel %vm3078_vm7, %v3096_v43, 0.0  ;;  %v3934_v53 = vpop.eup %3933  ;;  %v3099_v24 = vmul.f32 %v3932_v51, %v4638_v23 }
0x2021   :  { %v3107_v58 = vsel %vm3078_vm7, %v3097_v32, 0.0  ;;  %v3936_v59 = vpop.eup %3935  ;;  %v3088_v30 = vsel %vm3078_vm7, %v3932_v51, 0.0  ;;  %v3100_v62 = vmul.f32 %v3934_v53, %v4652_v35  ;;  %v3090_v3 = vsel %vm3078_vm7, %v3934_v53, 0.0 }
0x2022   :  { %v3085_v1 = vadd.f32 %v3084_v48, %v3083_v54  ;;  %v3106_v22 = vadd.f32 %v3105_v28, %v3104_v46  ;;  %v3101_v5 = vmul.f32 %v3936_v59, %v4654_v52  ;;  %v3111_v6 = vsel %vm3078_vm7, %v3099_v24, 0.0  ;;  %v3338_v52 = vld [vmem:[%s4749_s10] ss:$0 sm:$0xff] }
0x2023   :  { %v3092_v8 = vsel %vm3078_vm7, %v3936_v59, 0.0  ;;  %v3113_v11 = vsel %vm3078_vm7, %v3100_v62, 0.0 }
0x2024   :  { %v3087_v60 = vadd.f32 %v3086_v57, %v3085_v1  ;;  %v3108_v61 = vadd.f32 %v3107_v58, %v3106_v22  ;;  %v3115_v4 = vsel %vm3078_vm7, %v3101_v5, 0.0 }
0x2026   :  { %v3089_v63 = vadd.f32 %v3088_v30, %v3087_v60  ;;  %v3110_v2 = vadd.f32 %v3109_v25, %v3108_v61 }
0x2028   :  { %v3091_v23 = vadd.f32 %v3090_v3, %v3089_v63  ;;  %v3112_v7 = vadd.f32 %v3111_v6, %v3110_v2 }
0x202a   :  { %v3093_v12 = vadd.f32 %v3092_v8, %v3091_v23  ;;  %v3114_v55 = vadd.f32 %v3113_v11, %v3112_v7 }
0x202c   :  { %v3116_v34 = vadd.f32 %v3115_v4, %v3114_v55  ;;  %3937 = vrcp.f32 %v3093_v12 }
0x2036   :  { %v3938_v35 = vpop.eup %3937 }
0x2037   :  { %v3118_v56 = vmul.f32 %v3938_v35, %v3093_v12 }
0x2039   :  { %v3119_v13 = vsub.f32 2.0, %v3118_v56 }
0x203b   :  { %v3120_v16 = vmul.f32 %v3938_v35, %v3119_v13 }
0x203d   :  { %v3121_v14 = vmul.f32 %v3120_v16, %v3116_v34 }
0x203f   :  { %3395 = vmatmul.mubr.msk.f32.vlgmr.msra.gmra.mrb[20].mxu1 %vm588_vm5, %v3121_v14 }
0x2112   :  { %v3206_v17 = vpop.f32.mrb[20].mxu1 }
0x2113   :  { %v3207_v18 = vadd.f32 %v3338_v52, %v3206_v17  ;;  %v3396_v15 = vpop.f32.mrb[21].mxu1 }
0x2115   :  { %3211 = vst.msk [vmem:[#allocation13] sm:$0x3] %vm3210_vm8, %v3207_v18 }
0x2116   :  { %4038 = shalt.err (!%p4035_p8)
}
0x2117   :  { %s4039_s15 = scalar_lea.hbm %s4750_s11, 32 }
0x2118   :  { %p4040_p9 = scmp.ne.s32.totalorder %s4750_s11, %s4039_s15  ;;  %p4043_p10 = scmp.lt.u32.totalorder %s4039_s15, %s4750_s11 }
0x211a   :  { %p4045_p11 = pnand %p4043_p10, %p4040_p9 }
0x211c   :  { %4048 = shalt.err (!%p4045_p11)
}
0x211d   :  { %3221 = dma.vmem_to_hbm [thread:$0]  %s3219_s27, 32, %s4750_s11, [#allocation7]  }
0x211e   :  { %4055 = dma.done.wait [#allocation7], 32  }
0x211f   :  { %4056 = vsyncadd [#allocation7], 4294967264 }
0x2120   :  { %3225 = vsyncpa [#allocation6], 1 }
0x2121   :  { %3226 = vsyncpa [#allocation9], 1 }
0x2122   :  { %3227 = vsyncpa [#allocation12], 1 }
0x2123   :  { %3228 = vsyncpa [#allocation7], 1 }

</bundles_post_ra>
